<compile_context>
chip_gen: v6e
topology: v6e:2x2x1
jax: 0.10.0
libtpu: 0.0.40
codegen_flags: <defaults>
</compile_context>

<pallas_src>
import functools
import math

import jax
import jax.numpy as jnp
from jax import lax
from jax.experimental import pallas as pl
from jax.experimental.pallas import tpu as pltpu


_MASK_VALUE = -1e30  # large finite negative: avoids inf-inf -> NaN in online softmax


def _layernorm(v, w, b, eps=1e-5):
    mu = jnp.mean(v, axis=-1, keepdims=True)
    c = v - mu
    var = jnp.mean(c * c, axis=-1, keepdims=True)
    return c * lax.rsqrt(var + eps) * w + b


# -----------------------------------------------------------------------------
# Kernel 1: LN1 + fused QKV projection, written head-major (B, H, T, D) in bf16.
# -----------------------------------------------------------------------------
def _qkv_kernel(x_ref, ln1w_ref, ln1b_ref, wqkv_ref, bqkv_ref,
                q_ref, k_ref, v_ref, *, num_heads, scale):
    x = x_ref[0]                                   # (tr, C) f32
    C = x.shape[-1]
    H = num_heads
    D = C // H

    xn = _layernorm(x, ln1w_ref[0], ln1b_ref[0])
    # One lane-dense (tr, 3C) matmul keeps the MXU output width full.
    qkv = jnp.dot(xn.astype(jnp.bfloat16), wqkv_ref[...],
                  preferred_element_type=jnp.float32) + bqkv_ref[0]

    q = qkv[:, 0 * C:1 * C] * scale                # fold 1/sqrt(D) into q once
    k = qkv[:, 1 * C:2 * C]
    v = qkv[:, 2 * C:3 * C]

    # Head-major stores: flash kernel then reads/writes full-D lane slabs.
    # Static loop: H is small and each slice is stored immediately (bounded live).
    for h in range(H):
        sl = slice(h * D, (h + 1) * D)
        q_ref[0, h, :, :] = q[:, sl].astype(q_ref.dtype)
        k_ref[0, h, :, :] = k[:, sl].astype(k_ref.dtype)
        v_ref[0, h, :, :] = v[:, sl].astype(v_ref.dtype)


# -----------------------------------------------------------------------------
# Kernel 2: flash-style causal attention, grid = (B, H, q_tiles, k_tiles).
# -----------------------------------------------------------------------------
def _flash_attn_kernel(q_ref, k_ref, v_ref, o_ref, m_sc, l_sc, acc_sc,
                       *, block_q, block_k):
    qi = pl.program_id(2)
    ki = pl.program_id(3)

    @pl.when(ki == 0)
    def _():
        m_sc[...] = jnp.full(m_sc.shape, _MASK_VALUE, m_sc.dtype)
        l_sc[...] = jnp.zeros(l_sc.shape, l_sc.dtype)
        acc_sc[...] = jnp.zeros(acc_sc.shape, acc_sc.dtype)

    q_start = qi * block_q
    k_start = ki * block_k
    fully_visible = (k_start + block_k - 1) <= q_start        # strictly below diagonal
    fully_masked = k_start > (q_start + block_q - 1)          # strictly above diagonal

    def scores():
        # QK^T contracting last dims; no materialized K transpose; q pre-scaled.
        return lax.dot_general(q_ref[0, 0], k_ref[0, 0],
                               (((1,), (1,)), ((), ())),
                               preferred_element_type=jnp.float32)

    def online_update(s):
        m_prev = m_sc[...]
        m_new = jnp.maximum(m_prev, jnp.max(s, axis=-1, keepdims=True))
        alpha = jnp.exp(m_prev - m_new)
        p = jnp.exp(s - m_new)
        l_sc[...] = alpha * l_sc[...] + jnp.sum(p, axis=-1, keepdims=True)
        acc_sc[...] = alpha * acc_sc[...] + jnp.dot(
            p.astype(jnp.bfloat16), v_ref[0, 0],
            preferred_element_type=jnp.float32)
        m_sc[...] = m_new

    @pl.when(fully_visible)
    def _():                                   # off-diagonal tile: no mask select
        online_update(scores())

    @pl.when(jnp.logical_and(jnp.logical_not(fully_visible),
                             jnp.logical_not(fully_masked)))
    def _():                                   # diagonal tile: apply causal mask
        row = q_start + lax.broadcasted_iota(jnp.int32, (block_q, block_k), 0)
        col = k_start + lax.broadcasted_iota(jnp.int32, (block_q, block_k), 1)
        online_update(jnp.where(col <= row, scores(), _MASK_VALUE))

    @pl.when(ki == pl.num_programs(3) - 1)
    def _():
        inv_l = pl.reciprocal(l_sc[...], approx=True)          # EUP slot
        o_ref[0, 0, :, :] = (acc_sc[...] * inv_l).astype(o_ref.dtype)


# -----------------------------------------------------------------------------
# Kernel 3: per-head output projection + residual + LN2 + MLP + residual.
# -----------------------------------------------------------------------------
def _proj_mlp_kernel(x_ref, y_ref, wpr_ref, bpr_ref, ln2w_ref, ln2b_ref,
                     wfc_ref, bfc_ref, wp2_ref, bp2_ref, o_ref, *, num_heads):
    x = x_ref[0]                                   # (tr, C) f32

    # Attention output projection accumulated per head:
    #   sum_h y[:, h] @ Wproj[h]  -- avoids an (H,tr,D)->(tr,C) in-kernel relayout.
    attn = jnp.zeros_like(x)
    for h in range(num_heads):                     # static; accumulation chain bounds liveness
        attn = attn + jnp.dot(y_ref[0, h], wpr_ref[h],
                              preferred_element_type=jnp.float32)
    x1 = x + attn + bpr_ref[0]

    xn2 = _layernorm(x1, ln2w_ref[0], ln2b_ref[0])
    hfc = jnp.dot(xn2.astype(jnp.bfloat16), wfc_ref[...],
                  preferred_element_type=jnp.float32) + bfc_ref[0]
    hfc = jax.nn.gelu(hfc, approximate=False)      # exact erf GELU == nn.GELU()
    mlp = jnp.dot(hfc.astype(jnp.bfloat16), wp2_ref[...],
                  preferred_element_type=jnp.float32) + bp2_ref[0]

    o_ref[0] = (x1 + mlp).astype(o_ref.dtype)


# -----------------------------------------------------------------------------
# Wrappers
# -----------------------------------------------------------------------------
def _vmem_limit_bytes():
    """~3/4 of physical VMEM: ~48 MiB on v7x (64 MiB), ~96 MiB on v5e/v6e (128 MiB)."""
    cap = None
    try:
        cap = getattr(pltpu.get_tpu_info(), "vmem_capacity_bytes", None)
    except Exception:
        cap = None
    if not cap:
        cap = 64 * 1024 * 1024
    return max(min(int(cap) * 3 // 4, 112 * 1024 * 1024), 32 * 1024 * 1024)


def _const_spec(shape, single_buffer):
    """BlockSpec for a grid-invariant operand (weights / biases / LN params)."""
    nd = len(shape)
    index_map = lambda *_: (0,) * nd
    if single_buffer:
        # Block index never changes -> the second pipeline buffer is pure waste.
        return pl.BlockSpec(shape, index_map, pipeline_mode=pl.Buffered(1))
    return pl.BlockSpec(shape, index_map)


def prepare_params(params, num_heads):
    """One-time (per-model) preprocessing:
       - matmul weights cast to bf16 (halves weight DMA bytes, feeds the MXU),
       - attention output projection reshaped head-major to (H, D, C)."""
    (ln1w, ln1b, wqkv, bqkv, wpr, bpr, ln2w, ln2b, wfc, bfc, wp2, bp2) = params
    C = wqkv.shape[0]
    D = C // num_heads
    wqkv = wqkv.astype(jnp.bfloat16)
    wpr = wpr.astype(jnp.bfloat16).reshape(num_heads, D, C)
    wfc = wfc.astype(jnp.bfloat16)
    wp2 = wp2.astype(jnp.bfloat16)
    return (ln1w, ln1b, wqkv, bqkv, wpr, bpr, ln2w, ln2b, wfc, bfc, wp2, bp2)


def _block_forward_impl(x, params, num_heads, *, block_q, block_k, block_rows,
                        single_buffer_weights):
    (ln1w, ln1b, wqkv, bqkv, wpr_h, bpr, ln2w, ln2b, wfc, bfc, wp2, bp2) = params
    B, T, C = x.shape
    H = num_heads
    assert C % H == 0
    D = C // H

    block_rows = min(block_rows, T)
    block_q = min(block_q, T)
    block_k = min(block_k, T)
    assert T % block_rows == 0 and T % block_q == 0 and T % block_k == 0, \
        "tile sizes must divide T"
    assert block_rows % 8 == 0 and block_q % 8 == 0 and block_k % 8 == 0

    vmem_limit = _vmem_limit_bytes()
    wspec = functools.partial(_const_spec, single_buffer=single_buffer_weights)
    n_row = T // block_rows
    n_q = T // block_q
    n_k = T // block_k

    # ---- Kernel 1: LN1 + QKV -------------------------------------------------
    qkv_shape = jax.ShapeDtypeStruct((B, H, T, D), jnp.bfloat16)
    q, k, v = pl.pallas_call(
        functools.partial(_qkv_kernel, num_heads=H, scale=1.0 / math.sqrt(D)),
        out_shape=(qkv_shape, qkv_shape, qkv_shape),
        grid_spec=pltpu.PrefetchScalarGridSpec(
            num_scalar_prefetch=0,
            grid=(B, n_row),
            in_specs=[
                pl.BlockSpec((1, block_rows, C), lambda b, r: (b, r, 0)),
                wspec(ln1w.shape), wspec(ln1b.shape),
                wspec(wqkv.shape), wspec(bqkv.shape),
            ],
            out_specs=[pl.BlockSpec((1, H, block_rows, D),
                                    lambda b, r: (b, 0, r, 0))] * 3,
        ),
        compiler_params=pltpu.CompilerParams(
            dimension_semantics=("parallel", "parallel"),
            vmem_limit_bytes=vmem_limit,
        ),
    )(x, ln1w, ln1b, wqkv, bqkv)

    # ---- Kernel 2: flash causal attention -------------------------------------
    def kv_index_map(b, h, qi, ki):
        # Clamp strictly-above-diagonal (fully masked) tiles to the last visible
        # one: the repeated block index lets Pallas skip the redundant DMA.
        last_visible = ((qi + 1) * block_q - 1) // block_k
        return (b, h, jnp.minimum(ki, last_visible), 0)

    y = pl.pallas_call(
        functools.partial(_flash_attn_kernel, block_q=block_q, block_k=block_k),
        out_shape=jax.ShapeDtypeStruct((B, H, T, D), jnp.bfloat16),
        grid_spec=pltpu.PrefetchScalarGridSpec(
            num_scalar_prefetch=0,
            grid=(B, H, n_q, n_k),
            in_specs=[
                pl.BlockSpec((1, 1, block_q, D), lambda b, h, qi, ki: (b, h, qi, 0)),
                pl.BlockSpec((1, 1, block_k, D), kv_index_map),
                pl.BlockSpec((1, 1, block_k, D), kv_index_map),
            ],
            out_specs=pl.BlockSpec((1, 1, block_q, D),
                                   lambda b, h, qi, ki: (b, h, qi, 0)),
            scratch_shapes=[
                pltpu.VMEM((block_q, 1), jnp.float32),   # running max m
                pltpu.VMEM((block_q, 1), jnp.float32),   # running denom l
                pltpu.VMEM((block_q, D), jnp.float32),   # output accumulator
            ],
        ),
        compiler_params=pltpu.CompilerParams(
            dimension_semantics=("parallel", "parallel", "parallel", "arbitrary"),
            vmem_limit_bytes=vmem_limit,
        ),
    )(q, k, v)

    # ---- Kernel 3: projection + residual + LN2 + MLP + residual ---------------
    out = pl.pallas_call(
        functools.partial(_proj_mlp_kernel, num_heads=H),
        out_shape=jax.ShapeDtypeStruct((B, T, C), x.dtype),
        grid_spec=pltpu.PrefetchScalarGridSpec(
            num_scalar_prefetch=0,
            grid=(B, n_row),
            in_specs=[
                pl.BlockSpec((1, block_rows, C), lambda b, r: (b, r, 0)),        # x
                pl.BlockSpec((1, H, block_rows, D), lambda b, r: (b, 0, r, 0)),  # y
                wspec(wpr_h.shape), wspec(bpr.shape),
                wspec(ln2w.shape), wspec(ln2b.shape),
                wspec(wfc.shape), wspec(bfc.shape),
                wspec(wp2.shape), wspec(bp2.shape),
            ],
            out_specs=pl.BlockSpec((1, block_rows, C), lambda b, r: (b, r, 0)),
        ),
        compiler_params=pltpu.CompilerParams(
            dimension_semantics=("parallel", "parallel"),
            vmem_limit_bytes=vmem_limit,
        ),
    )(x, y, wpr_h, bpr, ln2w, ln2b, wfc, bfc, wp2, bp2)
    return out


def block_forward(x, prepared_params, num_heads, *,
                  block_q=128, block_k=128, block_rows=256):
    """Forward pass of the transformer Block. `prepared_params` must come from
    prepare_params (bf16 weights, head-major attention projection)."""
    try:
        return _block_forward_impl(x, prepared_params, num_heads,
                                   block_q=block_q, block_k=block_k,
                                   block_rows=block_rows,
                                   single_buffer_weights=True)
    except Exception:
        # pl.Buffered(1) (single-buffered grid-invariant operands) is not
        # supported on every jax/Mosaic version; fall back to double buffering.
        return _block_forward_impl(x, prepared_params, num_heads,
                                   block_q=block_q, block_k=block_k,
                                   block_rows=block_rows,
                                   single_buffer_weights=False)


# -----------------------------------------------------------------------------
# Pure-JAX f32 reference matching the PyTorch Block forward (eval mode).
# -----------------------------------------------------------------------------
def block_reference(x, params, num_heads):
    (ln1w, ln1b, wqkv, bqkv, wpr, bpr, ln2w, ln2b, wfc, bfc, wp2, bp2) = params
    B, T, C = x.shape
    H = num_heads
    D = C // H

    def ln(v, w, b):
        mu = jnp.mean(v, axis=-1, keepdims=True)
        var = jnp.mean((v - mu) ** 2, axis=-1, keepdims=True)
        return (v - mu) / jnp.sqrt(var + 1e-5) * w[0] + b[0]

    xn = ln(x, ln1w, ln1b)
    qkv = xn @ wqkv + bqkv[0]
    q, k, v = jnp.split(qkv, 3, axis=-1)
    q = q.reshape(B, T, H, D).transpose(0, 2, 1, 3)
    k = k.reshape(B, T, H, D).transpose(0, 2, 1, 3)
    v = v.reshape(B, T, H, D).transpose(0, 2, 1, 3)
    s = jnp.einsum("bhqd,bhkd->bhqk", q, k) / math.sqrt(D)
    mask = jnp.tril(jnp.ones((T, T), bool))
    s = jnp.where(mask, s, -jnp.inf)
    p = jax.nn.softmax(s, axis=-1)
    y = jnp.einsum("bhqk,bhkd->bhqd", p, v).transpose(0, 2, 1, 3).reshape(B, T, C)
    x = x + (y @ wpr + bpr[0])
    xn2 = ln(x, ln2w, ln2b)
    h = jax.nn.gelu(xn2 @ wfc + bfc[0], approximate=False)
    return x + (h @ wp2 + bp2[0])


if __name__ == "__main__":
    B, T, C, H = 2, 256, 128, 4
    key = jax.random.PRNGKey(0)
    ks = jax.random.split(key, 12)

    # Deterministic parameters (weights stored as (in, out) for x @ W + b).
    ln1w = 1.0 + 0.05 * jax.random.normal(ks[8], (1, C), jnp.float32)
    ln1b = 0.05 * jax.random.normal(ks[9], (1, C), jnp.float32)
    ln2w = 1.0 + 0.05 * jax.random.normal(ks[10], (1, C), jnp.float32)
    ln2b = 0.05 * jax.random.normal(ks[11], (1, C), jnp.float32)
    wqkv = 0.02 * jax.random.normal(ks[0], (C, 3 * C), jnp.float32)
    bqkv = 0.02 * jax.random.normal(ks[1], (1, 3 * C), jnp.float32)
    wpr = 0.02 * jax.random.normal(ks[2], (C, C), jnp.float32)
    bpr = 0.02 * jax.random.normal(ks[3], (1, C), jnp.float32)
    wfc = 0.02 * jax.random.normal(ks[4], (C, 4 * C), jnp.float32)
    bfc = 0.02 * jax.random.normal(ks[5], (1, 4 * C), jnp.float32)
    wp2 = 0.02 * jax.random.normal(ks[6], (4 * C, C), jnp.float32)
    bp2 = 0.02 * jax.random.normal(ks[7], (1, C), jnp.float32)
    raw_params = (ln1w, ln1b, wqkv, bqkv, wpr, bpr, ln2w, ln2b, wfc, bfc, wp2, bp2)

    x = jax.random.normal(jax.random.PRNGKey(42), (B, T, C), jnp.float32)

    # One-time parameter preprocessing (bf16 cast, head-major projection).
    params = prepare_params(raw_params, H)

    # Small tiles chosen so the test exercises multiple row tiles and all three
    # causal tile classes (fully visible / diagonal / skipped).
    out = block_forward(x, params, H, block_q=64, block_k=64, block_rows=128)
    out = jax.block_until_ready(out)

    ref = block_reference(x, raw_params, H)
    assert out.shape == (B, T, C)
    err = jnp.max(jnp.abs(out - ref))
    # Tolerance relaxed vs the f32 reference: bf16 MXU operands (f32 accumulation),
    # bf16 q/k/v/y intermediates, and the approximate EUP reciprocal in softmax.
    assert jnp.allclose(out, ref, atol=2e-2, rtol=2e-2), f"max err {err}"
    print("KERNEL_OK")
</pallas_src>

<mosaic_0001>
module attributes {stable_mosaic.version = 11 : i64} {
  func.func @_qkv_kernel(%arg0: i32, %arg1: i32, %arg2: memref<1x128x128xf32, #tpu.memory_space<vmem>>, %arg3: memref<1x128xf32, #tpu.memory_space<vmem>>, %arg4: memref<1x128xf32, #tpu.memory_space<vmem>>, %arg5: memref<128x384xbf16, #tpu.memory_space<vmem>>, %arg6: memref<1x384xf32, #tpu.memory_space<vmem>>, %arg7: memref<1x4x128x32xbf16, #tpu.memory_space<vmem>>, %arg8: memref<1x4x128x32xbf16, #tpu.memory_space<vmem>>, %arg9: memref<1x4x128x32xbf16, #tpu.memory_space<vmem>>) attributes {dimension_semantics = [#tpu.dimension_semantics<parallel>, #tpu.dimension_semantics<parallel>], iteration_bounds = array<i64: 2, 2>, scalar_prefetch = 0 : i64, scratch_operands = 0 : i64, tpu.core_type = #tpu.core_type<tc>, window_params = [{transform_indices = @transform_0, window_bounds = array<i64: 1, 128, 128>}, {pipeline_mode = #tpu.pipeline_mode<synchronous>, transform_indices = @transform_1, window_bounds = array<i64: 1, 128>}, {pipeline_mode = #tpu.pipeline_mode<synchronous>, transform_indices = @transform_2, window_bounds = array<i64: 1, 128>}, {pipeline_mode = #tpu.pipeline_mode<synchronous>, transform_indices = @transform_3, window_bounds = array<i64: 128, 384>}, {pipeline_mode = #tpu.pipeline_mode<synchronous>, transform_indices = @transform_4, window_bounds = array<i64: 1, 384>}, {transform_indices = @transform_5, window_bounds = array<i64: 1, 4, 128, 32>}, {transform_indices = @transform_6, window_bounds = array<i64: 1, 4, 128, 32>}, {transform_indices = @transform_7, window_bounds = array<i64: 1, 4, 128, 32>}]} {
    %c0 = arith.constant 0 : index
    %c0_0 = arith.constant 0 : index
    %c0_1 = arith.constant 0 : index
    %0 = vector.load %arg2[%c0, %c0_0, %c0_1] : memref<1x128x128xf32, #tpu.memory_space<vmem>>, vector<1x128x128xf32>
    %1 = vector.shape_cast %0 : vector<1x128x128xf32> to vector<128x128xf32>
    %c0_2 = arith.constant 0 : index
    %c0_3 = arith.constant 0 : index
    %2 = vector.load %arg3[%c0_2, %c0_3] : memref<1x128xf32, #tpu.memory_space<vmem>>, vector<1x128xf32>
    %3 = vector.shape_cast %2 : vector<1x128xf32> to vector<128xf32>
    %c0_4 = arith.constant 0 : index
    %c0_5 = arith.constant 0 : index
    %4 = vector.load %arg4[%c0_4, %c0_5] : memref<1x128xf32, #tpu.memory_space<vmem>>, vector<1x128xf32>
    %5 = vector.shape_cast %4 : vector<1x128xf32> to vector<128xf32>
    %cst = arith.constant dense<0.000000e+00> : vector<128xf32>
    %6 = vector.multi_reduction <add>, %1, %cst [1] : vector<128x128xf32> to vector<128xf32>
    %7 = vector.shape_cast %6 : vector<128xf32> to vector<128x1xf32>
    %cst_6 = arith.constant 1.280000e+02 : f32
    %8 = vector.broadcast %cst_6 : f32 to vector<128x1xf32>
    %9 = arith.divf %7, %8 : vector<128x1xf32>
    %10 = vector.broadcast %9 : vector<128x1xf32> to vector<128x128xf32>
    %11 = arith.subf %1, %10 : vector<128x128xf32>
    %12 = arith.mulf %11, %11 : vector<128x128xf32>
    %cst_7 = arith.constant dense<0.000000e+00> : vector<128xf32>
    %13 = vector.multi_reduction <add>, %12, %cst_7 [1] : vector<128x128xf32> to vector<128xf32>
    %14 = vector.shape_cast %13 : vector<128xf32> to vector<128x1xf32>
    %cst_8 = arith.constant 1.280000e+02 : f32
    %15 = vector.broadcast %cst_8 : f32 to vector<128x1xf32>
    %16 = arith.divf %14, %15 : vector<128x1xf32>
    %cst_9 = arith.constant 9.99999974E-6 : f32
    %17 = vector.broadcast %cst_9 : f32 to vector<128x1xf32>
    %18 = arith.addf %16, %17 : vector<128x1xf32>
    %19 = math.rsqrt %18 : vector<128x1xf32>
    %20 = vector.broadcast %19 : vector<128x1xf32> to vector<128x128xf32>
    %21 = arith.mulf %11, %20 : vector<128x128xf32>
    %22 = vector.shape_cast %3 : vector<128xf32> to vector<1x128xf32>
    %23 = vector.broadcast %22 : vector<1x128xf32> to vector<128x128xf32>
    %24 = arith.mulf %21, %23 : vector<128x128xf32>
    %25 = vector.shape_cast %5 : vector<128xf32> to vector<1x128xf32>
    %26 = vector.broadcast %25 : vector<1x128xf32> to vector<128x128xf32>
    %27 = arith.addf %24, %26 : vector<128x128xf32>
    %28 = arith.truncf %27 : vector<128x128xf32> to vector<128x128xbf16>
    %c0_10 = arith.constant 0 : index
    %c0_11 = arith.constant 0 : index
    %29 = vector.load %arg5[%c0_10, %c0_11] : memref<128x384xbf16, #tpu.memory_space<vmem>>, vector<128x384xbf16>
    %cst_12 = arith.constant dense<0.000000e+00> : vector<128x384xf32>
    %30 = tpu.matmul %28, %29, %cst_12 {dimension_numbers = #tpu.dot_dimension_numbers<[1], [0], [0], [1], [0, 0, 1, 1], [], []>} : vector<128x128xbf16>, vector<128x384xbf16>, vector<128x384xf32> -> vector<128x384xf32>
    %c0_13 = arith.constant 0 : index
    %c0_14 = arith.constant 0 : index
    %31 = vector.load %arg6[%c0_13, %c0_14] : memref<1x384xf32, #tpu.memory_space<vmem>>, vector<1x384xf32>
    %32 = vector.shape_cast %31 : vector<1x384xf32> to vector<384xf32>
    %33 = vector.shape_cast %32 : vector<384xf32> to vector<1x384xf32>
    %34 = vector.broadcast %33 : vector<1x384xf32> to vector<128x384xf32>
    %35 = arith.addf %30, %34 : vector<128x384xf32>
    %36 = vector.extract_strided_slice %35 {offsets = [0, 0], sizes = [128, 128], strides = [1, 1]} : vector<128x384xf32> to vector<128x128xf32>
    %cst_15 = arith.constant 0.176776692 : f32
    %37 = vector.broadcast %cst_15 : f32 to vector<128x128xf32>
    %38 = arith.mulf %36, %37 : vector<128x128xf32>
    %39 = vector.extract_strided_slice %35 {offsets = [0, 128], sizes = [128, 128], strides = [1, 1]} : vector<128x384xf32> to vector<128x128xf32>
    %40 = vector.extract_strided_slice %35 {offsets = [0, 256], sizes = [128, 128], strides = [1, 1]} : vector<128x384xf32> to vector<128x128xf32>
    %41 = vector.extract_strided_slice %38 {offsets = [0, 0], sizes = [128, 32], strides = [1, 1]} : vector<128x128xf32> to vector<128x32xf32>
    %42 = arith.truncf %41 : vector<128x32xf32> to vector<128x32xbf16>
    %c0_16 = arith.constant 0 : index
    %c0_17 = arith.constant 0 : index
    %c0_18 = arith.constant 0 : index
    %c0_19 = arith.constant 0 : index
    %43 = vector.load %arg7[%c0_16, %c0_17, %c0_18, %c0_19] : memref<1x4x128x32xbf16, #tpu.memory_space<vmem>>, vector<1x1x128x32xbf16>
    %44 = vector.shape_cast %43 : vector<1x1x128x32xbf16> to vector<128x32xbf16>
    %45 = vector.shape_cast %42 : vector<128x32xbf16> to vector<1x1x128x32xbf16>
    tpu.vector_store %arg7[%c0_16, %c0_17, %c0_18, %c0_19], %45 {strides = array<i32>} : memref<1x4x128x32xbf16, #tpu.memory_space<vmem>>, vector<1x1x128x32xbf16>,
    %46 = vector.extract_strided_slice %39 {offsets = [0, 0], sizes = [128, 32], strides = [1, 1]} : vector<128x128xf32> to vector<128x32xf32>
    %47 = arith.truncf %46 : vector<128x32xf32> to vector<128x32xbf16>
    %c0_20 = arith.constant 0 : index
    %c0_21 = arith.constant 0 : index
    %c0_22 = arith.constant 0 : index
    %c0_23 = arith.constant 0 : index
    %48 = vector.load %arg8[%c0_20, %c0_21, %c0_22, %c0_23] : memref<1x4x128x32xbf16, #tpu.memory_space<vmem>>, vector<1x1x128x32xbf16>
    %49 = vector.shape_cast %48 : vector<1x1x128x32xbf16> to vector<128x32xbf16>
    %50 = vector.shape_cast %47 : vector<128x32xbf16> to vector<1x1x128x32xbf16>
    tpu.vector_store %arg8[%c0_20, %c0_21, %c0_22, %c0_23], %50 {strides = array<i32>} : memref<1x4x128x32xbf16, #tpu.memory_space<vmem>>, vector<1x1x128x32xbf16>,
    %51 = vector.extract_strided_slice %40 {offsets = [0, 0], sizes = [128, 32], strides = [1, 1]} : vector<128x128xf32> to vector<128x32xf32>
    %52 = arith.truncf %51 : vector<128x32xf32> to vector<128x32xbf16>
    %c0_24 = arith.constant 0 : index
    %c0_25 = arith.constant 0 : index
    %c0_26 = arith.constant 0 : index
    %c0_27 = arith.constant 0 : index
    %53 = vector.load %arg9[%c0_24, %c0_25, %c0_26, %c0_27] : memref<1x4x128x32xbf16, #tpu.memory_space<vmem>>, vector<1x1x128x32xbf16>
    %54 = vector.shape_cast %53 : vector<1x1x128x32xbf16> to vector<128x32xbf16>
    %55 = vector.shape_cast %52 : vector<128x32xbf16> to vector<1x1x128x32xbf16>
    tpu.vector_store %arg9[%c0_24, %c0_25, %c0_26, %c0_27], %55 {strides = array<i32>} : memref<1x4x128x32xbf16, #tpu.memory_space<vmem>>, vector<1x1x128x32xbf16>,
    %56 = vector.extract_strided_slice %38 {offsets = [0, 32], sizes = [128, 32], strides = [1, 1]} : vector<128x128xf32> to vector<128x32xf32>
    %57 = arith.truncf %56 : vector<128x32xf32> to vector<128x32xbf16>
    %c0_28 = arith.constant 0 : index
    %c1 = arith.constant 1 : index
    %c0_29 = arith.constant 0 : index
    %c0_30 = arith.constant 0 : index
    %58 = vector.load %arg7[%c0_28, %c1, %c0_29, %c0_30] : memref<1x4x128x32xbf16, #tpu.memory_space<vmem>>, vector<1x1x128x32xbf16>
    %59 = vector.shape_cast %58 : vector<1x1x128x32xbf16> to vector<128x32xbf16>
    %60 = vector.shape_cast %57 : vector<128x32xbf16> to vector<1x1x128x32xbf16>
    tpu.vector_store %arg7[%c0_28, %c1, %c0_29, %c0_30], %60 {strides = array<i32>} : memref<1x4x128x32xbf16, #tpu.memory_space<vmem>>, vector<1x1x128x32xbf16>,
    %61 = vector.extract_strided_slice %39 {offsets = [0, 32], sizes = [128, 32], strides = [1, 1]} : vector<128x128xf32> to vector<128x32xf32>
    %62 = arith.truncf %61 : vector<128x32xf32> to vector<128x32xbf16>
    %c0_31 = arith.constant 0 : index
    %c1_32 = arith.constant 1 : index
    %c0_33 = arith.constant 0 : index
    %c0_34 = arith.constant 0 : index
    %63 = vector.load %arg8[%c0_31, %c1_32, %c0_33, %c0_34] : memref<1x4x128x32xbf16, #tpu.memory_space<vmem>>, vector<1x1x128x32xbf16>
    %64 = vector.shape_cast %63 : vector<1x1x128x32xbf16> to vector<128x32xbf16>
    %65 = vector.shape_cast %62 : vector<128x32xbf16> to vector<1x1x128x32xbf16>
    tpu.vector_store %arg8[%c0_31, %c1_32, %c0_33, %c0_34], %65 {strides = array<i32>} : memref<1x4x128x32xbf16, #tpu.memory_space<vmem>>, vector<1x1x128x32xbf16>,
    %66 = vector.extract_strided_slice %40 {offsets = [0, 32], sizes = [128, 32], strides = [1, 1]} : vector<128x128xf32> to vector<128x32xf32>
    %67 = arith.truncf %66 : vector<128x32xf32> to vector<128x32xbf16>
    %c0_35 = arith.constant 0 : index
    %c1_36 = arith.constant 1 : index
    %c0_37 = arith.constant 0 : index
    %c0_38 = arith.constant 0 : index
    %68 = vector.load %arg9[%c0_35, %c1_36, %c0_37, %c0_38] : memref<1x4x128x32xbf16, #tpu.memory_space<vmem>>, vector<1x1x128x32xbf16>
    %69 = vector.shape_cast %68 : vector<1x1x128x32xbf16> to vector<128x32xbf16>
    %70 = vector.shape_cast %67 : vector<128x32xbf16> to vector<1x1x128x32xbf16>
    tpu.vector_store %arg9[%c0_35, %c1_36, %c0_37, %c0_38], %70 {strides = array<i32>} : memref<1x4x128x32xbf16, #tpu.memory_space<vmem>>, vector<1x1x128x32xbf16>,
    %71 = vector.extract_strided_slice %38 {offsets = [0, 64], sizes = [128, 32], strides = [1, 1]} : vector<128x128xf32> to vector<128x32xf32>
    %72 = arith.truncf %71 : vector<128x32xf32> to vector<128x32xbf16>
    %c0_39 = arith.constant 0 : index
    %c2 = arith.constant 2 : index
    %c0_40 = arith.constant 0 : index
    %c0_41 = arith.constant 0 : index
    %73 = vector.load %arg7[%c0_39, %c2, %c0_40, %c0_41] : memref<1x4x128x32xbf16, #tpu.memory_space<vmem>>, vector<1x1x128x32xbf16>
    %74 = vector.shape_cast %73 : vector<1x1x128x32xbf16> to vector<128x32xbf16>
    %75 = vector.shape_cast %72 : vector<128x32xbf16> to vector<1x1x128x32xbf16>
    tpu.vector_store %arg7[%c0_39, %c2, %c0_40, %c0_41], %75 {strides = array<i32>} : memref<1x4x128x32xbf16, #tpu.memory_space<vmem>>, vector<1x1x128x32xbf16>,
    %76 = vector.extract_strided_slice %39 {offsets = [0, 64], sizes = [128, 32], strides = [1, 1]} : vector<128x128xf32> to vector<128x32xf32>
    %77 = arith.truncf %76 : vector<128x32xf32> to vector<128x32xbf16>
    %c0_42 = arith.constant 0 : index
    %c2_43 = arith.constant 2 : index
    %c0_44 = arith.constant 0 : index
    %c0_45 = arith.constant 0 : index
    %78 = vector.load %arg8[%c0_42, %c2_43, %c0_44, %c0_45] : memref<1x4x128x32xbf16, #tpu.memory_space<vmem>>, vector<1x1x128x32xbf16>
    %79 = vector.shape_cast %78 : vector<1x1x128x32xbf16> to vector<128x32xbf16>
    %80 = vector.shape_cast %77 : vector<128x32xbf16> to vector<1x1x128x32xbf16>
    tpu.vector_store %arg8[%c0_42, %c2_43, %c0_44, %c0_45], %80 {strides = array<i32>} : memref<1x4x128x32xbf16, #tpu.memory_space<vmem>>, vector<1x1x128x32xbf16>,
    %81 = vector.extract_strided_slice %40 {offsets = [0, 64], sizes = [128, 32], strides = [1, 1]} : vector<128x128xf32> to vector<128x32xf32>
    %82 = arith.truncf %81 : vector<128x32xf32> to vector<128x32xbf16>
    %c0_46 = arith.constant 0 : index
    %c2_47 = arith.constant 2 : index
    %c0_48 = arith.constant 0 : index
    %c0_49 = arith.constant 0 : index
    %83 = vector.load %arg9[%c0_46, %c2_47, %c0_48, %c0_49] : memref<1x4x128x32xbf16, #tpu.memory_space<vmem>>, vector<1x1x128x32xbf16>
    %84 = vector.shape_cast %83 : vector<1x1x128x32xbf16> to vector<128x32xbf16>
    %85 = vector.shape_cast %82 : vector<128x32xbf16> to vector<1x1x128x32xbf16>
    tpu.vector_store %arg9[%c0_46, %c2_47, %c0_48, %c0_49], %85 {strides = array<i32>} : memref<1x4x128x32xbf16, #tpu.memory_space<vmem>>, vector<1x1x128x32xbf16>,
    %86 = vector.extract_strided_slice %38 {offsets = [0, 96], sizes = [128, 32], strides = [1, 1]} : vector<128x128xf32> to vector<128x32xf32>
    %87 = arith.truncf %86 : vector<128x32xf32> to vector<128x32xbf16>
    %c0_50 = arith.constant 0 : index
    %c3 = arith.constant 3 : index
    %c0_51 = arith.constant 0 : index
    %c0_52 = arith.constant 0 : index
    %88 = vector.load %arg7[%c0_50, %c3, %c0_51, %c0_52] : memref<1x4x128x32xbf16, #tpu.memory_space<vmem>>, vector<1x1x128x32xbf16>
    %89 = vector.shape_cast %88 : vector<1x1x128x32xbf16> to vector<128x32xbf16>
    %90 = vector.shape_cast %87 : vector<128x32xbf16> to vector<1x1x128x32xbf16>
    tpu.vector_store %arg7[%c0_50, %c3, %c0_51, %c0_52], %90 {strides = array<i32>} : memref<1x4x128x32xbf16, #tpu.memory_space<vmem>>, vector<1x1x128x32xbf16>,
    %91 = vector.extract_strided_slice %39 {offsets = [0, 96], sizes = [128, 32], strides = [1, 1]} : vector<128x128xf32> to vector<128x32xf32>
    %92 = arith.truncf %91 : vector<128x32xf32> to vector<128x32xbf16>
    %c0_53 = arith.constant 0 : index
    %c3_54 = arith.constant 3 : index
    %c0_55 = arith.constant 0 : index
    %c0_56 = arith.constant 0 : index
    %93 = vector.load %arg8[%c0_53, %c3_54, %c0_55, %c0_56] : memref<1x4x128x32xbf16, #tpu.memory_space<vmem>>, vector<1x1x128x32xbf16>
    %94 = vector.shape_cast %93 : vector<1x1x128x32xbf16> to vector<128x32xbf16>
    %95 = vector.shape_cast %92 : vector<128x32xbf16> to vector<1x1x128x32xbf16>
    tpu.vector_store %arg8[%c0_53, %c3_54, %c0_55, %c0_56], %95 {strides = array<i32>} : memref<1x4x128x32xbf16, #tpu.memory_space<vmem>>, vector<1x1x128x32xbf16>,
    %96 = vector.extract_strided_slice %40 {offsets = [0, 96], sizes = [128, 32], strides = [1, 1]} : vector<128x128xf32> to vector<128x32xf32>
    %97 = arith.truncf %96 : vector<128x32xf32> to vector<128x32xbf16>
    %c0_57 = arith.constant 0 : index
    %c3_58 = arith.constant 3 : index
    %c0_59 = arith.constant 0 : index
    %c0_60 = arith.constant 0 : index
    %98 = vector.load %arg9[%c0_57, %c3_58, %c0_59, %c0_60] : memref<1x4x128x32xbf16, #tpu.memory_space<vmem>>, vector<1x1x128x32xbf16>
    %99 = vector.shape_cast %98 : vector<1x1x128x32xbf16> to vector<128x32xbf16>
    %100 = vector.shape_cast %97 : vector<128x32xbf16> to vector<1x1x128x32xbf16>
    tpu.vector_store %arg9[%c0_57, %c3_58, %c0_59, %c0_60], %100 {strides = array<i32>} : memref<1x4x128x32xbf16, #tpu.memory_space<vmem>>, vector<1x1x128x32xbf16>,
    return
  }
  func.func @transform_0(%arg0: i32, %arg1: i32) -> (i32, i32, i32) {
    %c0_i32 = arith.constant 0 : i32
    %c0_i32_0 = arith.constant 0 : i32
    return %arg0, %arg1, %c0_i32 : i32, i32, i32
  }
  func.func @transform_1(%arg0: i32, %arg1: i32) -> (i32, i32) {
    %c0_i32 = arith.constant 0 : i32
    %c0_i32_0 = arith.constant 0 : i32
    %c0_i32_1 = arith.constant 0 : i32
    return %c0_i32, %c0_i32_0 : i32, i32
  }
  func.func @transform_2(%arg0: i32, %arg1: i32) -> (i32, i32) {
    %c0_i32 = arith.constant 0 : i32
    %c0_i32_0 = arith.constant 0 : i32
    %c0_i32_1 = arith.constant 0 : i32
    return %c0_i32, %c0_i32_0 : i32, i32
  }
  func.func @transform_3(%arg0: i32, %arg1: i32) -> (i32, i32) {
    %c0_i32 = arith.constant 0 : i32
    %c0_i32_0 = arith.constant 0 : i32
    %c0_i32_1 = arith.constant 0 : i32
    return %c0_i32, %c0_i32_0 : i32, i32
  }
  func.func @transform_4(%arg0: i32, %arg1: i32) -> (i32, i32) {
    %c0_i32 = arith.constant 0 : i32
    %c0_i32_0 = arith.constant 0 : i32
    %c0_i32_1 = arith.constant 0 : i32
    return %c0_i32, %c0_i32_0 : i32, i32
  }
  func.func @transform_5(%arg0: i32, %arg1: i32) -> (i32, i32, i32, i32) {
    %c0_i32 = arith.constant 0 : i32
    %c0_i32_0 = arith.constant 0 : i32
    %c0_i32_1 = arith.constant 0 : i32
    return %arg0, %c0_i32, %arg1, %c0_i32_0 : i32, i32, i32, i32
  }
  func.func @transform_6(%arg0: i32, %arg1: i32) -> (i32, i32, i32, i32) {
    %c0_i32 = arith.constant 0 : i32
    %c0_i32_0 = arith.constant 0 : i32
    %c0_i32_1 = arith.constant 0 : i32
    return %arg0, %c0_i32, %arg1, %c0_i32_0 : i32, i32, i32, i32
  }
  func.func @transform_7(%arg0: i32, %arg1: i32) -> (i32, i32, i32, i32) {
    %c0_i32 = arith.constant 0 : i32
    %c0_i32_0 = arith.constant 0 : i32
    %c0_i32_1 = arith.constant 0 : i32
    return %arg0, %c0_i32, %arg1, %c0_i32_0 : i32, i32, i32, i32
  }
}

module attributes {stable_mosaic.version = 11 : i64} {
  func.func @_qkv_kernel(%arg0: i32, %arg1: i32, %arg2: memref<1x128x128xf32, #tpu.memory_space<vmem>>, %arg3: memref<1x128xf32, #tpu.memory_space<vmem>>, %arg4: memref<1x128xf32, #tpu.memory_space<vmem>>, %arg5: memref<128x384xbf16, #tpu.memory_space<vmem>>, %arg6: memref<1x384xf32, #tpu.memory_space<vmem>>, %arg7: memref<1x4x128x32xbf16, #tpu.memory_space<vmem>>, %arg8: memref<1x4x128x32xbf16, #tpu.memory_space<vmem>>, %arg9: memref<1x4x128x32xbf16, #tpu.memory_space<vmem>>) attributes {dimension_semantics = [#tpu.dimension_semantics<parallel>, #tpu.dimension_semantics<parallel>], iteration_bounds = array<i64: 2, 2>, scalar_prefetch = 0 : i64, scratch_operands = 0 : i64, tpu.core_type = #tpu.core_type<tc>, window_params = [{transform_indices = @transform_0, window_bounds = array<i64: 1, 128, 128>}, {pipeline_mode = #tpu.pipeline_mode<synchronous>, transform_indices = @transform_1, window_bounds = array<i64: 1, 128>}, {pipeline_mode = #tpu.pipeline_mode<synchronous>, transform_indices = @transform_2, window_bounds = array<i64: 1, 128>}, {pipeline_mode = #tpu.pipeline_mode<synchronous>, transform_indices = @transform_3, window_bounds = array<i64: 128, 384>}, {pipeline_mode = #tpu.pipeline_mode<synchronous>, transform_indices = @transform_4, window_bounds = array<i64: 1, 384>}, {transform_indices = @transform_5, window_bounds = array<i64: 1, 4, 128, 32>}, {transform_indices = @transform_6, window_bounds = array<i64: 1, 4, 128, 32>}, {transform_indices = @transform_7, window_bounds = array<i64: 1, 4, 128, 32>}]} {
    %c0 = arith.constant 0 : index
    %c0_0 = arith.constant 0 : index
    %c0_1 = arith.constant 0 : index
    %0 = vector.load %arg2[%c0, %c0_0, %c0_1] : memref<1x128x128xf32, #tpu.memory_space<vmem>>, vector<1x128x128xf32>
    %1 = vector.shape_cast %0 : vector<1x128x128xf32> to vector<128x128xf32>
    %c0_2 = arith.constant 0 : index
    %c0_3 = arith.constant 0 : index
    %2 = vector.load %arg3[%c0_2, %c0_3] : memref<1x128xf32, #tpu.memory_space<vmem>>, vector<1x128xf32>
    %3 = vector.shape_cast %2 : vector<1x128xf32> to vector<128xf32>
    %c0_4 = arith.constant 0 : index
    %c0_5 = arith.constant 0 : index
    %4 = vector.load %arg4[%c0_4, %c0_5] : memref<1x128xf32, #tpu.memory_space<vmem>>, vector<1x128xf32>
    %5 = vector.shape_cast %4 : vector<1x128xf32> to vector<128xf32>
    %cst = arith.constant dense<0.000000e+00> : vector<128xf32>
    %6 = vector.multi_reduction <add>, %1, %cst [1] : vector<128x128xf32> to vector<128xf32>
    %7 = vector.shape_cast %6 : vector<128xf32> to vector<128x1xf32>
    %cst_6 = arith.constant 1.280000e+02 : f32
    %8 = vector.broadcast %cst_6 : f32 to vector<128x1xf32>
    %9 = arith.divf %7, %8 : vector<128x1xf32>
    %10 = vector.broadcast %9 : vector<128x1xf32> to vector<128x128xf32>
    %11 = arith.subf %1, %10 : vector<128x128xf32>
    %12 = arith.mulf %11, %11 : vector<128x128xf32>
    %cst_7 = arith.constant dense<0.000000e+00> : vector<128xf32>
    %13 = vector.multi_reduction <add>, %12, %cst_7 [1] : vector<128x128xf32> to vector<128xf32>
    %14 = vector.shape_cast %13 : vector<128xf32> to vector<128x1xf32>
    %cst_8 = arith.constant 1.280000e+02 : f32
    %15 = vector.broadcast %cst_8 : f32 to vector<128x1xf32>
    %16 = arith.divf %14, %15 : vector<128x1xf32>
    %cst_9 = arith.constant 9.99999974E-6 : f32
    %17 = vector.broadcast %cst_9 : f32 to vector<128x1xf32>
    %18 = arith.addf %16, %17 : vector<128x1xf32>
    %19 = math.rsqrt %18 : vector<128x1xf32>
    %20 = vector.broadcast %19 : vector<128x1xf32> to vector<128x128xf32>
    %21 = arith.mulf %11, %20 : vector<128x128xf32>
    %22 = vector.shape_cast %3 : vector<128xf32> to vector<1x128xf32>
    %23 = vector.broadcast %22 : vector<1x128xf32> to vector<128x128xf32>
    %24 = arith.mulf %21, %23 : vector<128x128xf32>
    %25 = vector.shape_cast %5 : vector<128xf32> to vector<1x128xf32>
    %26 = vector.broadcast %25 : vector<1x128xf32> to vector<128x128xf32>
    %27 = arith.addf %24, %26 : vector<128x128xf32>
    %28 = arith.truncf %27 : vector<128x128xf32> to vector<128x128xbf16>
    %c0_10 = arith.constant 0 : index
    %c0_11 = arith.constant 0 : index
    %29 = vector.load %arg5[%c0_10, %c0_11] : memref<128x384xbf16, #tpu.memory_space<vmem>>, vector<128x384xbf16>
    %cst_12 = arith.constant dense<0.000000e+00> : vector<128x384xf32>
    %30 = tpu.matmul %28, %29, %cst_12 {dimension_numbers = #tpu.dot_dimension_numbers<[1], [0], [0], [1], [0, 0, 1, 1], [], []>} : vector<128x128xbf16>, vector<128x384xbf16>, vector<128x384xf32> -> vector<128x384xf32>
    %c0_13 = arith.constant 0 : index
    %c0_14 = arith.constant 0 : index
    %31 = vector.load %arg6[%c0_13, %c0_14] : memref<1x384xf32, #tpu.memory_space<vmem>>, vector<1x384xf32>
    %32 = vector.shape_cast %31 : vector<1x384xf32> to vector<384xf32>
    %33 = vector.shape_cast %32 : vector<384xf32> to vector<1x384xf32>
    %34 = vector.broadcast %33 : vector<1x384xf32> to vector<128x384xf32>
    %35 = arith.addf %30, %34 : vector<128x384xf32>
    %36 = vector.extract_strided_slice %35 {offsets = [0, 0], sizes = [128, 128], strides = [1, 1]} : vector<128x384xf32> to vector<128x128xf32>
    %cst_15 = arith.constant 0.176776692 : f32
    %37 = vector.broadcast %cst_15 : f32 to vector<128x128xf32>
    %38 = arith.mulf %36, %37 : vector<128x128xf32>
    %39 = vector.extract_strided_slice %35 {offsets = [0, 128], sizes = [128, 128], strides = [1, 1]} : vector<128x384xf32> to vector<128x128xf32>
    %40 = vector.extract_strided_slice %35 {offsets = [0, 256], sizes = [128, 128], strides = [1, 1]} : vector<128x384xf32> to vector<128x128xf32>
    %41 = vector.extract_strided_slice %38 {offsets = [0, 0], sizes = [128, 32], strides = [1, 1]} : vector<128x128xf32> to vector<128x32xf32>
    %42 = arith.truncf %41 : vector<128x32xf32> to vector<128x32xbf16>
    %c0_16 = arith.constant 0 : index
    %c0_17 = arith.constant 0 : index
    %c0_18 = arith.constant 0 : index
    %c0_19 = arith.constant 0 : index
    %43 = vector.load %arg7[%c0_16, %c0_17, %c0_18, %c0_19] : memref<1x4x128x32xbf16, #tpu.memory_space<vmem>>, vector<1x1x128x32xbf16>
    %44 = vector.shape_cast %43 : vector<1x1x128x32xbf16> to vector<128x32xbf16>
    %45 = vector.shape_cast %42 : vector<128x32xbf16> to vector<1x1x128x32xbf16>
    tpu.vector_store %arg7[%c0_16, %c0_17, %c0_18, %c0_19], %45 {strides = array<i32>} : memref<1x4x128x32xbf16, #tpu.memory_space<vmem>>, vector<1x1x128x32xbf16>,
    %46 = vector.extract_strided_slice %39 {offsets = [0, 0], sizes = [128, 32], strides = [1, 1]} : vector<128x128xf32> to vector<128x32xf32>
    %47 = arith.truncf %46 : vector<128x32xf32> to vector<128x32xbf16>
    %c0_20 = arith.constant 0 : index
    %c0_21 = arith.constant 0 : index
    %c0_22 = arith.constant 0 : index
    %c0_23 = arith.constant 0 : index
    %48 = vector.load %arg8[%c0_20, %c0_21, %c0_22, %c0_23] : memref<1x4x128x32xbf16, #tpu.memory_space<vmem>>, vector<1x1x128x32xbf16>
    %49 = vector.shape_cast %48 : vector<1x1x128x32xbf16> to vector<128x32xbf16>
    %50 = vector.shape_cast %47 : vector<128x32xbf16> to vector<1x1x128x32xbf16>
    tpu.vector_store %arg8[%c0_20, %c0_21, %c0_22, %c0_23], %50 {strides = array<i32>} : memref<1x4x128x32xbf16, #tpu.memory_space<vmem>>, vector<1x1x128x32xbf16>,
    %51 = vector.extract_strided_slice %40 {offsets = [0, 0], sizes = [128, 32], strides = [1, 1]} : vector<128x128xf32> to vector<128x32xf32>
    %52 = arith.truncf %51 : vector<128x32xf32> to vector<128x32xbf16>
    %c0_24 = arith.constant 0 : index
    %c0_25 = arith.constant 0 : index
    %c0_26 = arith.constant 0 : index
    %c0_27 = arith.constant 0 : index
    %53 = vector.load %arg9[%c0_24, %c0_25, %c0_26, %c0_27] : memref<1x4x128x32xbf16, #tpu.memory_space<vmem>>, vector<1x1x128x32xbf16>
    %54 = vector.shape_cast %53 : vector<1x1x128x32xbf16> to vector<128x32xbf16>
    %55 = vector.shape_cast %52 : vector<128x32xbf16> to vector<1x1x128x32xbf16>
    tpu.vector_store %arg9[%c0_24, %c0_25, %c0_26, %c0_27], %55 {strides = array<i32>} : memref<1x4x128x32xbf16, #tpu.memory_space<vmem>>, vector<1x1x128x32xbf16>,
    %56 = vector.extract_strided_slice %38 {offsets = [0, 32], sizes = [128, 32], strides = [1, 1]} : vector<128x128xf32> to vector<128x32xf32>
    %57 = arith.truncf %56 : vector<128x32xf32> to vector<128x32xbf16>
    %c0_28 = arith.constant 0 : index
    %c1 = arith.constant 1 : index
    %c0_29 = arith.constant 0 : index
    %c0_30 = arith.constant 0 : index
    %58 = vector.load %arg7[%c0_28, %c1, %c0_29, %c0_30] : memref<1x4x128x32xbf16, #tpu.memory_space<vmem>>, vector<1x1x128x32xbf16>
    %59 = vector.shape_cast %58 : vector<1x1x128x32xbf16> to vector<128x32xbf16>
    %60 = vector.shape_cast %57 : vector<128x32xbf16> to vector<1x1x128x32xbf16>
    tpu.vector_store %arg7[%c0_28, %c1, %c0_29, %c0_30], %60 {strides = array<i32>} : memref<1x4x128x32xbf16, #tpu.memory_space<vmem>>, vector<1x1x128x32xbf16>,
    %61 = vector.extract_strided_slice %39 {offsets = [0, 32], sizes = [128, 32], strides = [1, 1]} : vector<128x128xf32> to vector<128x32xf32>
    %62 = arith.truncf %61 : vector<128x32xf32> to vector<128x32xbf16>
    %c0_31 = arith.constant 0 : index
    %c1_32 = arith.constant 1 : index
    %c0_33 = arith.constant 0 : index
    %c0_34 = arith.constant 0 : index
    %63 = vector.load %arg8[%c0_31, %c1_32, %c0_33, %c0_34] : memref<1x4x128x32xbf16, #tpu.memory_space<vmem>>, vector<1x1x128x32xbf16>
    %64 = vector.shape_cast %63 : vector<1x1x128x32xbf16> to vector<128x32xbf16>
    %65 = vector.shape_cast %62 : vector<128x32xbf16> to vector<1x1x128x32xbf16>
    tpu.vector_store %arg8[%c0_31, %c1_32, %c0_33, %c0_34], %65 {strides = array<i32>} : memref<1x4x128x32xbf16, #tpu.memory_space<vmem>>, vector<1x1x128x32xbf16>,
    %66 = vector.extract_strided_slice %40 {offsets = [0, 32], sizes = [128, 32], strides = [1, 1]} : vector<128x128xf32> to vector<128x32xf32>
    %67 = arith.truncf %66 : vector<128x32xf32> to vector<128x32xbf16>
    %c0_35 = arith.constant 0 : index
    %c1_36 = arith.constant 1 : index
    %c0_37 = arith.constant 0 : index
    %c0_38 = arith.constant 0 : index
    %68 = vector.load %arg9[%c0_35, %c1_36, %c0_37, %c0_38] : memref<1x4x128x32xbf16, #tpu.memory_space<vmem>>, vector<1x1x128x32xbf16>
    %69 = vector.shape_cast %68 : vector<1x1x128x32xbf16> to vector<128x32xbf16>
    %70 = vector.shape_cast %67 : vector<128x32xbf16> to vector<1x1x128x32xbf16>
    tpu.vector_store %arg9[%c0_35, %c1_36, %c0_37, %c0_38], %70 {strides = array<i32>} : memref<1x4x128x32xbf16, #tpu.memory_space<vmem>>, vector<1x1x128x32xbf16>,
    %71 = vector.extract_strided_slice %38 {offsets = [0, 64], sizes = [128, 32], strides = [1, 1]} : vector<128x128xf32> to vector<128x32xf32>
    %72 = arith.truncf %71 : vector<128x32xf32> to vector<128x32xbf16>
    %c0_39 = arith.constant 0 : index
    %c2 = arith.constant 2 : index
    %c0_40 = arith.constant 0 : index
    %c0_41 = arith.constant 0 : index
    %73 = vector.load %arg7[%c0_39, %c2, %c0_40, %c0_41] : memref<1x4x128x32xbf16, #tpu.memory_space<vmem>>, vector<1x1x128x32xbf16>
    %74 = vector.shape_cast %73 : vector<1x1x128x32xbf16> to vector<128x32xbf16>
    %75 = vector.shape_cast %72 : vector<128x32xbf16> to vector<1x1x128x32xbf16>
    tpu.vector_store %arg7[%c0_39, %c2, %c0_40, %c0_41], %75 {strides = array<i32>} : memref<1x4x128x32xbf16, #tpu.memory_space<vmem>>, vector<1x1x128x32xbf16>,
    %76 = vector.extract_strided_slice %39 {offsets = [0, 64], sizes = [128, 32], strides = [1, 1]} : vector<128x128xf32> to vector<128x32xf32>
    %77 = arith.truncf %76 : vector<128x32xf32> to vector<128x32xbf16>
    %c0_42 = arith.constant 0 : index
    %c2_43 = arith.constant 2 : index
    %c0_44 = arith.constant 0 : index
    %c0_45 = arith.constant 0 : index
    %78 = vector.load %arg8[%c0_42, %c2_43, %c0_44, %c0_45] : memref<1x4x128x32xbf16, #tpu.memory_space<vmem>>, vector<1x1x128x32xbf16>
    %79 = vector.shape_cast %78 : vector<1x1x128x32xbf16> to vector<128x32xbf16>
    %80 = vector.shape_cast %77 : vector<128x32xbf16> to vector<1x1x128x32xbf16>
    tpu.vector_store %arg8[%c0_42, %c2_43, %c0_44, %c0_45], %80 {strides = array<i32>} : memref<1x4x128x32xbf16, #tpu.memory_space<vmem>>, vector<1x1x128x32xbf16>,
    %81 = vector.extract_strided_slice %40 {offsets = [0, 64], sizes = [128, 32], strides = [1, 1]} : vector<128x128xf32> to vector<128x32xf32>
    %82 = arith.truncf %81 : vector<128x32xf32> to vector<128x32xbf16>
    %c0_46 = arith.constant 0 : index
    %c2_47 = arith.constant 2 : index
    %c0_48 = arith.constant 0 : index
    %c0_49 = arith.constant 0 : index
    %83 = vector.load %arg9[%c0_46, %c2_47, %c0_48, %c0_49] : memref<1x4x128x32xbf16, #tpu.memory_space<vmem>>, vector<1x1x128x32xbf16>
    %84 = vector.shape_cast %83 : vector<1x1x128x32xbf16> to vector<128x32xbf16>
    %85 = vector.shape_cast %82 : vector<128x32xbf16> to vector<1x1x128x32xbf16>
    tpu.vector_store %arg9[%c0_46, %c2_47, %c0_48, %c0_49], %85 {strides = array<i32>} : memref<1x4x128x32xbf16, #tpu.memory_space<vmem>>, vector<1x1x128x32xbf16>,
    %86 = vector.extract_strided_slice %38 {offsets = [0, 96], sizes = [128, 32], strides = [1, 1]} : vector<128x128xf32> to vector<128x32xf32>
    %87 = arith.truncf %86 : vector<128x32xf32> to vector<128x32xbf16>
    %c0_50 = arith.constant 0 : index
    %c3 = arith.constant 3 : index
    %c0_51 = arith.constant 0 : index
    %c0_52 = arith.constant 0 : index
    %88 = vector.load %arg7[%c0_50, %c3, %c0_51, %c0_52] : memref<1x4x128x32xbf16, #tpu.memory_space<vmem>>, vector<1x1x128x32xbf16>
    %89 = vector.shape_cast %88 : vector<1x1x128x32xbf16> to vector<128x32xbf16>
    %90 = vector.shape_cast %87 : vector<128x32xbf16> to vector<1x1x128x32xbf16>
    tpu.vector_store %arg7[%c0_50, %c3, %c0_51, %c0_52], %90 {strides = array<i32>} : memref<1x4x128x32xbf16, #tpu.memory_space<vmem>>, vector<1x1x128x32xbf16>,
    %91 = vector.extract_strided_slice %39 {offsets = [0, 96], sizes = [128, 32], strides = [1, 1]} : vector<128x128xf32> to vector<128x32xf32>
    %92 = arith.truncf %91 : vector<128x32xf32> to vector<128x32xbf16>
    %c0_53 = arith.constant 0 : index
    %c3_54 = arith.constant 3 : index
    %c0_55 = arith.constant 0 : index
    %c0_56 = arith.constant 0 : index
    %93 = vector.load %arg8[%c0_53, %c3_54, %c0_55, %c0_56] : memref<1x4x128x32xbf16, #tpu.memory_space<vmem>>, vector<1x1x128x32xbf16>
    %94 = vector.shape_cast %93 : vector<1x1x128x32xbf16> to vector<128x32xbf16>
    %95 = vector.shape_cast %92 : vector<128x32xbf16> to vector<1x1x128x32xbf16>
    tpu.vector_store %arg8[%c0_53, %c3_54, %c0_55, %c0_56], %95 {strides = array<i32>} : memref<1x4x128x32xbf16, #tpu.memory_space<vmem>>, vector<1x1x128x32xbf16>,
    %96 = vector.extract_strided_slice %40 {offsets = [0, 96], sizes = [128, 32], strides = [1, 1]} : vector<128x128xf32> to vector<128x32xf32>
    %97 = arith.truncf %96 : vector<128x32xf32> to vector<128x32xbf16>
    %c0_57 = arith.constant 0 : index
    %c3_58 = arith.constant 3 : index
    %c0_59 = arith.constant 0 : index
    %c0_60 = arith.constant 0 : index
    %98 = vector.load %arg9[%c0_57, %c3_58, %c0_59, %c0_60] : memref<1x4x128x32xbf16, #tpu.memory_space<vmem>>, vector<1x1x128x32xbf16>
    %99 = vector.shape_cast %98 : vector<1x1x128x32xbf16> to vector<128x32xbf16>
    %100 = vector.shape_cast %97 : vector<128x32xbf16> to vector<1x1x128x32xbf16>
    tpu.vector_store %arg9[%c0_57, %c3_58, %c0_59, %c0_60], %100 {strides = array<i32>} : memref<1x4x128x32xbf16, #tpu.memory_space<vmem>>, vector<1x1x128x32xbf16>,
    return
  }
  func.func @transform_0(%arg0: i32, %arg1: i32) -> (i32, i32, i32) {
    %c0_i32 = arith.constant 0 : i32
    %c0_i32_0 = arith.constant 0 : i32
    return %arg0, %arg1, %c0_i32 : i32, i32, i32
  }
  func.func @transform_1(%arg0: i32, %arg1: i32) -> (i32, i32) {
    %c0_i32 = arith.constant 0 : i32
    %c0_i32_0 = arith.constant 0 : i32
    %c0_i32_1 = arith.constant 0 : i32
    return %c0_i32, %c0_i32_0 : i32, i32
  }
  func.func @transform_2(%arg0: i32, %arg1: i32) -> (i32, i32) {
    %c0_i32 = arith.constant 0 : i32
    %c0_i32_0 = arith.constant 0 : i32
    %c0_i32_1 = arith.constant 0 : i32
    return %c0_i32, %c0_i32_0 : i32, i32
  }
  func.func @transform_3(%arg0: i32, %arg1: i32) -> (i32, i32) {
    %c0_i32 = arith.constant 0 : i32
    %c0_i32_0 = arith.constant 0 : i32
    %c0_i32_1 = arith.constant 0 : i32
    return %c0_i32, %c0_i32_0 : i32, i32
  }
  func.func @transform_4(%arg0: i32, %arg1: i32) -> (i32, i32) {
    %c0_i32 = arith.constant 0 : i32
    %c0_i32_0 = arith.constant 0 : i32
    %c0_i32_1 = arith.constant 0 : i32
    return %c0_i32, %c0_i32_0 : i32, i32
  }
  func.func @transform_5(%arg0: i32, %arg1: i32) -> (i32, i32, i32, i32) {
    %c0_i32 = arith.constant 0 : i32
    %c0_i32_0 = arith.constant 0 : i32
    %c0_i32_1 = arith.constant 0 : i32
    return %arg0, %c0_i32, %arg1, %c0_i32_0 : i32, i32, i32, i32
  }
  func.func @transform_6(%arg0: i32, %arg1: i32) -> (i32, i32, i32, i32) {
    %c0_i32 = arith.constant 0 : i32
    %c0_i32_0 = arith.constant 0 : i32
    %c0_i32_1 = arith.constant 0 : i32
    return %arg0, %c0_i32, %arg1, %c0_i32_0 : i32, i32, i32, i32
  }
  func.func @transform_7(%arg0: i32, %arg1: i32) -> (i32, i32, i32, i32) {
    %c0_i32 = arith.constant 0 : i32
    %c0_i32_0 = arith.constant 0 : i32
    %c0_i32_1 = arith.constant 0 : i32
    return %arg0, %c0_i32, %arg1, %c0_i32_0 : i32, i32, i32, i32
  }
}

</mosaic_0001>

<bundles_post_ra>
// kernel: tpu_custom_call.1
= control target key start
LH: loop header
LB: loop body
LE: loop exit
PB: predicated region body
PF: predicated region fallthrough
CT: control target
= control target key end

     0   :  { %s4983_s0 = inlined_call_operand.hbm [shape: f32[2,256,128], index: 0, kind: input, shape index: {}]   ;;  %s4984_s1 = inlined_call_operand.vmem [shape: f32[1,128], index: 1, kind: input, shape index: {}]   ;;  %s4985_s2 = inlined_call_operand.vmem [shape: f32[1,128], index: 2, kind: input, shape index: {}]   ;;  %s4986_s3 = inlined_call_operand.hbm [shape: bf16[128,384], index: 3, kind: input, shape index: {}]   ;;  %s4987_s4 = inlined_call_operand.vmem [shape: f32[1,384], index: 4, kind: input, shape index: {}]   ;;  %s4988_s5 = inlined_call_operand.vmem [shape: bf16[2,4,256,32], index: 5, kind: output, shape index: {0}]   ;;  %s4989_s6 = inlined_call_operand.vmem [shape: bf16[2,4,256,32], index: 6, kind: output, shape index: {1}]   ;;  %s4990_s7 = inlined_call_operand.vmem [shape: bf16[2,4,256,32], index: 7, kind: output, shape index: {2}]  }
   0x1   :  { %4994 = sst [smem:[#allocation15_spill]] %s4986_s3 }
   0x2   :  { %4995 = sst [smem:[#allocation16_spill]] %s4988_s5 }
   0x3   :  { %4996 = sst [smem:[#allocation17_spill]] %s4989_s6 }
   0x4   :  { %4997 = sst [smem:[#allocation18_spill]] %s4990_s7 }
   0x5   :  { %13 = vsyncpa [#allocation3], 0 }
   0x6   :  { %15 = vsyncpa [#allocation3 + $0x1], 0 }
   0x7   :  { %16 = vsyncpa [#allocation5], 0  ;;  %s3563_s24 = smov 0   ;;  %s3565_s25 = smov 0  }
   0x8   :  { %s3567_s26 = smov 0   ;;  %s3569_s27 = smov 0  }
   0x9   :  { %s3571_s28 = smov 0   ;;  %s3573_s29 = smov 0  }
   0xa   :  { %s3575_s30 = smov 0   ;;  %s3577_s8 = smov 0  }
   0xb LB: > { %4998 = sst [smem:[#allocation11_spill]] %s3495_s27  ;;  %s2890_s9 = sadd.s32 4294967295, %s3511_s8   ;;  %s3511_s8 = sphi %s3577_s8, %s22_s8   ;;  %s3507_s30 = sphi %s3575_s30, %s5030_s30   ;;  %s3503_s29 = sphi %s3573_s29, %s5029_s29   ;;  %s3499_s28 = sphi %s3571_s28, %s5028_s28   ;;  %s3495_s27 = sphi %s3569_s27, %s5027_s27   ;;  %s3491_s26 = sphi %s3567_s26, %s5026_s26   ;;  %s3487_s25 = sphi %s3565_s25, %s5025_s25   ;;  %s3483_s24 = sphi %s3563_s24, %s5024_s24  }
   0xc   : > { %4999 = sst [smem:[#allocation12_spill]] %s3499_s28  ;;  %p56_p0 = scmp.ne.s32.totalorder %s3487_s25, %s3483_s24 }
   0xd   : > { %p3603_p1 = scmp.eq.s32.totalorder %s2890_s9, 0  ;;  %p3607_p2 = scmp.eq.s32.totalorder %s2890_s9, 3 }
   0xe   : > { %p2892_p3 = scmp.ge.s32.totalorder %s3511_s8, 1  ;;  %p235_p4 = scmp.lt.s32.totalorder %s3511_s8, 5 }
   0xf   : > { %p3615_p5 = por %p3603_p1, %p56_p0  ;;  %s3513_s14 = smov [#allocation4]  }
  0x10   : > { %p3619_p6 = pnand %p2892_p3, %p235_p4  ;;  %s253_s15 = sshll.u32 %s3513_s14, 4  ;;  %s254_s15 = int_to_ptr.vmem [resolvable:$true] %s253_s15 }
  0x11   : > { %s5002_s12 = scalar_select %p3615_p5, 1, 0 }
  0x12   : > { %p3239_p7 = pneg %p3619_p6  ;;  %s3398_s16 = scalar_lea.vmem %s254_s15, 3072 }
  0x13   : > { %p3399_p10 = scmp.ne.s32.totalorder %s254_s15, %s3398_s16  ;;  %p3406_p13 = scmp.lt.s32.totalorder %s254_s15, %s254_s15 }
  0x14   : > { %p3240_p8 = pnand %p3239_p7, %p3603_p1  ;;  %p3407_p0 = scmp.lt.s32.totalorder %s3398_s16, %s3398_s16 }
  0x16   : > { %p3389_p9 = pneg %p3240_p8  ;;  %p3408_p5 = por %p3407_p0, %p3406_p13 }
  0x18   : > { %p3401_p11 = pnand %p3399_p10, %p3389_p9 }
  0x1a   : > { %p3402_p12 = pneg %p3401_p11 }
  0x1c   : > { %p3409_p3 = pnand %p3408_p5, %p3402_p12 }
  0x1e   : > { %3412 = shalt.err (!%p3409_p3)
}
  0x1f   : > { %s3514_s17 = smov 192   ;;  %s3515_s18 = smov 12  }
  0x20   : > { %s5004_s3 = sld [smem:[#allocation15_spill]]  ;;  %s31_s21 = sadd.s32 1, %s3503_s29 }
  0x21   : > { %s34_s22 = sadd.s32 1, %s3507_s30  ;;  %p32_p4 = scmp.ge.s32.totalorder %s31_s21, 2 }
  0x22   : > { %s43_s23 = sadd.s32 1, %s3491_s26  ;;  %p50_p5 = scmp.ne.s32.totalorder %s3491_s26, %s3487_s25 }
  0x23   : > { %p51_p7 = scmp.eq.s32.totalorder %s3511_s8, 0  ;;  %s5032_s21 = smov (%p32_p4, %s31_s21), 0 }
  0x24   : > { %5005 = sst [smem:[#allocation13_spill]] %s5032_s21  ;;  %s5034_s22 = smov (!%p32_p4, %s34_s22), %s3507_s30 }
  0x25   : > { %s39_s24 = ssub.s32 %s3503_s29, %s5032_s21  ;;  %p3641_p9 = por %p51_p7, %p50_p5 }
  0x26   : > { %3242 = dma.hbm_to_vmem [thread:$0]  (!%p3240_p8), %s5004_s3, 3072, %s254_s15, [#allocation5], %s3514_s17, %s3514_s17, %s3515_s18  }
  0x27   : > { %p36_p8 = scmp.ge.s32.totalorder %s5034_s22, 2  ;;  %p3647_p10 = por %p3607_p2, %p50_p5 }
  0x28   : > { %p3248_p11 = scmp.lt.s32.totalorder %s3511_s8, 4  ;;  %s270_s15 = sand.u32 1, %s3491_s26  }
  0x29   : > { %s5007_s14 = scalar_select %p3647_p10, 1, 0 }
  0x2a   : > { %s5036_s22 = smov (%p36_p8, %s5034_s22), 0  ;;  %s2895_s16 = sshll.u32 %s270_s15, 7 }
  0x2b   : > { %5008 = sst [smem:[#allocation14_spill]] %s5007_s14  ;;  %s38_s17 = ssub.s32 %s3507_s30, %s5036_s22 }
  0x2c   : > { %s40_s18 = sor.u32 %s39_s24, %s38_s17  ;;  %s2896_s19 = sshll.u32 %s3503_s29, 4 }
  0x2d   : > { %p41_p12 = scmp.eq.s32.totalorder %s40_s18, 0  ;;  %s2897_s20 = sshll.u32 %s3507_s30, 5 }
  0x2e   : > { %s280_s3 = sadd.s32 %s2897_s20, %s2896_s19  ;;  %s274_s21 = scalar_lea.vmem [#allocation2], %s2895_s16 }
  0x2f   : > { %s283_s11 = sshll.u32 %s274_s21, 4  ;;  %s2898_s6 = sshll.u32 %s280_s3, 7  ;;  %s284_s11 = int_to_ptr.vmem [resolvable:$true] %s283_s11 }
  0x30   : > { %s3660_s7 = scalar_select %p41_p12, %s3491_s26, %s43_s23  }
  0x31   : > { %s282_s27 = scalar_lea.hbm %s4983_s0, %s2898_s6  ;;  %p3669_p2 = pnand %p3248_p11, %p3641_p9 }
  0x32   : > { %s271_s24 = scalar_lea.sflag [#allocation3], %s270_s15  ;;  %s3426_s16 = scalar_lea.vmem %s284_s11, 2048 }
  0x33   : > { %p3415_p13 = pneg %p3669_p2  ;;  %p3427_p0 = scmp.ne.s32.totalorder %s284_s11, %s3426_s16 }
  0x34   : > { %s3516_s3 = smov [#allocation2]  }
  0x35   : > { %p3429_p3 = pnand %p3427_p0, %p3415_p13  ;;  %s3431_s21 = sshll.u32 %s3516_s3, 4  ;;  %s3432_s21 = int_to_ptr.vmem [resolvable:$false] %s3431_s21 }
  0x36   : > { %s3433_s23 = scalar_lea.vmem %s3432_s21, 4096  ;;  %p3434_p5 = scmp.lt.s32.totalorder %s284_s11, %s3432_s21 }
  0x37   : > { %p3430_p4 = pneg %p3429_p3  ;;  %p3435_p7 = scmp.lt.s32.totalorder %s3433_s23, %s3426_s16 }
  0x39   : > { %p3436_p8 = por %p3435_p7, %p3434_p5 }
  0x3b   : > { %p3437_p12 = pnand %p3436_p8, %p3430_p4 }
  0x3d   : > { %3440 = shalt.err (!%p3437_p12)
}
  0x3e   : > { %s3517_s5 = smov 128   ;;  %s3518_s6 = smov 8  }
  0x3f   : > { %3246 = dma.hbm_to_vmem [thread:$0]  (!%p3669_p2), %s282_s27, 2048, %s284_s11, %s271_s24, %s3517_s5, %s3517_s5, %s3518_s6  }
  0x40   : > { %295 = sbr.rel (%p3619_p6) target bundleno = 1049 (0x419), region = 40  ;;  %s3680_s28 = sand.u32 (!%p3619_p6), 1, %s3487_s25  }
  0x41   : > { %s2900_s9 = sshll.u32 (!%p3619_p6), %s3680_s28, 7  ;;  %s298_s15 = scalar_lea.sflag (!%p3619_p6), [#allocation3], %s3680_s28 }
  0x42   : > { %s3684_s17 = scalar_lea.vmem (!%p3619_p6), [#allocation2], %s2900_s9  ;;  %p5010_p9 = scmp.ne.s32.totalorder (!%p3619_p6), %s5002_s12, 0 }
  0x45   : > { %3474 = dma.done.wait (%p5010_p9), %s298_s15, 2048  }
  0x46   : > { %3476 = vsyncadd (%p5010_p9), %s298_s15, 4294965248 }
  0x47   : > { %3478 = dma.done.wait (%p3603_p1), [#allocation5], 3072  }
  0x48   : > { %3480 = vsyncadd (%p3603_p1), [#allocation5], 4294964224  ;;  %v348_v0 = vld [vmem:[%s3684_s17] sm:$0xff]  ;;  %v350_v1 = vld [vmem:[%s3684_s17 + $0x10] sm:$0xff]  ;;  %s2902_s19 = sshll.u32 %s3680_s28, 8  ;;  %vm1062_vm0 = vcmask 257024  }
  0x49   : > { %366 = vadd.xlane.f32.xlu0 %v348_v0  ;;  %370 = vadd.xlane.f32.xlu1 %v350_v1  ;;  %v349_v2 = vld [vmem:[%s3684_s17 + $0x8] sm:$0xff]  ;;  %v351_v3 = vld [vmem:[%s3684_s17 + $0x18] sm:$0xff]  ;;  %v352_v4 = vld [vmem:[%s3684_s17 + $0x20] sm:$0xff]  ;;  %s3890_s20 = scalar_lea.vmem [#allocation6], %s2902_s19  ;;  %s3895_s11 = scalar_lea.vmem [#allocation7], %s2902_s19 }
  0x4a   : > { %v353_v5 = vld [vmem:[%s3684_s17 + $0x28] sm:$0xff]  ;;  %v354_v6 = vld [vmem:[%s3684_s17 + $0x30] sm:$0xff]  ;;  %v355_v7 = vld [vmem:[%s3684_s17 + $0x38] sm:$0xff]  ;;  %s3907_s24 = scalar_lea.vmem [#allocation8], %s2902_s19  ;;  %s3520_s16 = smov 96  }
  0x4b   : > { %v3703_v8 = vld [vmem:[%s3684_s17 + $0x40] sm:$0xff]  ;;  %v3706_v9 = vld [vmem:[%s3684_s17 + $0x48] sm:$0xff]  ;;  %v3711_v10 = vld [vmem:[%s3684_s17 + $0x50] sm:$0xff]  ;;  %s3521_s3 = smov 64   ;;  %s3522_s21 = smov 32  }
  0x4c   : > { %v3714_v11 = vld [vmem:[%s3684_s17 + $0x58] sm:$0xff]  ;;  %v3719_v12 = vld [vmem:[%s3684_s17 + $0x60] sm:$0xff]  ;;  %v3722_v13 = vld [vmem:[%s3684_s17 + $0x68] sm:$0xff]  ;;  %s5012_s5 = sld [smem:[#allocation11_spill]] (%p3647_p10) }
  0x4d   : > { %368 = vadd.xlane.f32.xlu0 %v349_v2  ;;  %372 = vadd.xlane.f32.xlu1 %v351_v3  ;;  %v3727_v14 = vld [vmem:[%s3684_s17 + $0x70] sm:$0xff]  ;;  %v3730_v15 = vld [vmem:[%s3684_s17 + $0x78] sm:$0xff]  ;;  %s5013_s6 = sld [smem:[#allocation12_spill]] (%p3647_p10) }
  0x4e   : > { %v3323_v16 = vld [vmem:[#allocation4 + $0xac] ss:$12 sps:$4 sm:$0xff]   ;;  %v3325_v17 = vld [vmem:[#allocation4 + $0xa8] ss:$12 sps:$4 sm:$0xff]   ;;  %v3328_v54 = vld [vmem:[#allocation4 + $0xb0] ss:$12 sps:$4 sm:$0xff]  }
  0x4f   : > { %772 = vmatprep.subr.bf16.mxu0 %v3323_v16  ;;  %v3326_v53 = vld [vmem:[#allocation4 + $0x94] ss:$12 sps:$4 sm:$0xff]   ;;  %v3329_v55 = vld [vmem:[#allocation4 + $0x90] ss:$12 sps:$4 sm:$0xff]   ;;  %3201 = vmatprep.subr.bf16.mxu1 %v3328_v54  ;;  %s5014_s12 = sld [smem:[#allocation16_spill]] (%p3647_p10) }
  0x50   : > { %773 = vmatpush1.bf16.msra.mxu0 %v3325_v17  ;;  %3202 = vmatpush3.bf16.msra.mxu1 %v3328_v54  ;;  %v3334_v17 = vld [vmem:[#allocation4 + $0x64] ss:$12 sps:$4 sm:$0xff]  }
  0x51   : > { %374 = vadd.xlane.f32.xlu0 %v352_v4  ;;  %376 = vadd.xlane.f32.xlu1 %v353_v5 }
  0x52   : > { %774 = vmatprep.subr.bf16.mxu0 %v3326_v53  ;;  %s3126_s28 = sshll.u32 (%p3647_p10), %s5012_s5, 4 }
  0x53   : > { %s3127_s9 = sshll.u32 (%p3647_p10), %s5013_s6, 7 }
  0x54   : > { %775 = vmatpush1.bf16.msra.mxu0 %v3329_v55  ;;  %s1841_s15 = sadd.s32 (%p3647_p10), %s3127_s9, %s3126_s28 }
  0x55   : > { %378 = vadd.xlane.f32.xlu0 %v354_v6  ;;  %380 = vadd.xlane.f32.xlu1 %v355_v7  ;;  %s3128_s17 = sshll.u32 (%p3647_p10), %s1841_s15, 2 }
  0x56   : > { %s4756_s13 = scalar_lea.vmem (%p3647_p10), %s5014_s12, %s3128_s17 }
  0x59   : > { %382 = vadd.xlane.f32.xlu0 %v3703_v8  ;;  %384 = vadd.xlane.f32.xlu1 %v3706_v9 }
  0x5d   : > { %386 = vadd.xlane.f32.xlu0 %v3711_v10  ;;  %388 = vadd.xlane.f32.xlu1 %v3714_v11 }
  0x61   : > { %390 = vadd.xlane.f32.xlu0 %v3719_v12  ;;  %392 = vadd.xlane.f32.xlu1 %v3722_v13 }
  0x65   : > { %394 = vadd.xlane.f32.xlu0 %v3727_v14  ;;  %396 = vadd.xlane.f32.xlu1 %v3730_v15 }
  0xd2   : > { %v367_v18 = vpop.xlane.xlu0 %366  ;;  %v371_v19 = vpop.xlane.xlu1 %370 }
  0xd3   : > { %v399_v20 = vmul.f32 0.0078125, %v367_v18  ;;  %v401_v21 = vmul.f32 0.0078125, %v371_v19  ;;  %v3336_v18 = vld [vmem:[#allocation4 + $0x80] ss:$12 sps:$4 sm:$0xff]  }
  0xd5   : > { %v3734_v22 = vsub.f32 %v348_v0, %v399_v20  ;;  %v3736_v23 = vsub.f32 %v350_v1, %v401_v21  ;;  %v3330_v0 = vld [vmem:[#allocation4 + $0x7c] ss:$12 sps:$4 sm:$0xff]   ;;  %v3332_v1 = vld [vmem:[#allocation4 + $0x98] ss:$12 sps:$4 sm:$0xff]   ;;  %v3337_v20 = vld [vmem:[#allocation4 + $0x60] ss:$12 sps:$4 sm:$0xff]  }
  0xd6   : > { %v369_v24 = vpop.xlane.xlu0 %368  ;;  %v373_v25 = vpop.xlane.xlu1 %372  ;;  %776 = vmatprep.subr.bf16.mxu0 %v3330_v0  ;;  %3203 = vmatprep.subr.bf16.mxu1 %v3332_v1 }
  0xd7   : > { %v400_v26 = vmul.f32 0.0078125, %v369_v24  ;;  %v431_v27 = vmul.f32 %v3734_v22, %v3734_v22  ;;  %v402_v28 = vmul.f32 0.0078125, %v373_v25  ;;  %v433_v29 = vmul.f32 %v3736_v23, %v3736_v23  ;;  %3204 = vmatpush3.bf16.msra.mxu1 %v3332_v1 }
  0xd8   : > { %3205 = vmatprep.subr.bf16.mxu1 %v3336_v18 }
  0xd9   : > { %447 = vadd.xlane.f32.xlu0 %v431_v27  ;;  %v3742_v30 = vsub.f32 %v349_v2, %v400_v26  ;;  %v3744_v31 = vsub.f32 %v351_v3, %v402_v28  ;;  %v3338_v28 = vld [vmem:[#allocation4 + $0x4c] ss:$12 sps:$4 sm:$0xff]  }
  0xda   : > { %v375_v32 = vpop.xlane.xlu0 %374  ;;  %v377_v33 = vpop.xlane.xlu1 %376 }
  0xdb   : > { %v403_v34 = vmul.f32 0.0078125, %v375_v32  ;;  %v432_v35 = vmul.f32 %v3742_v30, %v3742_v30  ;;  %v404_v36 = vmul.f32 0.0078125, %v377_v33  ;;  %v434_v37 = vmul.f32 %v3744_v31, %v3744_v31  ;;  %3206 = vmatpush3.bf16.msra.mxu1 %v3336_v18  ;;  %v3341_v33 = vld [vmem:[#allocation4 + $0x48] ss:$12 sps:$4 sm:$0xff]  }
  0xdd   : > { %451 = vadd.xlane.f32.xlu0 %v433_v29  ;;  %449 = vadd.xlane.f32.xlu1 %v432_v35  ;;  %v3750_v38 = vsub.f32 %v352_v4, %v403_v34  ;;  %v3752_v39 = vsub.f32 %v353_v5, %v404_v36  ;;  %v3333_v5 = vld [vmem:[#allocation4 + $0x78] ss:$12 sps:$4 sm:$0xff]   ;;  %v3340_v29 = vld [vmem:[#allocation4 + $0x68] ss:$12 sps:$4 sm:$0xff]   ;;  %v3344_v36 = vld [vmem:[#allocation4 + $0x50] ss:$12 sps:$4 sm:$0xff]  }
  0xde   : > { %v379_v40 = vpop.xlane.xlu0 %378  ;;  %v381_v41 = vpop.xlane.xlu1 %380  ;;  %777 = vmatpush1.bf16.msra.mxu0 %v3333_v5  ;;  %3207 = vmatprep.subr.bf16.mxu1 %v3340_v29  ;;  %v3342_v35 = vld [vmem:[#allocation4 + $0x34] ss:$12 sps:$4 sm:$0xff]  }
  0xdf   : > { %v405_v42 = vmul.f32 0.0078125, %v379_v40  ;;  %v435_v43 = vmul.f32 %v3750_v38, %v3750_v38  ;;  %v406_v44 = vmul.f32 0.0078125, %v381_v41  ;;  %v436_v45 = vmul.f32 %v3752_v39, %v3752_v39  ;;  %778 = vmatprep.subr.bf16.mxu0 %v3334_v17  ;;  %3208 = vmatpush3.bf16.msra.mxu1 %v3340_v29  ;;  %v3348_v40 = vld [vmem:[#allocation4 + $0x38] ss:$12 sps:$4 sm:$0xff]  }
  0xe0   : > { %3209 = vmatprep.subr.bf16.mxu1 %v3344_v36  ;;  %v3349_v41 = vld [vmem:[#allocation4 + $0x18] ss:$12 sps:$4 sm:$0xff]  }
  0xe1   : > { %453 = vadd.xlane.f32.xlu1 %v434_v37  ;;  %455 = vadd.xlane.f32.xlu0 %v435_v43  ;;  %v3758_v46 = vsub.f32 %v354_v6, %v405_v42  ;;  %v3760_v47 = vsub.f32 %v355_v7, %v406_v44  ;;  %v3350_v42 = vld [vmem:[#allocation4 + $0x4] ss:$12 sps:$4 sm:$0xff]   ;;  %v3352_v43 = vld [vmem:[#allocation4 + $0x20] ss:$12 sps:$4 sm:$0xff]  }
  0xe2   : > { %v383_v48 = vpop.xlane.xlu0 %382  ;;  %v385_v49 = vpop.xlane.xlu1 %384  ;;  %779 = vmatpush1.bf16.msra.mxu0 %v3337_v20  ;;  %v3353_v44 = vld [vmem:[#allocation4] ss:$12 sps:$4 sm:$0xff]  }
  0xe3   : > { %v407_v50 = vmul.f32 0.0078125, %v383_v48  ;;  %v437_v51 = vmul.f32 %v3758_v46, %v3758_v46  ;;  %v408_v52 = vmul.f32 0.0078125, %v385_v49  ;;  %v438_v56 = vmul.f32 %v3760_v47, %v3760_v47  ;;  %780 = vmatprep.subr.bf16.mxu0 %v3338_v28  ;;  %3210 = vmatpush3.bf16.msra.mxu1 %v3344_v36 }
  0xe4   : > { %3211 = vmatprep.subr.bf16.mxu1 %v3348_v40  ;;  %v3519_v48 = vmov 0  }
  0xe5   : > { %457 = vadd.xlane.f32.xlu1 %v436_v45  ;;  %459 = vadd.xlane.f32.xlu0 %v437_v51  ;;  %v3767_v57 = vsub.f32 %v3703_v8, %v407_v50  ;;  %v3770_v58 = vsub.f32 %v3706_v9, %v408_v52  ;;  %v3354_v45 = vld [vmem:[#allocation4 + $0x8] ss:$12 sps:$4 sm:$0xff]  }
  0xe6   : > { %v387_v59 = vpop.xlane.xlu0 %386  ;;  %v389_v60 = vpop.xlane.xlu1 %388  ;;  %781 = vmatpush1.bf16.msra.mxu0 %v3341_v33  ;;  %804 = vmatprep.mubr.bf16.mxu0 %v3519_v48 }
  0xe7   : > { %v409_v61 = vmul.f32 0.0078125, %v387_v59  ;;  %v439_v62 = vmul.f32 %v3767_v57, %v3767_v57  ;;  %v410_v63 = vmul.f32 0.0078125, %v389_v60  ;;  %v440_v2 = vmul.f32 %v3770_v58, %v3770_v58  ;;  %782 = vmatprep.subr.bf16.mxu0 %v3342_v35  ;;  %3212 = vmatpush3.bf16.msra.mxu1 %v3348_v40 }
  0xe8   : > { %3213 = vmatprep.subr.bf16.mxu1 %v3352_v43 }
  0xe9   : > { %461 = vadd.xlane.f32.xlu1 %v438_v56  ;;  %463 = vadd.xlane.f32.xlu0 %v439_v62  ;;  %v3777_v3 = vsub.f32 %v3711_v10, %v409_v61  ;;  %v3780_v4 = vsub.f32 %v3714_v11, %v410_v63 }
  0xea   : > { %v391_v6 = vpop.xlane.xlu0 %390  ;;  %v393_v7 = vpop.xlane.xlu1 %392 }
  0xeb   : > { %v411_v8 = vmul.f32 0.0078125, %v391_v6  ;;  %v441_v9 = vmul.f32 %v3777_v3, %v3777_v3  ;;  %v412_v16 = vmul.f32 0.0078125, %v393_v7  ;;  %v442_v10 = vmul.f32 %v3780_v4, %v3780_v4  ;;  %3214 = vmatpush3.bf16.msra.mxu1 %v3352_v43 }
  0xec   : > { %3215 = vmatprep.subr.bf16.mxu1 %v3354_v45 }
  0xed   : > { %465 = vadd.xlane.f32.xlu1 %v440_v2  ;;  %467 = vadd.xlane.f32.xlu0 %v441_v9  ;;  %v3787_v11 = vsub.f32 %v3719_v12, %v411_v8  ;;  %v3790_v19 = vsub.f32 %v3722_v13, %v412_v16 }
  0xee   : > { %v395_v21 = vpop.xlane.xlu0 %394  ;;  %v397_v24 = vpop.xlane.xlu1 %396 }
  0xef   : > { %v413_v25 = vmul.f32 0.0078125, %v395_v21  ;;  %v443_v26 = vmul.f32 %v3787_v11, %v3787_v11  ;;  %v414_v27 = vmul.f32 0.0078125, %v397_v24  ;;  %v444_v12 = vmul.f32 %v3790_v19, %v3790_v19  ;;  %3216 = vmatpush3.bf16.msra.mxu1 %v3354_v45 }
  0xf1   : > { %469 = vadd.xlane.f32.xlu1 %v442_v10  ;;  %471 = vadd.xlane.f32.xlu0 %v443_v26  ;;  %v3797_v13 = vsub.f32 %v3727_v14, %v413_v25  ;;  %v3800_v32 = vsub.f32 %v3730_v15, %v414_v27  ;;  %v3345_v14 = vld [vmem:[#allocation4 + $0x30] ss:$12 sps:$4 sm:$0xff]   ;;  %v3810_v25 = vld [vmem:[%s4984_s1] ss:$0 sm:$0xff] }
  0xf2   : > { %783 = vmatpush1.bf16.msra.mxu0 %v3345_v14  ;;  %v3346_v15 = vld [vmem:[#allocation4 + $0x1c] ss:$12 sps:$4 sm:$0xff]   ;;  %v3817_v14 = vld [vmem:[%s4985_s2] ss:$0 sm:$0xff] }
  0xf3   : > { %v445_v34 = vmul.f32 %v3797_v13, %v3797_v13  ;;  %v446_v37 = vmul.f32 %v3800_v32, %v3800_v32  ;;  %784 = vmatprep.subr.bf16.mxu0 %v3346_v15 }
  0xf5   : > { %473 = vadd.xlane.f32.xlu1 %v444_v12  ;;  %475 = vadd.xlane.f32.xlu0 %v445_v34 }
  0xf6   : > { %785 = vmatpush1.bf16.msra.mxu0 %v3349_v41 }
  0xf7   : > { %786 = vmatprep.subr.bf16.mxu0 %v3350_v42 }
  0xf9   : > { %477 = vadd.xlane.f32.xlu1 %v446_v37 }
  0xfa   : > { %787 = vmatpush1.bf16.msra.mxu0 %v3353_v44 }
 0x162   : > { %v448_v49 = vpop.xlane.xlu0 %447 }
 0x163   : > { %v479_v50 = vmul.f32 0.0078125, %v448_v49 }
 0x165   : > { %v495_v51 = vadd.f32 1e-05, %v479_v50 }
 0x166   : > { %v450_v52 = vpop.xlane.xlu1 %449  ;;  %v452_v53 = vpop.xlane.xlu0 %451 }
 0x167   : > { %3355 = vrsqrt.f32 %v495_v51  ;;  %v480_v54 = vmul.f32 0.0078125, %v450_v52  ;;  %v481_v55 = vmul.f32 0.0078125, %v452_v53 }
 0x169   : > { %v496_v56 = vadd.f32 1e-05, %v480_v54  ;;  %v497_v59 = vadd.f32 1e-05, %v481_v55 }
 0x16a   : > { %v454_v60 = vpop.xlane.xlu1 %453  ;;  %v456_v61 = vpop.xlane.xlu0 %455 }
 0x16b   : > { %3357 = vrsqrt.f32 %v496_v56  ;;  %v482_v62 = vmul.f32 0.0078125, %v454_v60  ;;  %v483_v63 = vmul.f32 0.0078125, %v456_v61 }
 0x16c   : > { %3359 = vrsqrt.f32 %v497_v59 }
 0x16d   : > { %v498_v0 = vadd.f32 1e-05, %v482_v62  ;;  %v499_v1 = vadd.f32 1e-05, %v483_v63 }
 0x16e   : > { %v458_v2 = vpop.xlane.xlu1 %457  ;;  %v460_v5 = vpop.xlane.xlu0 %459 }
 0x16f   : > { %3361 = vrsqrt.f32 %v498_v0  ;;  %v484_v6 = vmul.f32 0.0078125, %v458_v2  ;;  %v485_v7 = vmul.f32 0.0078125, %v460_v5 }
 0x170   : > { %3363 = vrsqrt.f32 %v499_v1 }
 0x171   : > { %v500_v8 = vadd.f32 1e-05, %v484_v6  ;;  %v501_v9 = vadd.f32 1e-05, %v485_v7 }
 0x172   : > { %v462_v16 = vpop.xlane.xlu1 %461  ;;  %v464_v17 = vpop.xlane.xlu0 %463 }
 0x173   : > { %3365 = vrsqrt.f32 %v500_v8  ;;  %v486_v18 = vmul.f32 0.0078125, %v462_v16  ;;  %v487_v10 = vmul.f32 0.0078125, %v464_v17 }
 0x174   : > { %v3356_v20 = vpop.eup %3355  ;;  %3367 = vrsqrt.f32 %v501_v9 }
 0x175   : > { %v502_v21 = vadd.f32 1e-05, %v486_v18  ;;  %v503_v24 = vadd.f32 1e-05, %v487_v10  ;;  %v527_v26 = vmul.f32 %v3356_v20, %v3734_v22 }
 0x176   : > { %v466_v27 = vpop.xlane.xlu1 %465  ;;  %v468_v28 = vpop.xlane.xlu0 %467 }
 0x177   : > { %3369 = vrsqrt.f32 %v502_v21  ;;  %v488_v29 = vmul.f32 0.0078125, %v466_v27  ;;  %v489_v12 = vmul.f32 0.0078125, %v468_v28  ;;  %v549_v34 = vmul.f32 %v3810_v25, %v527_v26 }
 0x178   : > { %v3358_v33 = vpop.eup %3357  ;;  %3371 = vrsqrt.f32 %v503_v24 }
 0x179   : > { %v3360_v35 = vpop.eup %3359  ;;  %v504_v36 = vadd.f32 1e-05, %v488_v29  ;;  %v505_v37 = vadd.f32 1e-05, %v489_v12  ;;  %v528_v15 = vmul.f32 %v3358_v33, %v3742_v30  ;;  %v571_v49 = vadd.f32 %v3817_v14, %v549_v34 }
 0x17a   : > { %v470_v22 = vpop.xlane.xlu1 %469  ;;  %v472_v40 = vpop.xlane.xlu0 %471  ;;  %v529_v41 = vmul.f32 %v3360_v35, %v3736_v23 }
 0x17b   : > { %3373 = vrsqrt.f32 %v504_v36  ;;  %v490_v42 = vmul.f32 0.0078125, %v470_v22  ;;  %v491_v43 = vmul.f32 0.0078125, %v472_v40  ;;  %v550_v44 = vmul.f32 %v3810_v25, %v528_v15 }
 0x17c   : > { %v3362_v45 = vpop.eup %3361  ;;  %3375 = vrsqrt.f32 %v505_v37  ;;  %v551_v23 = vmul.f32 %v3810_v25, %v529_v41 }
 0x17d   : > { %v3364_v50 = vpop.eup %3363  ;;  %v506_v51 = vadd.f32 1e-05, %v490_v42  ;;  %v507_v52 = vadd.f32 1e-05, %v491_v43  ;;  %v572_v53 = vadd.f32 %v3817_v14, %v550_v44  ;;  %v530_v30 = vmul.f32 %v3362_v45, %v3744_v31 }
 0x17e   : > { %v474_v54 = vpop.xlane.xlu1 %473  ;;  %v476_v55 = vpop.xlane.xlu0 %475  ;;  %v531_v56 = vmul.f32 %v3364_v50, %v3750_v38  ;;  %v573_v38 = vadd.f32 %v3817_v14, %v551_v23 }
 0x17f   : > { %3377 = vrsqrt.f32 %v506_v51  ;;  %v492_v59 = vmul.f32 0.0078125, %v474_v54  ;;  %v493_v60 = vmul.f32 0.0078125, %v476_v55  ;;  %v587_v61 = vpack.c.bf16 %v572_v53, %v571_v49 }
 0x180   : > { %v3366_v62 = vpop.eup %3365  ;;  %3379 = vrsqrt.f32 %v507_v52  ;;  %v552_v63 = vmul.f32 %v3810_v25, %v530_v30  ;;  %v553_v5 = vmul.f32 %v3810_v25, %v531_v56 }
 0x181   : > { %v3368_v0 = vpop.eup %3367  ;;  %v508_v1 = vadd.f32 1e-05, %v492_v59  ;;  %v509_v2 = vadd.f32 1e-05, %v493_v60  ;;  %805 = vmatmul.mubr.bf16.vlgmr.msra.gmra.mxu0 %v587_v61  ;;  %3217 = vmatprep.mubr.bf16.mxu1 %v587_v61  ;;  %v532_v31 = vmul.f32 %v3366_v62, %v3752_v39 }
 0x182   : > { %v478_v6 = vpop.xlane.xlu1 %477  ;;  %v574_v7 = vadd.f32 %v3817_v14, %v552_v63  ;;  %814 = vmatprep.mubr.bf16.mxu0 %v3519_v48  ;;  %v533_v8 = vmul.f32 %v3368_v0, %v3758_v46  ;;  %v575_v21 = vadd.f32 %v3817_v14, %v553_v5 }
 0x183   : > { %3381 = vrsqrt.f32 %v508_v1  ;;  %v494_v9 = vmul.f32 0.0078125, %v478_v6  ;;  %v554_v16 = vmul.f32 %v3810_v25, %v532_v31 }
 0x184   : > { %v3370_v17 = vpop.eup %3369  ;;  %3383 = vrsqrt.f32 %v509_v2  ;;  %v588_v18 = vpack.c.bf16 %v574_v7, %v573_v38  ;;  %v555_v39 = vmul.f32 %v3810_v25, %v533_v8 }
 0x185   : > { %v3372_v10 = vpop.eup %3371  ;;  %v510_v20 = vadd.f32 1e-05, %v494_v9  ;;  %v576_v24 = vadd.f32 %v3817_v14, %v554_v16  ;;  %v534_v26 = vmul.f32 %v3370_v17, %v3760_v47 }
 0x186   : > { %3218 = vmatmul.mubr.bf16.vlgmr.msra.gmra.mxu1 %v588_v18  ;;  %v535_v46 = vmul.f32 %v3372_v10, %v3767_v57  ;;  %v577_v12 = vadd.f32 %v3817_v14, %v555_v39 }
 0x187   : > { %3385 = vrsqrt.f32 %v510_v20  ;;  %v589_v27 = vpack.c.bf16 %v576_v24, %v575_v21  ;;  %v556_v28 = vmul.f32 %v3810_v25, %v534_v26 }
 0x188   : > { %v3374_v29 = vpop.eup %3373  ;;  %v557_v36 = vmul.f32 %v3810_v25, %v535_v46 }
 0x189   : > { %v3376_v33 = vpop.eup %3375  ;;  %815 = vmatmul.mubr.bf16.gmra.mxu0 %v588_v18  ;;  %3221 = vmatprep.mubr.bf16.mxu1 %v589_v27  ;;  %v578_v34 = vadd.f32 %v3817_v14, %v556_v28  ;;  %v536_v35 = vmul.f32 %v3374_v29, %v3770_v58 }
 0x18a   : > { %824 = vmatprep.mubr.bf16.mxu0 %v3519_v48  ;;  %v537_v47 = vmul.f32 %v3376_v33, %v3777_v3  ;;  %v579_v41 = vadd.f32 %v3817_v14, %v557_v36 }
 0x18b   : > { %v590_v57 = vpack.c.bf16 %v578_v34, %v577_v12  ;;  %v558_v37 = vmul.f32 %v3810_v25, %v536_v35 }
 0x18c   : > { %v3378_v15 = vpop.eup %3377  ;;  %v559_v22 = vmul.f32 %v3810_v25, %v537_v47 }
 0x18d   : > { %v3380_v40 = vpop.eup %3379  ;;  %v580_v42 = vadd.f32 %v3817_v14, %v558_v37  ;;  %v538_v43 = vmul.f32 %v3378_v15, %v3780_v4 }
 0x18e   : > { %3222 = vmatmul.mubr.bf16.gmra.mxu1 %v590_v57  ;;  %v539_v58 = vmul.f32 %v3380_v40, %v3787_v11  ;;  %v581_v49 = vadd.f32 %v3817_v14, %v559_v22 }
 0x18f   : > { %v591_v44 = vpack.c.bf16 %v580_v42, %v579_v41  ;;  %v560_v45 = vmul.f32 %v3810_v25, %v538_v43 }
 0x190   : > { %v3382_v3 = vpop.eup %3381  ;;  %v561_v53 = vmul.f32 %v3810_v25, %v539_v58 }
 0x191   : > { %v3384_v50 = vpop.eup %3383  ;;  %825 = vmatmul.mubr.bf16.gmra.mxu0 %v589_v27  ;;  %3225 = vmatprep.mubr.bf16.mxu1 %v591_v44  ;;  %v582_v51 = vadd.f32 %v3817_v14, %v560_v45  ;;  %v540_v52 = vmul.f32 %v3382_v3, %v3790_v19 }
 0x192   : > { %834 = vmatprep.mubr.bf16.mxu0 %v3519_v48  ;;  %v541_v4 = vmul.f32 %v3384_v50, %v3797_v13  ;;  %v583_v55 = vadd.f32 %v3817_v14, %v561_v53 }
 0x193   : > { %v592_v11 = vpack.c.bf16 %v582_v51, %v581_v49  ;;  %v562_v30 = vmul.f32 %v3810_v25, %v540_v52 }
 0x194   : > { %v3386_v54 = vpop.eup %3385  ;;  %v563_v59 = vmul.f32 %v3810_v25, %v541_v4 }
 0x195   : > { %v584_v23 = vadd.f32 %v3817_v14, %v562_v30  ;;  %v542_v56 = vmul.f32 %v3386_v54, %v3800_v32  ;;  %v629_v32 = vlaneseq }
 0x196   : > { %3226 = vmatmul.mubr.bf16.gmra.mxu1 %v592_v11  ;;  %v585_v13 = vadd.f32 %v3817_v14, %v563_v59 }
 0x197   : > { %v593_v19 = vpack.c.bf16 %v584_v23, %v583_v55  ;;  %v564_v60 = vmul.f32 %v3810_v25, %v542_v56  ;;  %v630_v25 = vshrl.u32 %v629_v32, 7 }
 0x199   : > { %835 = vmatmul.mubr.bf16.gmra.mxu0 %v590_v57  ;;  %3229 = vmatprep.mubr.bf16.mxu1 %v593_v19  ;;  %v586_v61 = vadd.f32 %v3817_v14, %v564_v60  ;;  %v631_v63 = vsub.s32 0, %v630_v25  ;;  %v627_v14 = vld [vmem:[%s4987_s4] sm:$0x7]  ;;  %v635_v0 = vsub.s32 1, %v630_v25  ;;  %v639_v2 = vsub.s32 2, %v630_v25 }
 0x19a   : > { %844 = vmatprep.mubr.bf16.mxu0 %v3519_v48 }
 0x19b   : > { %v594_v62 = vpack.c.bf16 %v586_v61, %v585_v13  ;;  %v3875_v1 = vrot.slane %v627_v14, %v631_v63  ;;  %v3877_v31 = vrot.slane %v627_v14, %v635_v0 }
 0x19e   : > { %3230 = vmatmul.mubr.bf16.gmra.mxu1 %v594_v62 }
 0x1a1   : > { %845 = vmatmul.mubr.bf16.gmra.mxu0 %v591_v44 }
 0x1a2   : > { %854 = vmatprep.mubr.bf16.mxu0 %v3519_v48 }
 0x1a9   : > { %855 = vmatmul.mubr.bf16.gmra.mxu0 %v592_v11 }
 0x1aa   : > { %864 = vmatprep.mubr.bf16.mxu0 %v3519_v48 }
 0x1b1   : > { %865 = vmatmul.mubr.bf16.gmra.mxu0 %v593_v19 }
 0x1b2   : > { %874 = vmatprep.mubr.bf16.mxu0 %v3519_v48  ;;  %v3881_v48 = vrot.slane %v627_v14, %v639_v2 }
 0x1b9   : > { %875 = vmatmul.mubr.bf16.gmra.mxu0 %v594_v62 }
 0x241   : > { %v806_v5 = vpop.f32.mrf.mxu0 }
 0x242   : > { %v807_v6 = vadd.f32 %v806_v5, %v3875_v1 }
 0x243   : > { %v808_v38 = vpop.f32.mrf.mxu0 }
 0x244   : > { %v982_v7 = vmul.f32 0.17677669, %v807_v6  ;;  %v809_v8 = vadd.f32 %v808_v38, %v3877_v31 }
 0x245   : > { %v810_v9 = vpop.f32.mrf.mxu0 }
 0x246   : > { %v3884_v16 = vpack.c.bf16 %v982_v7, %v982_v7  ;;  %v3886_v17 = vpack.c.bf16 %v809_v8, %v809_v8  ;;  %v811_v18 = vadd.f32 %v810_v9, %v3875_v1  ;;  %v3219_v39 = vpop.f32.mrf.mxu1 }
 0x247   : > { %v928_v10 = vadd.f32 %v3219_v39, %v3881_v48  ;;  %v812_v20 = vpop.f32.mrf.mxu0 }
 0x248   : > { %1063 = vst.msk [vmem:[%s3890_s20] sm:$0xf] %vm1062_vm0, %v3884_v16  ;;  %1143 = vst.msk [vmem:[%s3895_s11] sm:$0xf] %vm1062_vm0, %v3886_v17  ;;  %v983_v21 = vmul.f32 0.17677669, %v811_v18  ;;  %v813_v24 = vadd.f32 %v812_v20, %v3877_v31  ;;  %v919_v26 = vpop.f32.mrf.mxu1 }
 0x249   : > { %v3171_v46 = vpack.c.bf16 %v928_v10, %v928_v10  ;;  %v920_v27 = vadd.f32 %v919_v26, %v3881_v48  ;;  %v816_v28 = vpop.f32.mrf.mxu0 }
 0x24a   : > { %v3902_v29 = vpack.c.bf16 %v983_v21, %v983_v21  ;;  %v3904_v12 = vpack.c.bf16 %v813_v24, %v813_v24  ;;  %v817_v33 = vadd.f32 %v816_v28, %v3875_v1  ;;  %v3220_v34 = vpop.f32.mrf.mxu1 }
 0x24b   : > { %1225 = vst.msk [vmem:[%s3907_s24 + $0x8] sm:$0xf] %vm1062_vm0, %v3171_v46  ;;  %v3911_v35 = vpack.c.bf16 %v920_v27, %v920_v27  ;;  %v931_v36 = vadd.f32 %v3220_v34, %v3881_v48  ;;  %1373 = vrot.lane.b32.xlu0 %v3171_v46, %s3520_s16  ;;  %v818_v47 = vpop.f32.mrf.mxu0 }
 0x24c   : > { %1064 = vst.msk [vmem:[%s3890_s20 + $0x4] sm:$0xf] %vm1062_vm0, %v3902_v29  ;;  %1144 = vst.msk [vmem:[%s3895_s11 + $0x4] sm:$0xf] %vm1062_vm0, %v3904_v12  ;;  %v984_v57 = vmul.f32 0.17677669, %v817_v33  ;;  %v819_v37 = vadd.f32 %v818_v47, %v3877_v31  ;;  %v922_v15 = vpop.f32.mrf.mxu1 }
 0x24d   : > { %1223 = vst.msk [vmem:[%s3907_s24] sm:$0xf] %vm1062_vm0, %v3911_v35  ;;  %v3172_v22 = vpack.c.bf16 %v931_v36, %v931_v36  ;;  %v923_v40 = vadd.f32 %v922_v15, %v3881_v48  ;;  %v820_v41 = vpop.f32.mrf.mxu0 }
 0x24e   : > { %v3926_v42 = vpack.c.bf16 %v984_v57, %v984_v57  ;;  %v3928_v43 = vpack.c.bf16 %v819_v37, %v819_v37  ;;  %v821_v58 = vadd.f32 %v820_v41, %v3875_v1  ;;  %v3223_v44 = vpop.f32.mrf.mxu1 }
 0x24f   : > { %1226 = vst.msk [vmem:[%s3907_s24 + $0xc] sm:$0xf] %vm1062_vm0, %v3172_v22  ;;  %v3933_v45 = vpack.c.bf16 %v923_v40, %v923_v40  ;;  %v944_v3 = vadd.f32 %v3223_v44, %v3881_v48  ;;  %1568 = vrot.lane.b32.xlu0 %v3171_v46, %s3521_s3  ;;  %1375 = vrot.lane.b32.xlu1 %v3172_v22, %s3520_s16  ;;  %v822_v49 = vpop.f32.mrf.mxu0 }
 0x250   : > { %1065 = vst.msk [vmem:[%s3890_s20 + $0x8] sm:$0xf] %vm1062_vm0, %v3926_v42  ;;  %1145 = vst.msk [vmem:[%s3895_s11 + $0x8] sm:$0xf] %vm1062_vm0, %v3928_v43  ;;  %v985_v50 = vmul.f32 0.17677669, %v821_v58  ;;  %v823_v51 = vadd.f32 %v822_v49, %v3877_v31  ;;  %v935_v52 = vpop.f32.mrf.mxu1 }
 0x251   : > { %1224 = vst.msk [vmem:[%s3907_s24 + $0x4] sm:$0xf] %vm1062_vm0, %v3933_v45  ;;  %v3948_v53 = vpack.c.bf16 %v944_v3, %v944_v3  ;;  %v936_v4 = vadd.f32 %v935_v52, %v3881_v48  ;;  %v826_v11 = vpop.f32.mrf.mxu0 }
 0x252   : > { %v3951_v30 = vpack.c.bf16 %v985_v50, %v985_v50  ;;  %v3953_v54 = vpack.c.bf16 %v823_v51, %v823_v51  ;;  %v827_v55 = vadd.f32 %v826_v11, %v3875_v1  ;;  %v3224_v23 = vpop.f32.mrf.mxu1 }
 0x253   : > { %1229 = vst.msk [vmem:[%s3907_s24 + $0x18] sm:$0xf] %vm1062_vm0, %v3948_v53  ;;  %v3959_v56 = vpack.c.bf16 %v936_v4, %v936_v4  ;;  %v947_v59 = vadd.f32 %v3224_v23, %v3881_v48  ;;  %1763 = vrot.lane.b32.xlu0 %v3171_v46, %s3522_s21  ;;  %1570 = vrot.lane.b32.xlu1 %v3172_v22, %s3521_s3  ;;  %v828_v19 = vpop.f32.mrf.mxu0 }
 0x254   : > { %1066 = vst.msk [vmem:[%s3890_s20 + $0xc] sm:$0xf] %vm1062_vm0, %v3951_v30  ;;  %1146 = vst.msk [vmem:[%s3895_s11 + $0xc] sm:$0xf] %vm1062_vm0, %v3953_v54  ;;  %v986_v60 = vmul.f32 0.17677669, %v827_v55  ;;  %v829_v13 = vadd.f32 %v828_v19, %v3877_v31  ;;  %v938_v61 = vpop.f32.mrf.mxu1 }
 0x255   : > { %1227 = vst.msk [vmem:[%s3907_s24 + $0x10] sm:$0xf] %vm1062_vm0, %v3959_v56  ;;  %v3974_v62 = vpack.c.bf16 %v947_v59, %v947_v59  ;;  %v939_v32 = vadd.f32 %v938_v61, %v3881_v48  ;;  %v830_v25 = vpop.f32.mrf.mxu0 }
 0x256   : > { %v3977_v63 = vpack.c.bf16 %v986_v60, %v986_v60  ;;  %v3979_v14 = vpack.c.bf16 %v829_v13, %v829_v13  ;;  %v831_v0 = vadd.f32 %v830_v25, %v3875_v1  ;;  %v3227_v2 = vpop.f32.mrf.mxu1 }
 0x257   : > { %1230 = vst.msk [vmem:[%s3907_s24 + $0x1c] sm:$0xf] %vm1062_vm0, %v3974_v62  ;;  %v3985_v5 = vpack.c.bf16 %v939_v32, %v939_v32  ;;  %v960_v6 = vadd.f32 %v3227_v2, %v3881_v48  ;;  %1239 = vrot.lane.b32.xlu0 %v3884_v16, %s3520_s16  ;;  %1765 = vrot.lane.b32.xlu1 %v3172_v22, %s3522_s21  ;;  %v832_v38 = vpop.f32.mrf.mxu0 }
 0x258   : > { %1067 = vst.msk [vmem:[%s3890_s20 + $0x10] sm:$0xf] %vm1062_vm0, %v3977_v63  ;;  %1147 = vst.msk [vmem:[%s3895_s11 + $0x10] sm:$0xf] %vm1062_vm0, %v3979_v14  ;;  %v987_v7 = vmul.f32 0.17677669, %v831_v0  ;;  %v833_v8 = vadd.f32 %v832_v38, %v3877_v31  ;;  %v951_v9 = vpop.f32.mrf.mxu1 }
 0x259   : > { %1228 = vst.msk [vmem:[%s3907_s24 + $0x14] sm:$0xf] %vm1062_vm0, %v3985_v5  ;;  %v4001_v18 = vpack.c.bf16 %v960_v6, %v960_v6  ;;  %v952_v39 = vadd.f32 %v951_v9, %v3881_v48  ;;  %v836_v10 = vpop.f32.mrf.mxu0 }
 0x25a   : > { %v4004_v20 = vpack.c.bf16 %v987_v7, %v987_v7  ;;  %v4006_v21 = vpack.c.bf16 %v833_v8, %v833_v8  ;;  %v837_v24 = vadd.f32 %v836_v10, %v3875_v1  ;;  %v3228_v26 = vpop.f32.mrf.mxu1 }
 0x25b   : > { %1233 = vst.msk [vmem:[%s3907_s24 + $0x28] sm:$0xf] %vm1062_vm0, %v4001_v18  ;;  %v4012_v46 = vpack.c.bf16 %v952_v39, %v952_v39  ;;  %v963_v27 = vadd.f32 %v3228_v26, %v3881_v48  ;;  %1304 = vrot.lane.b32.xlu0 %v3886_v17, %s3520_s16  ;;  %1241 = vrot.lane.b32.xlu1 %v3902_v29, %s3520_s16  ;;  %v838_v28 = vpop.f32.mrf.mxu0 }
 0x25c   : > { %1068 = vst.msk [vmem:[%s3890_s20 + $0x14] sm:$0xf] %vm1062_vm0, %v4004_v20  ;;  %1148 = vst.msk [vmem:[%s3895_s11 + $0x14] sm:$0xf] %vm1062_vm0, %v4006_v21  ;;  %v988_v33 = vmul.f32 0.17677669, %v837_v24  ;;  %v839_v34 = vadd.f32 %v838_v28, %v3877_v31  ;;  %v954_v36 = vpop.f32.mrf.mxu1 }
 0x25d   : > { %1231 = vst.msk [vmem:[%s3907_s24 + $0x20] sm:$0xf] %vm1062_vm0, %v4012_v46  ;;  %v4029_v47 = vpack.c.bf16 %v963_v27, %v963_v27  ;;  %v955_v57 = vadd.f32 %v954_v36, %v3881_v48  ;;  %v840_v37 = vpop.f32.mrf.mxu0 }
 0x25e   : > { %v4032_v15 = vpack.c.bf16 %v988_v33, %v988_v33  ;;  %v4034_v22 = vpack.c.bf16 %v839_v34, %v839_v34  ;;  %v841_v40 = vadd.f32 %v840_v37, %v3875_v1  ;;  %v3231_v41 = vpop.f32.mrf.mxu1 }
 0x25f   : > { %1234 = vst.msk [vmem:[%s3907_s24 + $0x2c] sm:$0xf] %vm1062_vm0, %v4029_v47  ;;  %v4040_v58 = vpack.c.bf16 %v955_v57, %v955_v57  ;;  %v976_v44 = vadd.f32 %v3231_v41, %v3881_v48  ;;  %1434 = vrot.lane.b32.xlu0 %v3884_v16, %s3521_s3  ;;  %1306 = vrot.lane.b32.xlu1 %v3904_v12, %s3520_s16  ;;  %v842_v3 = vpop.f32.mrf.mxu0 }
 0x260   : > { %1069 = vst.msk [vmem:[%s3890_s20 + $0x18] sm:$0xf] %vm1062_vm0, %v4032_v15  ;;  %1149 = vst.msk [vmem:[%s3895_s11 + $0x18] sm:$0xf] %vm1062_vm0, %v4034_v22  ;;  %v989_v49 = vmul.f32 0.17677669, %v841_v40  ;;  %v843_v50 = vadd.f32 %v842_v3, %v3877_v31  ;;  %v967_v51 = vpop.f32.mrf.mxu1 }
 0x261   : > { %1232 = vst.msk [vmem:[%s3907_s24 + $0x24] sm:$0xf] %vm1062_vm0, %v4040_v58  ;;  %v4057_v52 = vpack.c.bf16 %v976_v44, %v976_v44  ;;  %v968_v4 = vadd.f32 %v967_v51, %v3881_v48  ;;  %v846_v11 = vpop.f32.mrf.mxu0 }
 0x262   : > { %v4060_v55 = vpack.c.bf16 %v989_v49, %v989_v49  ;;  %v4062_v23 = vpack.c.bf16 %v843_v50, %v843_v50  ;;  %v847_v59 = vadd.f32 %v846_v11, %v3875_v1  ;;  %v3232_v19 = vpop.f32.mrf.mxu1 }
 0x263   : > { %1237 = vst.msk [vmem:[%s3907_s24 + $0x38] sm:$0xf] %vm1062_vm0, %v4057_v52  ;;  %v4068_v60 = vpack.c.bf16 %v968_v4, %v968_v4  ;;  %v979_v13 = vadd.f32 %v3232_v19, %v3881_v48  ;;  %1499 = vrot.lane.b32.xlu0 %v3886_v17, %s3521_s3  ;;  %1436 = vrot.lane.b32.xlu1 %v3902_v29, %s3521_s3  ;;  %v848_v61 = vpop.f32.mrf.mxu0 }
 0x264   : > { %1070 = vst.msk [vmem:[%s3890_s20 + $0x1c] sm:$0xf] %vm1062_vm0, %v4060_v55  ;;  %1150 = vst.msk [vmem:[%s3895_s11 + $0x1c] sm:$0xf] %vm1062_vm0, %v4062_v23  ;;  %v990_v32 = vmul.f32 0.17677669, %v847_v59  ;;  %v849_v25 = vadd.f32 %v848_v61, %v3877_v31  ;;  %v970_v0 = vpop.f32.mrf.mxu1 }
 0x265   : > { %1235 = vst.msk [vmem:[%s3907_s24 + $0x30] sm:$0xf] %vm1062_vm0, %v4068_v60  ;;  %v4085_v2 = vpack.c.bf16 %v979_v13, %v979_v13  ;;  %v971_v6 = vadd.f32 %v970_v0, %v3881_v48  ;;  %v850_v38 = vpop.f32.mrf.mxu0 }
 0x266   : > { %v4088_v7 = vpack.c.bf16 %v990_v32, %v990_v32  ;;  %v4090_v8 = vpack.c.bf16 %v849_v25, %v849_v25  ;;  %v851_v9 = vadd.f32 %v850_v38, %v3875_v1 }
 0x267   : > { %1238 = vst.msk [vmem:[%s3907_s24 + $0x3c] sm:$0xf] %vm1062_vm0, %v4085_v2  ;;  %v4096_v39 = vpack.c.bf16 %v971_v6, %v971_v6  ;;  %1629 = vrot.lane.b32.xlu0 %v3884_v16, %s3522_s21  ;;  %1501 = vrot.lane.b32.xlu1 %v3904_v12, %s3521_s3  ;;  %v852_v48 = vpop.f32.mrf.mxu0 }
 0x268   : > { %1071 = vst.msk [vmem:[%s3890_s20 + $0x20] sm:$0xf] %vm1062_vm0, %v4088_v7  ;;  %1151 = vst.msk [vmem:[%s3895_s11 + $0x20] sm:$0xf] %vm1062_vm0, %v4090_v8  ;;  %v991_v10 = vmul.f32 0.17677669, %v851_v9  ;;  %v853_v24 = vadd.f32 %v852_v48, %v3877_v31 }
 0x269   : > { %1236 = vst.msk [vmem:[%s3907_s24 + $0x34] sm:$0xf] %vm1062_vm0, %v4096_v39  ;;  %v856_v26 = vpop.f32.mrf.mxu0 }
 0x26a   : > { %v4112_v27 = vpack.c.bf16 %v991_v10, %v991_v10  ;;  %v4114_v16 = vpack.c.bf16 %v853_v24, %v853_v24  ;;  %v857_v28 = vadd.f32 %v856_v26, %v3875_v1 }
 0x26b   : > { %1694 = vrot.lane.b32.xlu0 %v3886_v17, %s3522_s21  ;;  %1631 = vrot.lane.b32.xlu1 %v3902_v29, %s3522_s21  ;;  %v858_v33 = vpop.f32.mrf.mxu0 }
 0x26c   : > { %1072 = vst.msk [vmem:[%s3890_s20 + $0x24] sm:$0xf] %vm1062_vm0, %v4112_v27  ;;  %1152 = vst.msk [vmem:[%s3895_s11 + $0x24] sm:$0xf] %vm1062_vm0, %v4114_v16  ;;  %v992_v34 = vmul.f32 0.17677669, %v857_v28  ;;  %v859_v36 = vadd.f32 %v858_v33, %v3877_v31 }
 0x26d   : > { %v860_v57 = vpop.f32.mrf.mxu0 }
 0x26e   : > { %v4128_v37 = vpack.c.bf16 %v992_v34, %v992_v34  ;;  %v4130_v40 = vpack.c.bf16 %v859_v36, %v859_v36  ;;  %v861_v17 = vadd.f32 %v860_v57, %v3875_v1 }
 0x26f   : > { %1696 = vrot.lane.b32.xlu1 %v3904_v12, %s3522_s21  ;;  %1369 = vrot.lane.b32.xlu0 %v3911_v35, %s3520_s16  ;;  %v862_v29 = vpop.f32.mrf.mxu0 }
 0x270   : > { %1073 = vst.msk [vmem:[%s3890_s20 + $0x28] sm:$0xf] %vm1062_vm0, %v4128_v37  ;;  %1153 = vst.msk [vmem:[%s3895_s11 + $0x28] sm:$0xf] %vm1062_vm0, %v4130_v40  ;;  %v993_v41 = vmul.f32 0.17677669, %v861_v17  ;;  %v863_v44 = vadd.f32 %v862_v29, %v3877_v31 }
 0x271   : > { %v866_v3 = vpop.f32.mrf.mxu0 }
 0x272   : > { %v4144_v49 = vpack.c.bf16 %v993_v41, %v993_v41  ;;  %v4146_v50 = vpack.c.bf16 %v863_v44, %v863_v44  ;;  %v867_v12 = vadd.f32 %v866_v3, %v3875_v1 }
 0x273   : > { %1371 = vrot.lane.b32.xlu1 %v3933_v45, %s3520_s16  ;;  %1564 = vrot.lane.b32.xlu0 %v3911_v35, %s3521_s3  ;;  %v868_v51 = vpop.f32.mrf.mxu0 }
 0x274   : > { %1074 = vst.msk [vmem:[%s3890_s20 + $0x2c] sm:$0xf] %vm1062_vm0, %v4144_v49  ;;  %1154 = vst.msk [vmem:[%s3895_s11 + $0x2c] sm:$0xf] %vm1062_vm0, %v4146_v50  ;;  %v994_v4 = vmul.f32 0.17677669, %v867_v12  ;;  %v869_v11 = vadd.f32 %v868_v51, %v3877_v31 }
 0x275   : > { %v870_v59 = vpop.f32.mrf.mxu0 }
 0x276   : > { %v4160_v19 = vpack.c.bf16 %v994_v4, %v994_v4  ;;  %v4162_v13 = vpack.c.bf16 %v869_v11, %v869_v11  ;;  %v871_v61 = vadd.f32 %v870_v59, %v3875_v1 }
 0x277   : > { %1566 = vrot.lane.b32.xlu1 %v3933_v45, %s3521_s3  ;;  %1759 = vrot.lane.b32.xlu0 %v3911_v35, %s3522_s21  ;;  %v872_v32 = vpop.f32.mrf.mxu0 }
 0x278   : > { %1075 = vst.msk [vmem:[%s3890_s20 + $0x30] sm:$0xf] %vm1062_vm0, %v4160_v19  ;;  %1155 = vst.msk [vmem:[%s3895_s11 + $0x30] sm:$0xf] %vm1062_vm0, %v4162_v13  ;;  %v995_v25 = vmul.f32 0.17677669, %v871_v61  ;;  %v873_v0 = vadd.f32 %v872_v32, %v3877_v31 }
 0x279   : > { %v876_v6 = vpop.f32.mrf.mxu0 }
 0x27a   : > { %v4176_v38 = vpack.c.bf16 %v995_v25, %v995_v25  ;;  %v4178_v9 = vpack.c.bf16 %v873_v0, %v873_v0  ;;  %v877_v48 = vadd.f32 %v876_v6, %v3875_v1 }
 0x27b   : > { %1761 = vrot.lane.b32.xlu1 %v3933_v45, %s3522_s21  ;;  %1381 = vrot.lane.b32.xlu0 %v3948_v53, %s3520_s16  ;;  %v878_v35 = vpop.f32.mrf.mxu0 }
 0x27c   : > { %1076 = vst.msk [vmem:[%s3890_s20 + $0x34] sm:$0xf] %vm1062_vm0, %v4176_v38  ;;  %1156 = vst.msk [vmem:[%s3895_s11 + $0x34] sm:$0xf] %vm1062_vm0, %v4178_v9  ;;  %v996_v10 = vmul.f32 0.17677669, %v877_v48  ;;  %v879_v24 = vadd.f32 %v878_v35, %v3877_v31 }
 0x27d   : > { %v880_v26 = vpop.f32.mrf.mxu0 }
 0x27e   : > { %v4192_v28 = vpack.c.bf16 %v996_v10, %v996_v10  ;;  %v4194_v33 = vpack.c.bf16 %v879_v24, %v879_v24  ;;  %v881_v45 = vadd.f32 %v880_v26, %v3875_v1 }
 0x27f   : > { %1243 = vrot.lane.b32.xlu1 %v3926_v42, %s3520_s16  ;;  %1576 = vrot.lane.b32.xlu0 %v3948_v53, %s3521_s3  ;;  %v882_v34 = vpop.f32.mrf.mxu0 }
 0x280   : > { %1077 = vst.msk [vmem:[%s3890_s20 + $0x38] sm:$0xf] %vm1062_vm0, %v4192_v28  ;;  %1157 = vst.msk [vmem:[%s3895_s11 + $0x38] sm:$0xf] %vm1062_vm0, %v4194_v33  ;;  %v997_v36 = vmul.f32 0.17677669, %v881_v45  ;;  %v883_v57 = vadd.f32 %v882_v34, %v3877_v31 }
 0x282   : > { %v4208_v17 = vpack.c.bf16 %v997_v36, %v997_v36  ;;  %v4210_v29 = vpack.c.bf16 %v883_v57, %v883_v57 }
 0x283   : > { %1771 = vrot.lane.b32.xlu0 %v3948_v53, %s3522_s21  ;;  %1383 = vrot.lane.b32.xlu1 %v3974_v62, %s3520_s16 }
 0x284   : > { %1078 = vst.msk [vmem:[%s3890_s20 + $0x3c] sm:$0xf] %vm1062_vm0, %v4208_v17  ;;  %1158 = vst.msk [vmem:[%s3895_s11 + $0x3c] sm:$0xf] %vm1062_vm0, %v4210_v29 }
 0x287   : > { %1308 = vrot.lane.b32.xlu0 %v3928_v43, %s3520_s16  ;;  %1578 = vrot.lane.b32.xlu1 %v3974_v62, %s3521_s3 }
 0x28b   : > { %1438 = vrot.lane.b32.xlu0 %v3926_v42, %s3521_s3  ;;  %1773 = vrot.lane.b32.xlu1 %v3974_v62, %s3522_s21 }
 0x28f   : > { %1503 = vrot.lane.b32.xlu0 %v3928_v43, %s3521_s3  ;;  %1245 = vrot.lane.b32.xlu1 %v3951_v30, %s3520_s16 }
 0x293   : > { %1633 = vrot.lane.b32.xlu0 %v3926_v42, %s3522_s21  ;;  %1310 = vrot.lane.b32.xlu1 %v3953_v54, %s3520_s16 }
 0x297   : > { %1698 = vrot.lane.b32.xlu0 %v3928_v43, %s3522_s21  ;;  %1440 = vrot.lane.b32.xlu1 %v3951_v30, %s3521_s3 }
 0x29b   : > { %1505 = vrot.lane.b32.xlu1 %v3953_v54, %s3521_s3  ;;  %1377 = vrot.lane.b32.xlu0 %v3959_v56, %s3520_s16 }
 0x29f   : > { %1635 = vrot.lane.b32.xlu1 %v3951_v30, %s3522_s21  ;;  %1572 = vrot.lane.b32.xlu0 %v3959_v56, %s3521_s3 }
 0x2a3   : > { %1700 = vrot.lane.b32.xlu1 %v3953_v54, %s3522_s21  ;;  %1767 = vrot.lane.b32.xlu0 %v3959_v56, %s3522_s21 }
 0x2a7   : > { %1379 = vrot.lane.b32.xlu1 %v3985_v5, %s3520_s16  ;;  %1389 = vrot.lane.b32.xlu0 %v4001_v18, %s3520_s16 }
 0x2ab   : > { %1574 = vrot.lane.b32.xlu1 %v3985_v5, %s3521_s3  ;;  %1584 = vrot.lane.b32.xlu0 %v4001_v18, %s3521_s3 }
 0x2af   : > { %1769 = vrot.lane.b32.xlu1 %v3985_v5, %s3522_s21  ;;  %1779 = vrot.lane.b32.xlu0 %v4001_v18, %s3522_s21 }
 0x2b3   : > { %1247 = vrot.lane.b32.xlu0 %v3977_v63, %s3520_s16  ;;  %1391 = vrot.lane.b32.xlu1 %v4029_v47, %s3520_s16 }
 0x2b7   : > { %1312 = vrot.lane.b32.xlu0 %v3979_v14, %s3520_s16  ;;  %1586 = vrot.lane.b32.xlu1 %v4029_v47, %s3521_s3 }
 0x2bb   : > { %1442 = vrot.lane.b32.xlu0 %v3977_v63, %s3521_s3  ;;  %1781 = vrot.lane.b32.xlu1 %v4029_v47, %s3522_s21 }
 0x2bd   : > { %v1374_v1 = vpop.permute.xlu0 %1373 }
 0x2be   : > { %3013 = vst.msk [vmem:[%s3907_s24 + $0x48] sm:$0xf] %vm1062_vm0, %v1374_v1 }
 0x2bf   : > { %1507 = vrot.lane.b32.xlu0 %v3979_v14, %s3521_s3  ;;  %1249 = vrot.lane.b32.xlu1 %v4004_v20, %s3520_s16 }
 0x2c1   : > { %v1376_v31 = vpop.permute.xlu1 %1375  ;;  %v1569_v42 = vpop.permute.xlu0 %1568 }
 0x2c2   : > { %3014 = vst.msk [vmem:[%s3907_s24 + $0x4c] sm:$0xf] %vm1062_vm0, %v1376_v31  ;;  %3061 = vst.msk [vmem:[%s3907_s24 + $0x88] sm:$0xf] %vm1062_vm0, %v1569_v42 }
 0x2c3   : > { %1637 = vrot.lane.b32.xlu0 %v3977_v63, %s3522_s21  ;;  %1314 = vrot.lane.b32.xlu1 %v4006_v21, %s3520_s16 }
 0x2c5   : > { %v1571_v43 = vpop.permute.xlu1 %1570  ;;  %v1764_v53 = vpop.permute.xlu0 %1763 }
 0x2c6   : > { %3062 = vst.msk [vmem:[%s3907_s24 + $0x8c] sm:$0xf] %vm1062_vm0, %v1571_v43  ;;  %3109 = vst.msk [vmem:[%s3907_s24 + $0xc8] sm:$0xf] %vm1062_vm0, %v1764_v53 }
 0x2c7   : > { %1702 = vrot.lane.b32.xlu0 %v3979_v14, %s3522_s21  ;;  %1444 = vrot.lane.b32.xlu1 %v4004_v20, %s3521_s3 }
 0x2c9   : > { %v1766_v30 = vpop.permute.xlu1 %1765  ;;  %v1240_v54 = vpop.permute.xlu0 %1239 }
 0x2ca   : > { %3110 = vst.msk [vmem:[%s3907_s24 + $0xcc] sm:$0xf] %vm1062_vm0, %v1766_v30  ;;  %2979 = vst.msk [vmem:[%s3890_s20 + $0x40] sm:$0xf] %vm1062_vm0, %v1240_v54 }
 0x2cb   : > { %1509 = vrot.lane.b32.xlu1 %v4006_v21, %s3521_s3  ;;  %1385 = vrot.lane.b32.xlu0 %v4012_v46, %s3520_s16 }
 0x2cd   : > { %v1242_v56 = vpop.permute.xlu1 %1241  ;;  %v1305_v62 = vpop.permute.xlu0 %1304 }
 0x2ce   : > { %2980 = vst.msk [vmem:[%s3890_s20 + $0x44] sm:$0xf] %vm1062_vm0, %v1242_v56  ;;  %2995 = vst.msk [vmem:[%s3895_s11 + $0x40] sm:$0xf] %vm1062_vm0, %v1305_v62 }
 0x2cf   : > { %1639 = vrot.lane.b32.xlu1 %v4004_v20, %s3522_s21  ;;  %1580 = vrot.lane.b32.xlu0 %v4012_v46, %s3521_s3 }
 0x2d1   : > { %v1307_v63 = vpop.permute.xlu1 %1306  ;;  %v1435_v14 = vpop.permute.xlu0 %1434 }
 0x2d2   : > { %2996 = vst.msk [vmem:[%s3895_s11 + $0x44] sm:$0xf] %vm1062_vm0, %v1307_v63  ;;  %3027 = vst.msk [vmem:[%s3890_s20 + $0x80] sm:$0xf] %vm1062_vm0, %v1435_v14 }
 0x2d3   : > { %1704 = vrot.lane.b32.xlu1 %v4006_v21, %s3522_s21  ;;  %1775 = vrot.lane.b32.xlu0 %v4012_v46, %s3522_s21 }
 0x2d5   : > { %v1437_v5 = vpop.permute.xlu1 %1436  ;;  %v1500_v18 = vpop.permute.xlu0 %1499 }
 0x2d6   : > { %3028 = vst.msk [vmem:[%s3890_s20 + $0x84] sm:$0xf] %vm1062_vm0, %v1437_v5  ;;  %3043 = vst.msk [vmem:[%s3895_s11 + $0x80] sm:$0xf] %vm1062_vm0, %v1500_v18 }
 0x2d7   : > { %1387 = vrot.lane.b32.xlu1 %v4040_v58, %s3520_s16  ;;  %1397 = vrot.lane.b32.xlu0 %v4057_v52, %s3520_s16 }
 0x2d9   : > { %v1502_v20 = vpop.permute.xlu1 %1501  ;;  %v1630_v21 = vpop.permute.xlu0 %1629 }
 0x2da   : > { %3044 = vst.msk [vmem:[%s3895_s11 + $0x84] sm:$0xf] %vm1062_vm0, %v1502_v20  ;;  %3075 = vst.msk [vmem:[%s3890_s20 + $0xc0] sm:$0xf] %vm1062_vm0, %v1630_v21 }
 0x2db   : > { %1582 = vrot.lane.b32.xlu1 %v4040_v58, %s3521_s3  ;;  %1592 = vrot.lane.b32.xlu0 %v4057_v52, %s3521_s3 }
 0x2dd   : > { %v1632_v46 = vpop.permute.xlu1 %1631  ;;  %v1695_v47 = vpop.permute.xlu0 %1694 }
 0x2de   : > { %3076 = vst.msk [vmem:[%s3890_s20 + $0xc4] sm:$0xf] %vm1062_vm0, %v1632_v46  ;;  %3091 = vst.msk [vmem:[%s3895_s11 + $0xc0] sm:$0xf] %vm1062_vm0, %v1695_v47 }
 0x2df   : > { %1777 = vrot.lane.b32.xlu1 %v4040_v58, %s3522_s21  ;;  %1251 = vrot.lane.b32.xlu0 %v4032_v15, %s3520_s16 }
 0x2e1   : > { %v1697_v41 = vpop.permute.xlu1 %1696  ;;  %v1370_v44 = vpop.permute.xlu0 %1369 }
 0x2e2   : > { %3092 = vst.msk [vmem:[%s3895_s11 + $0xc4] sm:$0xf] %vm1062_vm0, %v1697_v41  ;;  %3011 = vst.msk [vmem:[%s3907_s24 + $0x40] sm:$0xf] %vm1062_vm0, %v1370_v44 }
 0x2e3   : > { %1316 = vrot.lane.b32.xlu0 %v4034_v22, %s3520_s16  ;;  %1399 = vrot.lane.b32.xlu1 %v4085_v2, %s3520_s16 }
 0x2e5   : > { %v1372_v58 = vpop.permute.xlu1 %1371  ;;  %v1565_v3 = vpop.permute.xlu0 %1564 }
 0x2e6   : > { %3012 = vst.msk [vmem:[%s3907_s24 + $0x44] sm:$0xf] %vm1062_vm0, %v1372_v58  ;;  %3059 = vst.msk [vmem:[%s3907_s24 + $0x80] sm:$0xf] %vm1062_vm0, %v1565_v3 }
 0x2e7   : > { %1446 = vrot.lane.b32.xlu0 %v4032_v15, %s3521_s3  ;;  %1594 = vrot.lane.b32.xlu1 %v4085_v2, %s3521_s3 }
 0x2e9   : > { %v1567_v12 = vpop.permute.xlu1 %1566  ;;  %v1760_v51 = vpop.permute.xlu0 %1759 }
 0x2ea   : > { %3060 = vst.msk [vmem:[%s3907_s24 + $0x84] sm:$0xf] %vm1062_vm0, %v1567_v12  ;;  %3107 = vst.msk [vmem:[%s3907_s24 + $0xc0] sm:$0xf] %vm1062_vm0, %v1760_v51 }
 0x2eb   : > { %1511 = vrot.lane.b32.xlu0 %v4034_v22, %s3521_s3  ;;  %1253 = vrot.lane.b32.xlu1 %v4060_v55, %s3520_s16 }
 0x2ed   : > { %v1762_v4 = vpop.permute.xlu1 %1761  ;;  %v1382_v11 = vpop.permute.xlu0 %1381 }
 0x2ee   : > { %3108 = vst.msk [vmem:[%s3907_s24 + $0xc4] sm:$0xf] %vm1062_vm0, %v1762_v4  ;;  %3017 = vst.msk [vmem:[%s3907_s24 + $0x58] sm:$0xf] %vm1062_vm0, %v1382_v11 }
 0x2ef   : > { %1641 = vrot.lane.b32.xlu0 %v4032_v15, %s3522_s21  ;;  %1318 = vrot.lane.b32.xlu1 %v4062_v23, %s3520_s16 }
 0x2f1   : > { %v1244_v59 = vpop.permute.xlu1 %1243  ;;  %v1577_v61 = vpop.permute.xlu0 %1576 }
 0x2f2   : > { %2981 = vst.msk [vmem:[%s3890_s20 + $0x48] sm:$0xf] %vm1062_vm0, %v1244_v59  ;;  %3065 = vst.msk [vmem:[%s3907_s24 + $0x98] sm:$0xf] %vm1062_vm0, %v1577_v61 }
 0x2f3   : > { %1706 = vrot.lane.b32.xlu0 %v4034_v22, %s3522_s21  ;;  %1448 = vrot.lane.b32.xlu1 %v4060_v55, %s3521_s3 }
 0x2f5   : > { %v1384_v15 = vpop.permute.xlu1 %1383  ;;  %v1772_v32 = vpop.permute.xlu0 %1771 }
 0x2f6   : > { %3018 = vst.msk [vmem:[%s3907_s24 + $0x5c] sm:$0xf] %vm1062_vm0, %v1384_v15  ;;  %3113 = vst.msk [vmem:[%s3907_s24 + $0xd8] sm:$0xf] %vm1062_vm0, %v1772_v32 }
 0x2f7   : > { %1513 = vrot.lane.b32.xlu1 %v4062_v23, %s3521_s3  ;;  %1393 = vrot.lane.b32.xlu0 %v4068_v60, %s3520_s16 }
 0x2f9   : > { %v1579_v22 = vpop.permute.xlu1 %1578  ;;  %v1309_v25 = vpop.permute.xlu0 %1308 }
 0x2fa   : > { %3066 = vst.msk [vmem:[%s3907_s24 + $0x9c] sm:$0xf] %vm1062_vm0, %v1579_v22  ;;  %2997 = vst.msk [vmem:[%s3895_s11 + $0x48] sm:$0xf] %vm1062_vm0, %v1309_v25 }
 0x2fb   : > { %1643 = vrot.lane.b32.xlu1 %v4060_v55, %s3522_s21  ;;  %1588 = vrot.lane.b32.xlu0 %v4068_v60, %s3521_s3 }
 0x2fd   : > { %v1774_v0 = vpop.permute.xlu1 %1773  ;;  %v1439_v6 = vpop.permute.xlu0 %1438 }
 0x2fe   : > { %3114 = vst.msk [vmem:[%s3907_s24 + $0xdc] sm:$0xf] %vm1062_vm0, %v1774_v0  ;;  %3029 = vst.msk [vmem:[%s3890_s20 + $0x88] sm:$0xf] %vm1062_vm0, %v1439_v6 }
 0x2ff   : > { %1708 = vrot.lane.b32.xlu1 %v4062_v23, %s3522_s21  ;;  %1783 = vrot.lane.b32.xlu0 %v4068_v60, %s3522_s21 }
 0x301   : > { %v1246_v55 = vpop.permute.xlu1 %1245  ;;  %v1504_v48 = vpop.permute.xlu0 %1503 }
 0x302   : > { %2982 = vst.msk [vmem:[%s3890_s20 + $0x4c] sm:$0xf] %vm1062_vm0, %v1246_v55  ;;  %3045 = vst.msk [vmem:[%s3895_s11 + $0x88] sm:$0xf] %vm1062_vm0, %v1504_v48 }
 0x303   : > { %1395 = vrot.lane.b32.xlu1 %v4096_v39, %s3520_s16  ;;  %1255 = vrot.lane.b32.xlu0 %v4088_v7, %s3520_s16 }
 0x305   : > { %v1311_v23 = vpop.permute.xlu1 %1310  ;;  %v1634_v35 = vpop.permute.xlu0 %1633 }
 0x306   : > { %2998 = vst.msk [vmem:[%s3895_s11 + $0x4c] sm:$0xf] %vm1062_vm0, %v1311_v23  ;;  %3077 = vst.msk [vmem:[%s3890_s20 + $0xc8] sm:$0xf] %vm1062_vm0, %v1634_v35 }
 0x307   : > { %1590 = vrot.lane.b32.xlu1 %v4096_v39, %s3521_s3  ;;  %1320 = vrot.lane.b32.xlu0 %v4090_v8, %s3520_s16 }
 0x309   : > { %v1441_v60 = vpop.permute.xlu1 %1440  ;;  %v1699_v10 = vpop.permute.xlu0 %1698 }
 0x30a   : > { %3030 = vst.msk [vmem:[%s3890_s20 + $0x8c] sm:$0xf] %vm1062_vm0, %v1441_v60  ;;  %3093 = vst.msk [vmem:[%s3895_s11 + $0xc8] sm:$0xf] %vm1062_vm0, %v1699_v10 }
 0x30b   : > { %1785 = vrot.lane.b32.xlu1 %v4096_v39, %s3522_s21  ;;  %1450 = vrot.lane.b32.xlu0 %v4088_v7, %s3521_s3 }
 0x30d   : > { %v1506_v24 = vpop.permute.xlu1 %1505  ;;  %v1378_v26 = vpop.permute.xlu0 %1377 }
 0x30e   : > { %3046 = vst.msk [vmem:[%s3895_s11 + $0x8c] sm:$0xf] %vm1062_vm0, %v1506_v24  ;;  %3015 = vst.msk [vmem:[%s3907_s24 + $0x50] sm:$0xf] %vm1062_vm0, %v1378_v26 }
 0x30f   : > { %1257 = vrot.lane.b32.xlu1 %v4112_v27, %s3520_s16  ;;  %1515 = vrot.lane.b32.xlu0 %v4090_v8, %s3521_s3 }
 0x311   : > { %v1636_v39 = vpop.permute.xlu1 %1635  ;;  %v1573_v45 = vpop.permute.xlu0 %1572 }
 0x312   : > { %3078 = vst.msk [vmem:[%s3890_s20 + $0xcc] sm:$0xf] %vm1062_vm0, %v1636_v39  ;;  %3063 = vst.msk [vmem:[%s3907_s24 + $0x90] sm:$0xf] %vm1062_vm0, %v1573_v45 }
 0x313   : > { %1322 = vrot.lane.b32.xlu1 %v4114_v16, %s3520_s16  ;;  %1645 = vrot.lane.b32.xlu0 %v4088_v7, %s3522_s21 }
 0x315   : > { %v1701_v34 = vpop.permute.xlu1 %1700  ;;  %v1768_v36 = vpop.permute.xlu0 %1767 }
 0x316   : > { %3094 = vst.msk [vmem:[%s3895_s11 + $0xcc] sm:$0xf] %vm1062_vm0, %v1701_v34  ;;  %3111 = vst.msk [vmem:[%s3907_s24 + $0xd0] sm:$0xf] %vm1062_vm0, %v1768_v36 }
 0x317   : > { %1452 = vrot.lane.b32.xlu1 %v4112_v27, %s3521_s3  ;;  %1710 = vrot.lane.b32.xlu0 %v4090_v8, %s3522_s21 }
 0x319   : > { %v1380_v57 = vpop.permute.xlu1 %1379  ;;  %v1390_v1 = vpop.permute.xlu0 %1389 }
 0x31a   : > { %3016 = vst.msk [vmem:[%s3907_s24 + $0x54] sm:$0xf] %vm1062_vm0, %v1380_v57  ;;  %3021 = vst.msk [vmem:[%s3907_s24 + $0x68] sm:$0xf] %vm1062_vm0, %v1390_v1 }
 0x31b   : > { %1517 = vrot.lane.b32.xlu1 %v4114_v16, %s3521_s3  ;;  %1259 = vrot.lane.b32.xlu0 %v4128_v37, %s3520_s16 }
 0x31d   : > { %v1575_v7 = vpop.permute.xlu1 %1574  ;;  %v1585_v31 = vpop.permute.xlu0 %1584 }
 0x31e   : > { %3064 = vst.msk [vmem:[%s3907_s24 + $0x94] sm:$0xf] %vm1062_vm0, %v1575_v7  ;;  %3069 = vst.msk [vmem:[%s3907_s24 + $0xa8] sm:$0xf] %vm1062_vm0, %v1585_v31 }
 0x31f   : > { %1647 = vrot.lane.b32.xlu1 %v4112_v27, %s3522_s21  ;;  %1324 = vrot.lane.b32.xlu0 %v4130_v40, %s3520_s16 }
 0x321   : > { %v1770_v8 = vpop.permute.xlu1 %1769  ;;  %v1780_v42 = vpop.permute.xlu0 %1779 }
 0x322   : > { %3112 = vst.msk [vmem:[%s3907_s24 + $0xd4] sm:$0xf] %vm1062_vm0, %v1770_v8  ;;  %3117 = vst.msk [vmem:[%s3907_s24 + $0xe8] sm:$0xf] %vm1062_vm0, %v1780_v42 }
 0x323   : > { %1712 = vrot.lane.b32.xlu1 %v4114_v16, %s3522_s21  ;;  %1454 = vrot.lane.b32.xlu0 %v4128_v37, %s3521_s3 }
 0x325   : > { %v1392_v27 = vpop.permute.xlu1 %1391  ;;  %v1248_v43 = vpop.permute.xlu0 %1247 }
 0x326   : > { %3022 = vst.msk [vmem:[%s3907_s24 + $0x6c] sm:$0xf] %vm1062_vm0, %v1392_v27  ;;  %2983 = vst.msk [vmem:[%s3890_s20 + $0x50] sm:$0xf] %vm1062_vm0, %v1248_v43 }
 0x327   : > { %1261 = vrot.lane.b32.xlu1 %v4144_v49, %s3520_s16  ;;  %1519 = vrot.lane.b32.xlu0 %v4130_v40, %s3521_s3 }
 0x329   : > { %v1587_v16 = vpop.permute.xlu1 %1586  ;;  %v1313_v53 = vpop.permute.xlu0 %1312 }
 0x32a   : > { %3070 = vst.msk [vmem:[%s3907_s24 + $0xac] sm:$0xf] %vm1062_vm0, %v1587_v16  ;;  %2999 = vst.msk [vmem:[%s3895_s11 + $0x50] sm:$0xf] %vm1062_vm0, %v1313_v53 }
 0x32b   : > { %1326 = vrot.lane.b32.xlu1 %v4146_v50, %s3520_s16  ;;  %1649 = vrot.lane.b32.xlu0 %v4128_v37, %s3522_s21 }
 0x32d   : > { %v1782_v30 = vpop.permute.xlu1 %1781  ;;  %v1443_v54 = vpop.permute.xlu0 %1442 }
 0x32e   : > { %3118 = vst.msk [vmem:[%s3907_s24 + $0xec] sm:$0xf] %vm1062_vm0, %v1782_v30  ;;  %3031 = vst.msk [vmem:[%s3890_s20 + $0x90] sm:$0xf] %vm1062_vm0, %v1443_v54 }
 0x32f   : > { %1456 = vrot.lane.b32.xlu1 %v4144_v49, %s3521_s3  ;;  %1714 = vrot.lane.b32.xlu0 %v4130_v40, %s3522_s21 }
 0x331   : > { %v1250_v56 = vpop.permute.xlu1 %1249  ;;  %v1508_v62 = vpop.permute.xlu0 %1507 }
 0x332   : > { %2984 = vst.msk [vmem:[%s3890_s20 + $0x54] sm:$0xf] %vm1062_vm0, %v1250_v56  ;;  %3047 = vst.msk [vmem:[%s3895_s11 + $0x90] sm:$0xf] %vm1062_vm0, %v1508_v62 }
 0x333   : > { %1521 = vrot.lane.b32.xlu1 %v4146_v50, %s3521_s3  ;;  %1263 = vrot.lane.b32.xlu0 %v4160_v19, %s3520_s16 }
 0x335   : > { %v1315_v37 = vpop.permute.xlu1 %1314  ;;  %v1638_v63 = vpop.permute.xlu0 %1637 }
 0x336   : > { %3000 = vst.msk [vmem:[%s3895_s11 + $0x54] sm:$0xf] %vm1062_vm0, %v1315_v37  ;;  %3079 = vst.msk [vmem:[%s3890_s20 + $0xd0] sm:$0xf] %vm1062_vm0, %v1638_v63 }
 0x337   : > { %1651 = vrot.lane.b32.xlu1 %v4144_v49, %s3522_s21  ;;  %1328 = vrot.lane.b32.xlu0 %v4162_v13, %s3520_s16 }
 0x339   : > { %v1445_v40 = vpop.permute.xlu1 %1444  ;;  %v1703_v14 = vpop.permute.xlu0 %1702 }
 0x33a   : > { %3032 = vst.msk [vmem:[%s3890_s20 + $0x94] sm:$0xf] %vm1062_vm0, %v1445_v40  ;;  %3095 = vst.msk [vmem:[%s3895_s11 + $0xd0] sm:$0xf] %vm1062_vm0, %v1703_v14 }
 0x33b   : > { %1716 = vrot.lane.b32.xlu1 %v4146_v50, %s3522_s21  ;;  %1458 = vrot.lane.b32.xlu0 %v4160_v19, %s3521_s3 }
 0x33d   : > { %v1510_v49 = vpop.permute.xlu1 %1509  ;;  %v1386_v5 = vpop.permute.xlu0 %1385 }
 0x33e   : > { %3048 = vst.msk [vmem:[%s3895_s11 + $0x94] sm:$0xf] %vm1062_vm0, %v1510_v49  ;;  %3019 = vst.msk [vmem:[%s3907_s24 + $0x60] sm:$0xf] %vm1062_vm0, %v1386_v5 }
 0x33f   : > { %1265 = vrot.lane.b32.xlu1 %v4176_v38, %s3520_s16  ;;  %1523 = vrot.lane.b32.xlu0 %v4162_v13, %s3521_s3 }
 0x341   : > { %v1640_v50 = vpop.permute.xlu1 %1639  ;;  %v1581_v18 = vpop.permute.xlu0 %1580 }
 0x342   : > { %3080 = vst.msk [vmem:[%s3890_s20 + $0xd4] sm:$0xf] %vm1062_vm0, %v1640_v50  ;;  %3067 = vst.msk [vmem:[%s3907_s24 + $0xa0] sm:$0xf] %vm1062_vm0, %v1581_v18 }
 0x343   : > { %1330 = vrot.lane.b32.xlu1 %v4178_v9, %s3520_s16  ;;  %1653 = vrot.lane.b32.xlu0 %v4160_v19, %s3522_s21 }
 0x345   : > { %v1705_v20 = vpop.permute.xlu1 %1704  ;;  %v1776_v21 = vpop.permute.xlu0 %1775 }
 0x346   : > { %3096 = vst.msk [vmem:[%s3895_s11 + $0xd4] sm:$0xf] %vm1062_vm0, %v1705_v20  ;;  %3115 = vst.msk [vmem:[%s3907_s24 + $0xe0] sm:$0xf] %vm1062_vm0, %v1776_v21 }
 0x347   : > { %1460 = vrot.lane.b32.xlu1 %v4176_v38, %s3521_s3  ;;  %1718 = vrot.lane.b32.xlu0 %v4162_v13, %s3522_s21 }
 0x349   : > { %v1388_v46 = vpop.permute.xlu1 %1387  ;;  %v1398_v47 = vpop.permute.xlu0 %1397 }
 0x34a   : > { %3020 = vst.msk [vmem:[%s3907_s24 + $0x64] sm:$0xf] %vm1062_vm0, %v1388_v46  ;;  %3025 = vst.msk [vmem:[%s3907_s24 + $0x78] sm:$0xf] %vm1062_vm0, %v1398_v47 }
 0x34b   : > { %1525 = vrot.lane.b32.xlu1 %v4178_v9, %s3521_s3  ;;  %1267 = vrot.lane.b32.xlu0 %v4192_v28, %s3520_s16 }
 0x34d   : > { %v1583_v19 = vpop.permute.xlu1 %1582  ;;  %v1593_v41 = vpop.permute.xlu0 %1592 }
 0x34e   : > { %3068 = vst.msk [vmem:[%s3907_s24 + $0xa4] sm:$0xf] %vm1062_vm0, %v1583_v19  ;;  %3073 = vst.msk [vmem:[%s3907_s24 + $0xb8] sm:$0xf] %vm1062_vm0, %v1593_v41 }
 0x34f   : > { %1655 = vrot.lane.b32.xlu1 %v4176_v38, %s3522_s21  ;;  %1332 = vrot.lane.b32.xlu0 %v4194_v33, %s3520_s16 }
 0x351   : > { %v1778_v13 = vpop.permute.xlu1 %1777  ;;  %v1252_v44 = vpop.permute.xlu0 %1251 }
 0x352   : > { %3116 = vst.msk [vmem:[%s3907_s24 + $0xe4] sm:$0xf] %vm1062_vm0, %v1778_v13  ;;  %2985 = vst.msk [vmem:[%s3890_s20 + $0x58] sm:$0xf] %vm1062_vm0, %v1252_v44 }
 0x353   : > { %1720 = vrot.lane.b32.xlu1 %v4178_v9, %s3522_s21  ;;  %1462 = vrot.lane.b32.xlu0 %v4192_v28, %s3521_s3 }
 0x355   : > { %v1400_v38 = vpop.permute.xlu1 %1399  ;;  %v1317_v58 = vpop.permute.xlu0 %1316 }
 0x356   : > { %3026 = vst.msk [vmem:[%s3907_s24 + $0x7c] sm:$0xf] %vm1062_vm0, %v1400_v38  ;;  %3001 = vst.msk [vmem:[%s3895_s11 + $0x58] sm:$0xf] %vm1062_vm0, %v1317_v58 }
 0x357   : > { %1269 = vrot.lane.b32.xlu1 %v4208_v17, %s3520_s16  ;;  %1527 = vrot.lane.b32.xlu0 %v4194_v33, %s3521_s3 }
 0x359   : > { %v1595_v9 = vpop.permute.xlu1 %1594  ;;  %v1447_v3 = vpop.permute.xlu0 %1446 }
 0x35a   : > { %3074 = vst.msk [vmem:[%s3907_s24 + $0xbc] sm:$0xf] %vm1062_vm0, %v1595_v9  ;;  %3033 = vst.msk [vmem:[%s3890_s20 + $0x98] sm:$0xf] %vm1062_vm0, %v1447_v3 }
 0x35b   : > { %1334 = vrot.lane.b32.xlu1 %v4210_v29, %s3520_s16  ;;  %1657 = vrot.lane.b32.xlu0 %v4192_v28, %s3522_s21 }
 0x35d   : > { %v1254_v12 = vpop.permute.xlu1 %1253  ;;  %v1512_v51 = vpop.permute.xlu0 %1511 }
 0x35e   : > { %2986 = vst.msk [vmem:[%s3890_s20 + $0x5c] sm:$0xf] %vm1062_vm0, %v1254_v12  ;;  %3049 = vst.msk [vmem:[%s3895_s11 + $0x98] sm:$0xf] %vm1062_vm0, %v1512_v51  ;;  %v1860_v51 = vld [vmem:[%s3890_s20] sm:$0xff] (%p3647_p10)  }
 0x35f   : > { %1464 = vrot.lane.b32.xlu1 %v4208_v17, %s3521_s3  ;;  %1722 = vrot.lane.b32.xlu0 %v4194_v33, %s3522_s21  ;;  %1861 = vst [vmem:[%s4756_s13] sm:$0xff] (%p3647_p10), %v1860_v51  }
 0x361   : > { %v1319_v4 = vpop.permute.xlu1 %1318  ;;  %v1642_v11 = vpop.permute.xlu0 %1641 }
 0x362   : > { %3002 = vst.msk [vmem:[%s3895_s11 + $0x5c] sm:$0xf] %vm1062_vm0, %v1319_v4  ;;  %3081 = vst.msk [vmem:[%s3890_s20 + $0xd8] sm:$0xf] %vm1062_vm0, %v1642_v11  ;;  %v1864_v4 = vld [vmem:[%s3890_s20 + $0x8] sm:$0xff] (%p3647_p10)   ;;  %v1868_v11 = vld [vmem:[%s3890_s20 + $0x10] sm:$0xff] (%p3647_p10)  }
 0x363   : > { %1529 = vrot.lane.b32.xlu1 %v4210_v29, %s3521_s3  ;;  %1787 = vrot.lane.b32.xlu0 %v4057_v52, %s3522_s21  ;;  %1865 = vst [vmem:[%s4756_s13 + $0x8] sm:$0xff] (%p3647_p10), %v1864_v4   ;;  %1869 = vst [vmem:[%s4756_s13 + $0x10] sm:$0xff] (%p3647_p10), %v1868_v11  }
 0x365   : > { %v1449_v28 = vpop.permute.xlu1 %1448  ;;  %v1707_v59 = vpop.permute.xlu0 %1706 }
 0x366   : > { %3034 = vst.msk [vmem:[%s3890_s20 + $0x9c] sm:$0xf] %vm1062_vm0, %v1449_v28  ;;  %3097 = vst.msk [vmem:[%s3895_s11 + $0xd8] sm:$0xf] %vm1062_vm0, %v1707_v59  ;;  %v1872_v28 = vld [vmem:[%s3890_s20 + $0x18] sm:$0xff] (%p3647_p10)   ;;  %v1876_v59 = vld [vmem:[%s3890_s20 + $0x20] sm:$0xff] (%p3647_p10)  }
 0x367   : > { %1659 = vrot.lane.b32.xlu1 %v4208_v17, %s3522_s21  ;;  %1873 = vst [vmem:[%s4756_s13 + $0x18] sm:$0xff] (%p3647_p10), %v1872_v28   ;;  %1877 = vst [vmem:[%s4756_s13 + $0x20] sm:$0xff] (%p3647_p10), %v1876_v59  }
 0x369   : > { %v1514_v33 = vpop.permute.xlu1 %1513  ;;  %v1394_v61 = vpop.permute.xlu0 %1393 }
 0x36a   : > { %3050 = vst.msk [vmem:[%s3895_s11 + $0x9c] sm:$0xf] %vm1062_vm0, %v1514_v33  ;;  %3023 = vst.msk [vmem:[%s3907_s24 + $0x70] sm:$0xf] %vm1062_vm0, %v1394_v61  ;;  %v1880_v33 = vld [vmem:[%s3890_s20 + $0x28] sm:$0xff] (%p3647_p10)   ;;  %v1884_v61 = vld [vmem:[%s3890_s20 + $0x30] sm:$0xff] (%p3647_p10)  }
 0x36b   : > { %1724 = vrot.lane.b32.xlu1 %v4210_v29, %s3522_s21  ;;  %1881 = vst [vmem:[%s4756_s13 + $0x28] sm:$0xff] (%p3647_p10), %v1880_v33   ;;  %1885 = vst [vmem:[%s4756_s13 + $0x30] sm:$0xff] (%p3647_p10), %v1884_v61  }
 0x36d   : > { %v1644_v52 = vpop.permute.xlu1 %1643  ;;  %v1589_v15 = vpop.permute.xlu0 %1588 }
 0x36e   : > { %3082 = vst.msk [vmem:[%s3890_s20 + $0xdc] sm:$0xf] %vm1062_vm0, %v1644_v52  ;;  %3071 = vst.msk [vmem:[%s3907_s24 + $0xb0] sm:$0xf] %vm1062_vm0, %v1589_v15  ;;  %v1888_v52 = vld [vmem:[%s3890_s20 + $0x38] sm:$0xff] (%p3647_p10)   ;;  %v1892_v15 = vld [vmem:[%s3890_s20 + $0x40] sm:$0xff] (%p3647_p10)  }
 0x36f   : > { %1789 = vrot.lane.b32.xlu1 %v4085_v2, %s3522_s21  ;;  %1889 = vst [vmem:[%s4756_s13 + $0x38] sm:$0xff] (%p3647_p10), %v1888_v52   ;;  %1893 = vst [vmem:[%s4756_s13 + $0x80] sm:$0xff] (%p3647_p10), %v1892_v15  }
 0x371   : > { %v1709_v17 = vpop.permute.xlu1 %1708  ;;  %v1784_v32 = vpop.permute.xlu0 %1783 }
 0x372   : > { %3098 = vst.msk [vmem:[%s3895_s11 + $0xdc] sm:$0xf] %vm1062_vm0, %v1709_v17  ;;  %3119 = vst.msk [vmem:[%s3907_s24 + $0xf0] sm:$0xf] %vm1062_vm0, %v1784_v32  ;;  %v1896_v17 = vld [vmem:[%s3890_s20 + $0x48] sm:$0xff] (%p3647_p10)   ;;  %v1900_v32 = vld [vmem:[%s3890_s20 + $0x50] sm:$0xff] (%p3647_p10)  }
 0x373   : > { %1897 = vst [vmem:[%s4756_s13 + $0x88] sm:$0xff] (%p3647_p10), %v1896_v17   ;;  %1901 = vst [vmem:[%s4756_s13 + $0x90] sm:$0xff] (%p3647_p10), %v1900_v32  }
 0x375   : > { %v1396_v29 = vpop.permute.xlu1 %1395  ;;  %v1256_v22 = vpop.permute.xlu0 %1255 }
 0x376   : > { %3024 = vst.msk [vmem:[%s3907_s24 + $0x74] sm:$0xf] %vm1062_vm0, %v1396_v29  ;;  %2987 = vst.msk [vmem:[%s3890_s20 + $0x60] sm:$0xf] %vm1062_vm0, %v1256_v22  ;;  %v1904_v29 = vld [vmem:[%s3890_s20 + $0x58] sm:$0xff] (%p3647_p10)  }
 0x377   : > { %1905 = vst [vmem:[%s4756_s13 + $0x98] sm:$0xff] (%p3647_p10), %v1904_v29  }
 0x379   : > { %v1591_v25 = vpop.permute.xlu1 %1590  ;;  %v1321_v0 = vpop.permute.xlu0 %1320 }
 0x37a   : > { %3072 = vst.msk [vmem:[%s3907_s24 + $0xb4] sm:$0xf] %vm1062_vm0, %v1591_v25  ;;  %3003 = vst.msk [vmem:[%s3895_s11 + $0x60] sm:$0xf] %vm1062_vm0, %v1321_v0 }
 0x37d   : > { %v1786_v2 = vpop.permute.xlu1 %1785  ;;  %v1451_v6 = vpop.permute.xlu0 %1450 }
 0x37e   : > { %3120 = vst.msk [vmem:[%s3907_s24 + $0xf4] sm:$0xf] %vm1062_vm0, %v1786_v2  ;;  %3035 = vst.msk [vmem:[%s3890_s20 + $0xa0] sm:$0xf] %vm1062_vm0, %v1451_v6  ;;  %v1924_v6 = vld [vmem:[%s3890_s20 + $0x80] sm:$0xff] (%p3647_p10)  }
 0x37f   : > { %1925 = vst [vmem:[%s4756_s13 + $0x100] sm:$0xff] (%p3647_p10), %v1924_v6  }
 0x381   : > { %v1258_v55 = vpop.permute.xlu1 %1257  ;;  %v1516_v48 = vpop.permute.xlu0 %1515 }
 0x382   : > { %2988 = vst.msk [vmem:[%s3890_s20 + $0x64] sm:$0xf] %vm1062_vm0, %v1258_v55  ;;  %3051 = vst.msk [vmem:[%s3895_s11 + $0xa0] sm:$0xf] %vm1062_vm0, %v1516_v48  ;;  %v1928_v55 = vld [vmem:[%s3890_s20 + $0x88] sm:$0xff] (%p3647_p10)   ;;  %v1932_v48 = vld [vmem:[%s3890_s20 + $0x90] sm:$0xff] (%p3647_p10)  }
 0x383   : > { %1929 = vst [vmem:[%s4756_s13 + $0x108] sm:$0xff] (%p3647_p10), %v1928_v55   ;;  %1933 = vst [vmem:[%s4756_s13 + $0x110] sm:$0xff] (%p3647_p10), %v1932_v48  }
 0x385   : > { %v1323_v23 = vpop.permute.xlu1 %1322  ;;  %v1646_v35 = vpop.permute.xlu0 %1645 }
 0x386   : > { %3004 = vst.msk [vmem:[%s3895_s11 + $0x64] sm:$0xf] %vm1062_vm0, %v1323_v23  ;;  %3083 = vst.msk [vmem:[%s3890_s20 + $0xe0] sm:$0xf] %vm1062_vm0, %v1646_v35  ;;  %v1936_v23 = vld [vmem:[%s3890_s20 + $0x98] sm:$0xff] (%p3647_p10)  }
 0x387   : > { %1937 = vst [vmem:[%s4756_s13 + $0x118] sm:$0xff] (%p3647_p10), %v1936_v23  }
 0x389   : > { %v1453_v60 = vpop.permute.xlu1 %1452  ;;  %v1711_v10 = vpop.permute.xlu0 %1710  ;;  %v1908_v22 = vld [vmem:[%s3890_s20 + $0x60] sm:$0xff] (%p3647_p10)  }
 0x38a   : > { %3036 = vst.msk [vmem:[%s3890_s20 + $0xa4] sm:$0xf] %vm1062_vm0, %v1453_v60  ;;  %3099 = vst.msk [vmem:[%s3895_s11 + $0xe0] sm:$0xf] %vm1062_vm0, %v1711_v10 }
 0x38b   : > { %1909 = vst [vmem:[%s4756_s13 + $0xa0] sm:$0xff] (%p3647_p10), %v1908_v22  }
 0x38d   : > { %v1518_v24 = vpop.permute.xlu1 %1517  ;;  %v1260_v26 = vpop.permute.xlu0 %1259 }
 0x38e   : > { %3052 = vst.msk [vmem:[%s3895_s11 + $0xa4] sm:$0xf] %vm1062_vm0, %v1518_v24  ;;  %2989 = vst.msk [vmem:[%s3890_s20 + $0x68] sm:$0xf] %vm1062_vm0, %v1260_v26  ;;  %v1956_v26 = vld [vmem:[%s3890_s20 + $0xc0] sm:$0xff] (%p3647_p10)  }
 0x38f   : > { %1957 = vst [vmem:[%s4756_s13 + $0x180] sm:$0xff] (%p3647_p10), %v1956_v26  }
 0x391   : > { %v1648_v39 = vpop.permute.xlu1 %1647  ;;  %v1325_v45 = vpop.permute.xlu0 %1324  ;;  %v1940_v35 = vld [vmem:[%s3890_s20 + $0xa0] sm:$0xff] (%p3647_p10)  }
 0x392   : > { %3084 = vst.msk [vmem:[%s3890_s20 + $0xe4] sm:$0xf] %vm1062_vm0, %v1648_v39  ;;  %3005 = vst.msk [vmem:[%s3895_s11 + $0x68] sm:$0xf] %vm1062_vm0, %v1325_v45  ;;  %v1960_v39 = vld [vmem:[%s3890_s20 + $0xc8] sm:$0xff] (%p3647_p10)   ;;  %v1964_v45 = vld [vmem:[%s3890_s20 + $0xd0] sm:$0xff] (%p3647_p10)  }
 0x393   : > { %1941 = vst [vmem:[%s4756_s13 + $0x120] sm:$0xff] (%p3647_p10), %v1940_v35   ;;  %1961 = vst [vmem:[%s4756_s13 + $0x188] sm:$0xff] (%p3647_p10), %v1960_v39  }
 0x394   : > { %1965 = vst [vmem:[%s4756_s13 + $0x190] sm:$0xff] (%p3647_p10), %v1964_v45  }
 0x395   : > { %v1713_v34 = vpop.permute.xlu1 %1712  ;;  %v1455_v36 = vpop.permute.xlu0 %1454 }
 0x396   : > { %3100 = vst.msk [vmem:[%s3895_s11 + $0xe4] sm:$0xf] %vm1062_vm0, %v1713_v34  ;;  %3037 = vst.msk [vmem:[%s3890_s20 + $0xa8] sm:$0xf] %vm1062_vm0, %v1455_v36  ;;  %v1968_v34 = vld [vmem:[%s3890_s20 + $0xd8] sm:$0xff] (%p3647_p10)  }
 0x397   : > { %1969 = vst [vmem:[%s4756_s13 + $0x198] sm:$0xff] (%p3647_p10), %v1968_v34  }
 0x399   : > { %v1262_v57 = vpop.permute.xlu1 %1261  ;;  %v1520_v1 = vpop.permute.xlu0 %1519  ;;  %v1972_v36 = vld [vmem:[%s3890_s20 + $0xe0] sm:$0xff] (%p3647_p10)  }
 0x39a   : > { %2990 = vst.msk [vmem:[%s3890_s20 + $0x6c] sm:$0xf] %vm1062_vm0, %v1262_v57  ;;  %3053 = vst.msk [vmem:[%s3895_s11 + $0xa8] sm:$0xf] %vm1062_vm0, %v1520_v1 }
 0x39b   : > { %1973 = vst [vmem:[%s4756_s13 + $0x1a0] sm:$0xff] (%p3647_p10), %v1972_v36  }
 0x39d   : > { %v1327_v7 = vpop.permute.xlu1 %1326  ;;  %v1650_v31 = vpop.permute.xlu0 %1649 }
 0x39e   : > { %3006 = vst.msk [vmem:[%s3895_s11 + $0x6c] sm:$0xf] %vm1062_vm0, %v1327_v7  ;;  %3085 = vst.msk [vmem:[%s3890_s20 + $0xe8] sm:$0xf] %vm1062_vm0, %v1650_v31 }
 0x3a1   : > { %v1457_v8 = vpop.permute.xlu1 %1456  ;;  %v1715_v42 = vpop.permute.xlu0 %1714  ;;  %v1912_v25 = vld [vmem:[%s3890_s20 + $0x68] sm:$0xff] (%p3647_p10)  }
 0x3a2   : > { %3038 = vst.msk [vmem:[%s3890_s20 + $0xac] sm:$0xf] %vm1062_vm0, %v1457_v8  ;;  %3101 = vst.msk [vmem:[%s3895_s11 + $0xe8] sm:$0xf] %vm1062_vm0, %v1715_v42 }
 0x3a3   : > { %1913 = vst [vmem:[%s4756_s13 + $0xa8] sm:$0xff] (%p3647_p10), %v1912_v25  }
 0x3a5   : > { %v1522_v27 = vpop.permute.xlu1 %1521  ;;  %v1264_v43 = vpop.permute.xlu0 %1263 }
 0x3a6   : > { %3054 = vst.msk [vmem:[%s3895_s11 + $0xac] sm:$0xf] %vm1062_vm0, %v1522_v27  ;;  %2991 = vst.msk [vmem:[%s3890_s20 + $0x70] sm:$0xf] %vm1062_vm0, %v1264_v43 }
 0x3a9   : > { %v1652_v16 = vpop.permute.xlu1 %1651  ;;  %v1329_v53 = vpop.permute.xlu0 %1328  ;;  %v1944_v60 = vld [vmem:[%s3890_s20 + $0xa8] sm:$0xff] (%p3647_p10)  }
 0x3aa   : > { %3086 = vst.msk [vmem:[%s3890_s20 + $0xec] sm:$0xf] %vm1062_vm0, %v1652_v16  ;;  %3007 = vst.msk [vmem:[%s3895_s11 + $0x70] sm:$0xf] %vm1062_vm0, %v1329_v53 }
 0x3ab   : > { %1945 = vst [vmem:[%s4756_s13 + $0x128] sm:$0xff] (%p3647_p10), %v1944_v60  }
 0x3ad   : > { %v1717_v30 = vpop.permute.xlu1 %1716  ;;  %v1459_v54 = vpop.permute.xlu0 %1458 }
 0x3ae   : > { %3102 = vst.msk [vmem:[%s3895_s11 + $0xec] sm:$0xf] %vm1062_vm0, %v1717_v30  ;;  %3039 = vst.msk [vmem:[%s3890_s20 + $0xb0] sm:$0xf] %vm1062_vm0, %v1459_v54 }
 0x3b1   : > { %v1266_v56 = vpop.permute.xlu1 %1265  ;;  %v1524_v62 = vpop.permute.xlu0 %1523  ;;  %v1976_v57 = vld [vmem:[%s3890_s20 + $0xe8] sm:$0xff] (%p3647_p10)  }
 0x3b2   : > { %2992 = vst.msk [vmem:[%s3890_s20 + $0x74] sm:$0xf] %vm1062_vm0, %v1266_v56  ;;  %3055 = vst.msk [vmem:[%s3895_s11 + $0xb0] sm:$0xf] %vm1062_vm0, %v1524_v62 }
 0x3b3   : > { %1977 = vst [vmem:[%s4756_s13 + $0x1a8] sm:$0xff] (%p3647_p10), %v1976_v57  }
 0x3b5   : > { %v1331_v37 = vpop.permute.xlu1 %1330  ;;  %v1654_v63 = vpop.permute.xlu0 %1653 }
 0x3b6   : > { %3008 = vst.msk [vmem:[%s3895_s11 + $0x74] sm:$0xf] %vm1062_vm0, %v1331_v37  ;;  %3087 = vst.msk [vmem:[%s3890_s20 + $0xf0] sm:$0xf] %vm1062_vm0, %v1654_v63 }
 0x3b9   : > { %v1461_v40 = vpop.permute.xlu1 %1460  ;;  %v1719_v14 = vpop.permute.xlu0 %1718  ;;  %v1916_v0 = vld [vmem:[%s3890_s20 + $0x70] sm:$0xff] (%p3647_p10)  }
 0x3ba   : > { %3040 = vst.msk [vmem:[%s3890_s20 + $0xb4] sm:$0xf] %vm1062_vm0, %v1461_v40  ;;  %3103 = vst.msk [vmem:[%s3895_s11 + $0xf0] sm:$0xf] %vm1062_vm0, %v1719_v14 }
 0x3bb   : > { %1917 = vst [vmem:[%s4756_s13 + $0xb0] sm:$0xff] (%p3647_p10), %v1916_v0  }
 0x3bd   : > { %v1526_v49 = vpop.permute.xlu1 %1525  ;;  %v1268_v5 = vpop.permute.xlu0 %1267 }
 0x3be   : > { %3056 = vst.msk [vmem:[%s3895_s11 + $0xb4] sm:$0xf] %vm1062_vm0, %v1526_v49  ;;  %2993 = vst.msk [vmem:[%s3890_s20 + $0x78] sm:$0xf] %vm1062_vm0, %v1268_v5 }
 0x3c1   : > { %v1656_v50 = vpop.permute.xlu1 %1655  ;;  %v1333_v18 = vpop.permute.xlu0 %1332  ;;  %v1948_v10 = vld [vmem:[%s3890_s20 + $0xb0] sm:$0xff] (%p3647_p10)  }
 0x3c2   : > { %3088 = vst.msk [vmem:[%s3890_s20 + $0xf4] sm:$0xf] %vm1062_vm0, %v1656_v50  ;;  %3009 = vst.msk [vmem:[%s3895_s11 + $0x78] sm:$0xf] %vm1062_vm0, %v1333_v18 }
 0x3c3   : > { %1949 = vst [vmem:[%s4756_s13 + $0x130] sm:$0xff] (%p3647_p10), %v1948_v10  }
 0x3c5   : > { %v1721_v20 = vpop.permute.xlu1 %1720  ;;  %v1463_v21 = vpop.permute.xlu0 %1462 }
 0x3c6   : > { %3104 = vst.msk [vmem:[%s3895_s11 + $0xf4] sm:$0xf] %vm1062_vm0, %v1721_v20  ;;  %3041 = vst.msk [vmem:[%s3890_s20 + $0xb8] sm:$0xf] %vm1062_vm0, %v1463_v21 }
 0x3c9   : > { %v1270_v46 = vpop.permute.xlu1 %1269  ;;  %v1528_v47 = vpop.permute.xlu0 %1527  ;;  %v1980_v1 = vld [vmem:[%s3890_s20 + $0xf0] sm:$0xff] (%p3647_p10)  }
 0x3ca   : > { %2994 = vst.msk [vmem:[%s3890_s20 + $0x7c] sm:$0xf] %vm1062_vm0, %v1270_v46  ;;  %3057 = vst.msk [vmem:[%s3895_s11 + $0xb8] sm:$0xf] %vm1062_vm0, %v1528_v47 }
 0x3cb   : > { %1981 = vst [vmem:[%s4756_s13 + $0x1b0] sm:$0xff] (%p3647_p10), %v1980_v1  }
 0x3cd   : > { %v1335_v19 = vpop.permute.xlu1 %1334  ;;  %v1658_v41 = vpop.permute.xlu0 %1657 }
 0x3ce   : > { %3010 = vst.msk [vmem:[%s3895_s11 + $0x7c] sm:$0xf] %vm1062_vm0, %v1335_v19  ;;  %3089 = vst.msk [vmem:[%s3890_s20 + $0xf8] sm:$0xf] %vm1062_vm0, %v1658_v41 }
 0x3d1   : > { %v1465_v13 = vpop.permute.xlu1 %1464  ;;  %v1723_v44 = vpop.permute.xlu0 %1722  ;;  %v1920_v2 = vld [vmem:[%s3890_s20 + $0x78] sm:$0xff] (%p3647_p10)  }
 0x3d2   : > { %3042 = vst.msk [vmem:[%s3890_s20 + $0xbc] sm:$0xf] %vm1062_vm0, %v1465_v13  ;;  %3105 = vst.msk [vmem:[%s3895_s11 + $0xf8] sm:$0xf] %vm1062_vm0, %v1723_v44 }
 0x3d3   : > { %1921 = vst [vmem:[%s4756_s13 + $0xb8] sm:$0xff] (%p3647_p10), %v1920_v2  }
 0x3d5   : > { %v1530_v38 = vpop.permute.xlu1 %1529  ;;  %v1788_v58 = vpop.permute.xlu0 %1787 }
 0x3d6   : > { %3058 = vst.msk [vmem:[%s3895_s11 + $0xbc] sm:$0xf] %vm1062_vm0, %v1530_v38  ;;  %3121 = vst.msk [vmem:[%s3907_s24 + $0xf8] sm:$0xf] %vm1062_vm0, %v1788_v58 }
 0x3d9   : > { %v1660_v9 = vpop.permute.xlu1 %1659  ;;  %v1952_v24 = vld [vmem:[%s3890_s20 + $0xb8] sm:$0xff] (%p3647_p10)  }
 0x3da   : > { %3090 = vst.msk [vmem:[%s3890_s20 + $0xfc] sm:$0xf] %vm1062_vm0, %v1660_v9  ;;  %1953 = vst [vmem:[%s4756_s13 + $0x138] sm:$0xff] (%p3647_p10), %v1952_v24  }
 0x3dd   : > { %v1725_v3 = vpop.permute.xlu1 %1724 }
 0x3de   : > { %3106 = vst.msk [vmem:[%s3895_s11 + $0xfc] sm:$0xf] %vm1062_vm0, %v1725_v3  ;;  %1838 = sbr.rel (!%p3647_p10) target bundleno = 995 (0x3e3), region = 52 }
 0x3e1   : > { %v1790_v12 = vpop.permute.xlu1 %1789  ;;  %v1984_v7 = vld [vmem:[%s3890_s20 + $0xf8] sm:$0xff] (%p3647_p10)  }
 0x3e2   : > { %3122 = vst.msk [vmem:[%s3907_s24 + $0xfc] sm:$0xf] %vm1062_vm0, %v1790_v12  ;;  %1985 = vst [vmem:[%s4756_s13 + $0x1b8] sm:$0xff] (%p3647_p10), %v1984_v7  }
 0x3e3 PF: > { %2139 = sbr.rel (!%p3647_p10) target bundleno = 1022 (0x3fe), region = 93  ;;  %s5016_s18 = sld [smem:[#allocation11_spill]] (%p3647_p10)  ;;  %v2161_v31 = vld [vmem:[%s3895_s11] sm:$0xff] (%p3647_p10)   ;;  %v2165_v8 = vld [vmem:[%s3895_s11 + $0x8] sm:$0xff] (%p3647_p10)   ;;  %v2169_v42 = vld [vmem:[%s3895_s11 + $0x10] sm:$0xff] (%p3647_p10)  }
 0x3e4   : > { %s5017_s19 = sld [smem:[#allocation12_spill]] (%p3647_p10)  ;;  %v2173_v27 = vld [vmem:[%s3895_s11 + $0x18] sm:$0xff] (%p3647_p10)   ;;  %v2177_v43 = vld [vmem:[%s3895_s11 + $0x20] sm:$0xff] (%p3647_p10)   ;;  %v2181_v16 = vld [vmem:[%s3895_s11 + $0x28] sm:$0xff] (%p3647_p10)  }
 0x3e5   : > { %v2185_v53 = vld [vmem:[%s3895_s11 + $0x30] sm:$0xff] (%p3647_p10)   ;;  %v2189_v30 = vld [vmem:[%s3895_s11 + $0x38] sm:$0xff] (%p3647_p10)   ;;  %v2193_v54 = vld [vmem:[%s3895_s11 + $0x40] sm:$0xff] (%p3647_p10)   ;;  %s5018_s6 = sld [smem:[#allocation17_spill]] (%p3647_p10) }
 0x3e6   : > { %v2197_v56 = vld [vmem:[%s3895_s11 + $0x48] sm:$0xff] (%p3647_p10)   ;;  %v2201_v62 = vld [vmem:[%s3895_s11 + $0x50] sm:$0xff] (%p3647_p10)   ;;  %v2205_v37 = vld [vmem:[%s3895_s11 + $0x58] sm:$0xff] (%p3647_p10)  }
 0x3e7   : > { %v2209_v63 = vld [vmem:[%s3895_s11 + $0x60] sm:$0xff] (%p3647_p10)   ;;  %v2213_v40 = vld [vmem:[%s3895_s11 + $0x68] sm:$0xff] (%p3647_p10)   ;;  %v2217_v14 = vld [vmem:[%s3895_s11 + $0x70] sm:$0xff] (%p3647_p10)  }
 0x3e8   : > { %v2221_v49 = vld [vmem:[%s3895_s11 + $0x78] sm:$0xff]   ;;  %v2225_v5 = vld [vmem:[%s3895_s11 + $0x80] sm:$0xff]   ;;  %v2229_v50 = vld [vmem:[%s3895_s11 + $0x88] sm:$0xff]  }
 0x3e9   : > { %s3129_s20 = sshll.u32 %s5016_s18, 4  ;;  %v2233_v18 = vld [vmem:[%s3895_s11 + $0x90] sm:$0xff]   ;;  %v2237_v20 = vld [vmem:[%s3895_s11 + $0x98] sm:$0xff]   ;;  %v2241_v21 = vld [vmem:[%s3895_s11 + $0xa0] sm:$0xff]  }
 0x3ea   : > { %s3130_s16 = sshll.u32 %s5017_s19, 7  ;;  %v2245_v46 = vld [vmem:[%s3895_s11 + $0xa8] sm:$0xff]   ;;  %v2249_v47 = vld [vmem:[%s3895_s11 + $0xb0] sm:$0xff]   ;;  %v2253_v19 = vld [vmem:[%s3895_s11 + $0xb8] sm:$0xff]  }
 0x3eb   : > { %s2142_s3 = sadd.s32 %s3130_s16, %s3129_s20  ;;  %v2257_v41 = vld [vmem:[%s3895_s11 + $0xc0] sm:$0xff]   ;;  %v2261_v13 = vld [vmem:[%s3895_s11 + $0xc8] sm:$0xff]   ;;  %v2265_v44 = vld [vmem:[%s3895_s11 + $0xd0] sm:$0xff]  }
 0x3ec   : > { %s3131_s21 = sshll.u32 %s2142_s3, 2  ;;  %v2269_v38 = vld [vmem:[%s3895_s11 + $0xd8] sm:$0xff]   ;;  %v2273_v58 = vld [vmem:[%s3895_s11 + $0xe0] sm:$0xff]   ;;  %v2277_v9 = vld [vmem:[%s3895_s11 + $0xe8] sm:$0xff]  }
 0x3ed   : > { %s4829_s28 = scalar_lea.vmem %s5018_s6, %s3131_s21  ;;  %v2281_v3 = vld [vmem:[%s3895_s11 + $0xf0] sm:$0xff]   ;;  %v2285_v12 = vld [vmem:[%s3895_s11 + $0xf8] sm:$0xff]  }
 0x3ee   : > { %2162 = vst [vmem:[%s4829_s28] sm:$0xff] %v2161_v31   ;;  %2166 = vst [vmem:[%s4829_s28 + $0x8] sm:$0xff] %v2165_v8  }
 0x3ef   : > { %2170 = vst [vmem:[%s4829_s28 + $0x10] sm:$0xff] %v2169_v42   ;;  %2174 = vst [vmem:[%s4829_s28 + $0x18] sm:$0xff] %v2173_v27  }
 0x3f0   : > { %2178 = vst [vmem:[%s4829_s28 + $0x20] sm:$0xff] %v2177_v43   ;;  %2182 = vst [vmem:[%s4829_s28 + $0x28] sm:$0xff] %v2181_v16  }
 0x3f1   : > { %2186 = vst [vmem:[%s4829_s28 + $0x30] sm:$0xff] %v2185_v53   ;;  %2190 = vst [vmem:[%s4829_s28 + $0x38] sm:$0xff] %v2189_v30  }
 0x3f2   : > { %2194 = vst [vmem:[%s4829_s28 + $0x80] sm:$0xff] %v2193_v54   ;;  %2198 = vst [vmem:[%s4829_s28 + $0x88] sm:$0xff] %v2197_v56  }
 0x3f3   : > { %2202 = vst [vmem:[%s4829_s28 + $0x90] sm:$0xff] %v2201_v62   ;;  %2206 = vst [vmem:[%s4829_s28 + $0x98] sm:$0xff] %v2205_v37  }
 0x3f4   : > { %2210 = vst [vmem:[%s4829_s28 + $0xa0] sm:$0xff] %v2209_v63   ;;  %2214 = vst [vmem:[%s4829_s28 + $0xa8] sm:$0xff] %v2213_v40  }
 0x3f5   : > { %2218 = vst [vmem:[%s4829_s28 + $0xb0] sm:$0xff] %v2217_v14   ;;  %2222 = vst [vmem:[%s4829_s28 + $0xb8] sm:$0xff] %v2221_v49  }
 0x3f6   : > { %2226 = vst [vmem:[%s4829_s28 + $0x100] sm:$0xff] %v2225_v5   ;;  %2230 = vst [vmem:[%s4829_s28 + $0x108] sm:$0xff] %v2229_v50  }
 0x3f7   : > { %2234 = vst [vmem:[%s4829_s28 + $0x110] sm:$0xff] %v2233_v18   ;;  %2238 = vst [vmem:[%s4829_s28 + $0x118] sm:$0xff] %v2237_v20  }
 0x3f8   : > { %2242 = vst [vmem:[%s4829_s28 + $0x120] sm:$0xff] %v2241_v21   ;;  %2246 = vst [vmem:[%s4829_s28 + $0x128] sm:$0xff] %v2245_v46  }
 0x3f9   : > { %2250 = vst [vmem:[%s4829_s28 + $0x130] sm:$0xff] %v2249_v47   ;;  %2254 = vst [vmem:[%s4829_s28 + $0x138] sm:$0xff] %v2253_v19  }
 0x3fa   : > { %2258 = vst [vmem:[%s4829_s28 + $0x180] sm:$0xff] %v2257_v41   ;;  %2262 = vst [vmem:[%s4829_s28 + $0x188] sm:$0xff] %v2261_v13  }
 0x3fb   : > { %2266 = vst [vmem:[%s4829_s28 + $0x190] sm:$0xff] %v2265_v44   ;;  %2270 = vst [vmem:[%s4829_s28 + $0x198] sm:$0xff] %v2269_v38  }
 0x3fc   : > { %2274 = vst [vmem:[%s4829_s28 + $0x1a0] sm:$0xff] %v2273_v58   ;;  %2278 = vst [vmem:[%s4829_s28 + $0x1a8] sm:$0xff] %v2277_v9  }
 0x3fd   : > { %2282 = vst [vmem:[%s4829_s28 + $0x1b0] sm:$0xff] %v2281_v3   ;;  %2286 = vst [vmem:[%s4829_s28 + $0x1b8] sm:$0xff] %v2285_v12  }
 0x3fe PF: > { %2440 = sbr.rel (!%p3647_p10) target bundleno = 1049 (0x419), region = 134  ;;  %s5020_s15 = sld [smem:[#allocation11_spill]] (%p3647_p10)  ;;  %v2462_v51 = vld [vmem:[%s3907_s24] sm:$0xff] (%p3647_p10)   ;;  %v2466_v4 = vld [vmem:[%s3907_s24 + $0x8] sm:$0xff] (%p3647_p10)   ;;  %v2470_v11 = vld [vmem:[%s3907_s24 + $0x10] sm:$0xff] (%p3647_p10)  }
 0x3ff   : > { %s5021_s17 = sld [smem:[#allocation12_spill]] (%p3647_p10)  ;;  %v2474_v28 = vld [vmem:[%s3907_s24 + $0x18] sm:$0xff] (%p3647_p10)   ;;  %v2478_v59 = vld [vmem:[%s3907_s24 + $0x20] sm:$0xff] (%p3647_p10)   ;;  %v2482_v33 = vld [vmem:[%s3907_s24 + $0x28] sm:$0xff] (%p3647_p10)  }
 0x400   : > { %v2486_v61 = vld [vmem:[%s3907_s24 + $0x30] sm:$0xff] (%p3647_p10)   ;;  %v2490_v52 = vld [vmem:[%s3907_s24 + $0x38] sm:$0xff] (%p3647_p10)   ;;  %v2494_v15 = vld [vmem:[%s3907_s24 + $0x40] sm:$0xff] (%p3647_p10)   ;;  %s5022_s18 = sld [smem:[#allocation18_spill]] (%p3647_p10) }
 0x401   : > { %v2498_v17 = vld [vmem:[%s3907_s24 + $0x48] sm:$0xff] (%p3647_p10)   ;;  %v2502_v32 = vld [vmem:[%s3907_s24 + $0x50] sm:$0xff] (%p3647_p10)   ;;  %v2506_v29 = vld [vmem:[%s3907_s24 + $0x58] sm:$0xff] (%p3647_p10)  }
 0x402   : > { %v2510_v22 = vld [vmem:[%s3907_s24 + $0x60] sm:$0xff] (%p3647_p10)   ;;  %v2514_v25 = vld [vmem:[%s3907_s24 + $0x68] sm:$0xff] (%p3647_p10)   ;;  %v2518_v0 = vld [vmem:[%s3907_s24 + $0x70] sm:$0xff] (%p3647_p10)  }
 0x403   : > { %v2522_v2 = vld [vmem:[%s3907_s24 + $0x78] sm:$0xff]   ;;  %v2526_v6 = vld [vmem:[%s3907_s24 + $0x80] sm:$0xff]   ;;  %v2530_v55 = vld [vmem:[%s3907_s24 + $0x88] sm:$0xff]  }
 0x404   : > { %s3132_s11 = sshll.u32 %s5020_s15, 4  ;;  %v2534_v48 = vld [vmem:[%s3907_s24 + $0x90] sm:$0xff]   ;;  %v2538_v23 = vld [vmem:[%s3907_s24 + $0x98] sm:$0xff]   ;;  %v2542_v35 = vld [vmem:[%s3907_s24 + $0xa0] sm:$0xff]  }
 0x405   : > { %s3133_s27 = sshll.u32 %s5021_s17, 7  ;;  %v2546_v60 = vld [vmem:[%s3907_s24 + $0xa8] sm:$0xff]   ;;  %v2550_v10 = vld [vmem:[%s3907_s24 + $0xb0] sm:$0xff]   ;;  %v2554_v24 = vld [vmem:[%s3907_s24 + $0xb8] sm:$0xff]  }
 0x406   : > { %s2443_s10 = sadd.s32 %s3133_s27, %s3132_s11  ;;  %v2558_v26 = vld [vmem:[%s3907_s24 + $0xc0] sm:$0xff]   ;;  %v2562_v39 = vld [vmem:[%s3907_s24 + $0xc8] sm:$0xff]   ;;  %v2566_v45 = vld [vmem:[%s3907_s24 + $0xd0] sm:$0xff]  }
 0x407   : > { %s3134_s12 = sshll.u32 %s2443_s10, 2  ;;  %v2570_v34 = vld [vmem:[%s3907_s24 + $0xd8] sm:$0xff]   ;;  %v2574_v36 = vld [vmem:[%s3907_s24 + $0xe0] sm:$0xff]   ;;  %v2578_v57 = vld [vmem:[%s3907_s24 + $0xe8] sm:$0xff]  }
 0x408   : > { %s4902_s19 = scalar_lea.vmem %s5022_s18, %s3134_s12  ;;  %v2582_v1 = vld [vmem:[%s3907_s24 + $0xf0] sm:$0xff]   ;;  %v2586_v7 = vld [vmem:[%s3907_s24 + $0xf8] sm:$0xff]  }
 0x409   : > { %2463 = vst [vmem:[%s4902_s19] sm:$0xff] %v2462_v51   ;;  %2467 = vst [vmem:[%s4902_s19 + $0x8] sm:$0xff] %v2466_v4  }
 0x40a   : > { %2471 = vst [vmem:[%s4902_s19 + $0x10] sm:$0xff] %v2470_v11   ;;  %2475 = vst [vmem:[%s4902_s19 + $0x18] sm:$0xff] %v2474_v28  }
 0x40b   : > { %2479 = vst [vmem:[%s4902_s19 + $0x20] sm:$0xff] %v2478_v59   ;;  %2483 = vst [vmem:[%s4902_s19 + $0x28] sm:$0xff] %v2482_v33  }
 0x40c   : > { %2487 = vst [vmem:[%s4902_s19 + $0x30] sm:$0xff] %v2486_v61   ;;  %2491 = vst [vmem:[%s4902_s19 + $0x38] sm:$0xff] %v2490_v52  }
 0x40d   : > { %2495 = vst [vmem:[%s4902_s19 + $0x80] sm:$0xff] %v2494_v15   ;;  %2499 = vst [vmem:[%s4902_s19 + $0x88] sm:$0xff] %v2498_v17  }
 0x40e   : > { %2503 = vst [vmem:[%s4902_s19 + $0x90] sm:$0xff] %v2502_v32   ;;  %2507 = vst [vmem:[%s4902_s19 + $0x98] sm:$0xff] %v2506_v29  }
 0x40f   : > { %2511 = vst [vmem:[%s4902_s19 + $0xa0] sm:$0xff] %v2510_v22   ;;  %2515 = vst [vmem:[%s4902_s19 + $0xa8] sm:$0xff] %v2514_v25  }
 0x410   : > { %2519 = vst [vmem:[%s4902_s19 + $0xb0] sm:$0xff] %v2518_v0   ;;  %2523 = vst [vmem:[%s4902_s19 + $0xb8] sm:$0xff] %v2522_v2  }
 0x411   : > { %2527 = vst [vmem:[%s4902_s19 + $0x100] sm:$0xff] %v2526_v6   ;;  %2531 = vst [vmem:[%s4902_s19 + $0x108] sm:$0xff] %v2530_v55  }
 0x412   : > { %2535 = vst [vmem:[%s4902_s19 + $0x110] sm:$0xff] %v2534_v48   ;;  %2539 = vst [vmem:[%s4902_s19 + $0x118] sm:$0xff] %v2538_v23  }
 0x413   : > { %2543 = vst [vmem:[%s4902_s19 + $0x120] sm:$0xff] %v2542_v35   ;;  %2547 = vst [vmem:[%s4902_s19 + $0x128] sm:$0xff] %v2546_v60  }
 0x414   : > { %2551 = vst [vmem:[%s4902_s19 + $0x130] sm:$0xff] %v2550_v10   ;;  %2555 = vst [vmem:[%s4902_s19 + $0x138] sm:$0xff] %v2554_v24  }
 0x415   : > { %2559 = vst [vmem:[%s4902_s19 + $0x180] sm:$0xff] %v2558_v26   ;;  %2563 = vst [vmem:[%s4902_s19 + $0x188] sm:$0xff] %v2562_v39  }
 0x416   : > { %2567 = vst [vmem:[%s4902_s19 + $0x190] sm:$0xff] %v2566_v45   ;;  %2571 = vst [vmem:[%s4902_s19 + $0x198] sm:$0xff] %v2570_v34  }
 0x417   : > { %2575 = vst [vmem:[%s4902_s19 + $0x1a0] sm:$0xff] %v2574_v36   ;;  %2579 = vst [vmem:[%s4902_s19 + $0x1a8] sm:$0xff] %v2578_v57  }
 0x418   : > { %2583 = vst [vmem:[%s4902_s19 + $0x1b0] sm:$0xff] %v2582_v1   ;;  %2587 = vst [vmem:[%s4902_s19 + $0x1b8] sm:$0xff] %v2586_v7  }
 0x419 PF: > { %s22_s8 = sadd.s32 1, %s3511_s8   ;;  %s5023_s20 = sld [smem:[#allocation13_spill]] }
 0x41a   : > { %p19_p1 = scmp.ge.s32.totalorder %s22_s8, 6   ;;  %s5024_s24 = smov %s3487_s25 }
 0x41b   : > { %s5025_s25 = smov %s3491_s26  ;;  %s5026_s26 = smov %s3660_s7 }
 0x41c   : > { %s5027_s27 = smov %s3503_s29  ;;  %s5028_s28 = smov %s3507_s30 }
 0x41d   : > { %s5030_s30 = smov %s5036_s22  ;;  %21 = sbr.rel (!%p19_p1) target bundleno = 11 (0xb), region = 240 }
 0x41f   : > { %s5029_s29 = smov %s5023_s20 }
 0x422   :  { %2765 = vsyncpa [#allocation3], 1 }
 0x423   :  { %2767 = vsyncpa [#allocation3 + $0x1], 1 }
 0x424   :  { %2768 = vsyncpa [#allocation5], 1 }

// kernel: tpu_custom_call.1
= control target key start
LH: loop header
LB: loop body
LE: loop exit
PB: predicated region body
PF: predicated region fallthrough
CT: control target
= control target key end

     0   :  { %s4983_s0 = inlined_call_operand.hbm [shape: f32[2,256,128], index: 0, kind: input, shape index: {}]   ;;  %s4984_s1 = inlined_call_operand.vmem [shape: f32[1,128], index: 1, kind: input, shape index: {}]   ;;  %s4985_s2 = inlined_call_operand.vmem [shape: f32[1,128], index: 2, kind: input, shape index: {}]   ;;  %s4986_s3 = inlined_call_operand.hbm [shape: bf16[128,384], index: 3, kind: input, shape index: {}]   ;;  %s4987_s4 = inlined_call_operand.vmem [shape: f32[1,384], index: 4, kind: input, shape index: {}]   ;;  %s4988_s5 = inlined_call_operand.vmem [shape: bf16[2,4,256,32], index: 5, kind: output, shape index: {0}]   ;;  %s4989_s6 = inlined_call_operand.vmem [shape: bf16[2,4,256,32], index: 6, kind: output, shape index: {1}]   ;;  %s4990_s7 = inlined_call_operand.vmem [shape: bf16[2,4,256,32], index: 7, kind: output, shape index: {2}]  }
   0x1   :  { %4994 = sst [smem:[#allocation15_spill]] %s4986_s3 }
   0x2   :  { %4995 = sst [smem:[#allocation16_spill]] %s4988_s5 }
   0x3   :  { %4996 = sst [smem:[#allocation17_spill]] %s4989_s6 }
   0x4   :  { %4997 = sst [smem:[#allocation18_spill]] %s4990_s7 }
   0x5   :  { %13 = vsyncpa [#allocation3], 0 }
   0x6   :  { %15 = vsyncpa [#allocation3 + $0x1], 0 }
   0x7   :  { %16 = vsyncpa [#allocation5], 0  ;;  %s3563_s24 = smov 0   ;;  %s3565_s25 = smov 0  }
   0x8   :  { %s3567_s26 = smov 0   ;;  %s3569_s27 = smov 0  }
   0x9   :  { %s3571_s28 = smov 0   ;;  %s3573_s29 = smov 0  }
   0xa   :  { %s3575_s30 = smov 0   ;;  %s3577_s8 = smov 0  }
   0xb LB: > { %4998 = sst [smem:[#allocation11_spill]] %s3495_s27  ;;  %s2890_s9 = sadd.s32 4294967295, %s3511_s8   ;;  %s3511_s8 = sphi %s3577_s8, %s22_s8   ;;  %s3507_s30 = sphi %s3575_s30, %s5030_s30   ;;  %s3503_s29 = sphi %s3573_s29, %s5029_s29   ;;  %s3499_s28 = sphi %s3571_s28, %s5028_s28   ;;  %s3495_s27 = sphi %s3569_s27, %s5027_s27   ;;  %s3491_s26 = sphi %s3567_s26, %s5026_s26   ;;  %s3487_s25 = sphi %s3565_s25, %s5025_s25   ;;  %s3483_s24 = sphi %s3563_s24, %s5024_s24  }
   0xc   : > { %4999 = sst [smem:[#allocation12_spill]] %s3499_s28  ;;  %p56_p0 = scmp.ne.s32.totalorder %s3487_s25, %s3483_s24 }
   0xd   : > { %p3603_p1 = scmp.eq.s32.totalorder %s2890_s9, 0  ;;  %p3607_p2 = scmp.eq.s32.totalorder %s2890_s9, 3 }
   0xe   : > { %p2892_p3 = scmp.ge.s32.totalorder %s3511_s8, 1  ;;  %p235_p4 = scmp.lt.s32.totalorder %s3511_s8, 5 }
   0xf   : > { %p3615_p5 = por %p3603_p1, %p56_p0  ;;  %s3513_s14 = smov [#allocation4]  }
  0x10   : > { %p3619_p6 = pnand %p2892_p3, %p235_p4  ;;  %s253_s15 = sshll.u32 %s3513_s14, 4  ;;  %s254_s15 = int_to_ptr.vmem [resolvable:$true] %s253_s15 }
  0x11   : > { %s5002_s12 = scalar_select %p3615_p5, 1, 0 }
  0x12   : > { %p3239_p7 = pneg %p3619_p6  ;;  %s3398_s16 = scalar_lea.vmem %s254_s15, 3072 }
  0x13   : > { %p3399_p10 = scmp.ne.s32.totalorder %s254_s15, %s3398_s16  ;;  %p3406_p13 = scmp.lt.s32.totalorder %s254_s15, %s254_s15 }
  0x14   : > { %p3240_p8 = pnand %p3239_p7, %p3603_p1  ;;  %p3407_p0 = scmp.lt.s32.totalorder %s3398_s16, %s3398_s16 }
  0x16   : > { %p3389_p9 = pneg %p3240_p8  ;;  %p3408_p5 = por %p3407_p0, %p3406_p13 }
  0x18   : > { %p3401_p11 = pnand %p3399_p10, %p3389_p9 }
  0x1a   : > { %p3402_p12 = pneg %p3401_p11 }
  0x1c   : > { %p3409_p3 = pnand %p3408_p5, %p3402_p12 }
  0x1e   : > { %3412 = shalt.err (!%p3409_p3)
}
  0x1f   : > { %s3514_s17 = smov 192   ;;  %s3515_s18 = smov 12  }
  0x20   : > { %s5004_s3 = sld [smem:[#allocation15_spill]]  ;;  %s31_s21 = sadd.s32 1, %s3503_s29 }
  0x21   : > { %s34_s22 = sadd.s32 1, %s3507_s30  ;;  %p32_p4 = scmp.ge.s32.totalorder %s31_s21, 2 }
  0x22   : > { %s43_s23 = sadd.s32 1, %s3491_s26  ;;  %p50_p5 = scmp.ne.s32.totalorder %s3491_s26, %s3487_s25 }
  0x23   : > { %p51_p7 = scmp.eq.s32.totalorder %s3511_s8, 0  ;;  %s5032_s21 = smov (%p32_p4, %s31_s21), 0 }
  0x24   : > { %5005 = sst [smem:[#allocation13_spill]] %s5032_s21  ;;  %s5034_s22 = smov (!%p32_p4, %s34_s22), %s3507_s30 }
  0x25   : > { %s39_s24 = ssub.s32 %s3503_s29, %s5032_s21  ;;  %p3641_p9 = por %p51_p7, %p50_p5 }
  0x26   : > { %3242 = dma.hbm_to_vmem [thread:$0]  (!%p3240_p8), %s5004_s3, 3072, %s254_s15, [#allocation5], %s3514_s17, %s3514_s17, %s3515_s18  }
  0x27   : > { %p36_p8 = scmp.ge.s32.totalorder %s5034_s22, 2  ;;  %p3647_p10 = por %p3607_p2, %p50_p5 }
  0x28   : > { %p3248_p11 = scmp.lt.s32.totalorder %s3511_s8, 4  ;;  %s270_s15 = sand.u32 1, %s3491_s26  }
  0x29   : > { %s5007_s14 = scalar_select %p3647_p10, 1, 0 }
  0x2a   : > { %s5036_s22 = smov (%p36_p8, %s5034_s22), 0  ;;  %s2895_s16 = sshll.u32 %s270_s15, 7 }
  0x2b   : > { %5008 = sst [smem:[#allocation14_spill]] %s5007_s14  ;;  %s38_s17 = ssub.s32 %s3507_s30, %s5036_s22 }
  0x2c   : > { %s40_s18 = sor.u32 %s39_s24, %s38_s17  ;;  %s2896_s19 = sshll.u32 %s3503_s29, 4 }
  0x2d   : > { %p41_p12 = scmp.eq.s32.totalorder %s40_s18, 0  ;;  %s2897_s20 = sshll.u32 %s3507_s30, 5 }
  0x2e   : > { %s280_s3 = sadd.s32 %s2897_s20, %s2896_s19  ;;  %s274_s21 = scalar_lea.vmem [#allocation2], %s2895_s16 }
  0x2f   : > { %s283_s11 = sshll.u32 %s274_s21, 4  ;;  %s2898_s6 = sshll.u32 %s280_s3, 7  ;;  %s284_s11 = int_to_ptr.vmem [resolvable:$true] %s283_s11 }
  0x30   : > { %s3660_s7 = scalar_select %p41_p12, %s3491_s26, %s43_s23  }
  0x31   : > { %s282_s27 = scalar_lea.hbm %s4983_s0, %s2898_s6  ;;  %p3669_p2 = pnand %p3248_p11, %p3641_p9 }
  0x32   : > { %s271_s24 = scalar_lea.sflag [#allocation3], %s270_s15  ;;  %s3426_s16 = scalar_lea.vmem %s284_s11, 2048 }
  0x33   : > { %p3415_p13 = pneg %p3669_p2  ;;  %p3427_p0 = scmp.ne.s32.totalorder %s284_s11, %s3426_s16 }
  0x34   : > { %s3516_s3 = smov [#allocation2]  }
  0x35   : > { %p3429_p3 = pnand %p3427_p0, %p3415_p13  ;;  %s3431_s21 = sshll.u32 %s3516_s3, 4  ;;  %s3432_s21 = int_to_ptr.vmem [resolvable:$false] %s3431_s21 }
  0x36   : > { %s3433_s23 = scalar_lea.vmem %s3432_s21, 4096  ;;  %p3434_p5 = scmp.lt.s32.totalorder %s284_s11, %s3432_s21 }
  0x37   : > { %p3430_p4 = pneg %p3429_p3  ;;  %p3435_p7 = scmp.lt.s32.totalorder %s3433_s23, %s3426_s16 }
  0x39   : > { %p3436_p8 = por %p3435_p7, %p3434_p5 }
  0x3b   : > { %p3437_p12 = pnand %p3436_p8, %p3430_p4 }
  0x3d   : > { %3440 = shalt.err (!%p3437_p12)
}
  0x3e   : > { %s3517_s5 = smov 128   ;;  %s3518_s6 = smov 8  }
  0x3f   : > { %3246 = dma.hbm_to_vmem [thread:$0]  (!%p3669_p2), %s282_s27, 2048, %s284_s11, %s271_s24, %s3517_s5, %s3517_s5, %s3518_s6  }
  0x40   : > { %295 = sbr.rel (%p3619_p6) target bundleno = 1049 (0x419), region = 40  ;;  %s3680_s28 = sand.u32 (!%p3619_p6), 1, %s3487_s25  }
  0x41   : > { %s2900_s9 = sshll.u32 (!%p3619_p6), %s3680_s28, 7  ;;  %s298_s15 = scalar_lea.sflag (!%p3619_p6), [#allocation3], %s3680_s28 }
  0x42   : > { %s3684_s17 = scalar_lea.vmem (!%p3619_p6), [#allocation2], %s2900_s9  ;;  %p5010_p9 = scmp.ne.s32.totalorder (!%p3619_p6), %s5002_s12, 0 }
  0x45   : > { %3474 = dma.done.wait (%p5010_p9), %s298_s15, 2048  }
  0x46   : > { %3476 = vsyncadd (%p5010_p9), %s298_s15, 4294965248 }
  0x47   : > { %3478 = dma.done.wait (%p3603_p1), [#allocation5], 3072  }
  0x48   : > { %3480 = vsyncadd (%p3603_p1), [#allocation5], 4294964224  ;;  %v348_v0 = vld [vmem:[%s3684_s17] sm:$0xff]  ;;  %v350_v1 = vld [vmem:[%s3684_s17 + $0x10] sm:$0xff]  ;;  %s2902_s19 = sshll.u32 %s3680_s28, 8  ;;  %vm1062_vm0 = vcmask 257024  }
  0x49   : > { %366 = vadd.xlane.f32.xlu0 %v348_v0  ;;  %370 = vadd.xlane.f32.xlu1 %v350_v1  ;;  %v349_v2 = vld [vmem:[%s3684_s17 + $0x8] sm:$0xff]  ;;  %v351_v3 = vld [vmem:[%s3684_s17 + $0x18] sm:$0xff]  ;;  %v352_v4 = vld [vmem:[%s3684_s17 + $0x20] sm:$0xff]  ;;  %s3890_s20 = scalar_lea.vmem [#allocation6], %s2902_s19  ;;  %s3895_s11 = scalar_lea.vmem [#allocation7], %s2902_s19 }
  0x4a   : > { %v353_v5 = vld [vmem:[%s3684_s17 + $0x28] sm:$0xff]  ;;  %v354_v6 = vld [vmem:[%s3684_s17 + $0x30] sm:$0xff]  ;;  %v355_v7 = vld [vmem:[%s3684_s17 + $0x38] sm:$0xff]  ;;  %s3907_s24 = scalar_lea.vmem [#allocation8], %s2902_s19  ;;  %s3520_s16 = smov 96  }
  0x4b   : > { %v3703_v8 = vld [vmem:[%s3684_s17 + $0x40] sm:$0xff]  ;;  %v3706_v9 = vld [vmem:[%s3684_s17 + $0x48] sm:$0xff]  ;;  %v3711_v10 = vld [vmem:[%s3684_s17 + $0x50] sm:$0xff]  ;;  %s3521_s3 = smov 64   ;;  %s3522_s21 = smov 32  }
  0x4c   : > { %v3714_v11 = vld [vmem:[%s3684_s17 + $0x58] sm:$0xff]  ;;  %v3719_v12 = vld [vmem:[%s3684_s17 + $0x60] sm:$0xff]  ;;  %v3722_v13 = vld [vmem:[%s3684_s17 + $0x68] sm:$0xff]  ;;  %s5012_s5 = sld [smem:[#allocation11_spill]] (%p3647_p10) }
  0x4d   : > { %368 = vadd.xlane.f32.xlu0 %v349_v2  ;;  %372 = vadd.xlane.f32.xlu1 %v351_v3  ;;  %v3727_v14 = vld [vmem:[%s3684_s17 + $0x70] sm:$0xff]  ;;  %v3730_v15 = vld [vmem:[%s3684_s17 + $0x78] sm:$0xff]  ;;  %s5013_s6 = sld [smem:[#allocation12_spill]] (%p3647_p10) }
  0x4e   : > { %v3323_v16 = vld [vmem:[#allocation4 + $0xac] ss:$12 sps:$4 sm:$0xff]   ;;  %v3325_v17 = vld [vmem:[#allocation4 + $0xa8] ss:$12 sps:$4 sm:$0xff]   ;;  %v3328_v54 = vld [vmem:[#allocation4 + $0xb0] ss:$12 sps:$4 sm:$0xff]  }
  0x4f   : > { %772 = vmatprep.subr.bf16.mxu0 %v3323_v16  ;;  %v3326_v53 = vld [vmem:[#allocation4 + $0x94] ss:$12 sps:$4 sm:$0xff]   ;;  %v3329_v55 = vld [vmem:[#allocation4 + $0x90] ss:$12 sps:$4 sm:$0xff]   ;;  %3201 = vmatprep.subr.bf16.mxu1 %v3328_v54  ;;  %s5014_s12 = sld [smem:[#allocation16_spill]] (%p3647_p10) }
  0x50   : > { %773 = vmatpush1.bf16.msra.mxu0 %v3325_v17  ;;  %3202 = vmatpush3.bf16.msra.mxu1 %v3328_v54  ;;  %v3334_v17 = vld [vmem:[#allocation4 + $0x64] ss:$12 sps:$4 sm:$0xff]  }
  0x51   : > { %374 = vadd.xlane.f32.xlu0 %v352_v4  ;;  %376 = vadd.xlane.f32.xlu1 %v353_v5 }
  0x52   : > { %774 = vmatprep.subr.bf16.mxu0 %v3326_v53  ;;  %s3126_s28 = sshll.u32 (%p3647_p10), %s5012_s5, 4 }
  0x53   : > { %s3127_s9 = sshll.u32 (%p3647_p10), %s5013_s6, 7 }
  0x54   : > { %775 = vmatpush1.bf16.msra.mxu0 %v3329_v55  ;;  %s1841_s15 = sadd.s32 (%p3647_p10), %s3127_s9, %s3126_s28 }
  0x55   : > { %378 = vadd.xlane.f32.xlu0 %v354_v6  ;;  %380 = vadd.xlane.f32.xlu1 %v355_v7  ;;  %s3128_s17 = sshll.u32 (%p3647_p10), %s1841_s15, 2 }
  0x56   : > { %s4756_s13 = scalar_lea.vmem (%p3647_p10), %s5014_s12, %s3128_s17 }
  0x59   : > { %382 = vadd.xlane.f32.xlu0 %v3703_v8  ;;  %384 = vadd.xlane.f32.xlu1 %v3706_v9 }
  0x5d   : > { %386 = vadd.xlane.f32.xlu0 %v3711_v10  ;;  %388 = vadd.xlane.f32.xlu1 %v3714_v11 }
  0x61   : > { %390 = vadd.xlane.f32.xlu0 %v3719_v12  ;;  %392 = vadd.xlane.f32.xlu1 %v3722_v13 }
  0x65   : > { %394 = vadd.xlane.f32.xlu0 %v3727_v14  ;;  %396 = vadd.xlane.f32.xlu1 %v3730_v15 }
  0xd2   : > { %v367_v18 = vpop.xlane.xlu0 %366  ;;  %v371_v19 = vpop.xlane.xlu1 %370 }
  0xd3   : > { %v399_v20 = vmul.f32 0.0078125, %v367_v18  ;;  %v401_v21 = vmul.f32 0.0078125, %v371_v19  ;;  %v3336_v18 = vld [vmem:[#allocation4 + $0x80] ss:$12 sps:$4 sm:$0xff]  }
  0xd5   : > { %v3734_v22 = vsub.f32 %v348_v0, %v399_v20  ;;  %v3736_v23 = vsub.f32 %v350_v1, %v401_v21  ;;  %v3330_v0 = vld [vmem:[#allocation4 + $0x7c] ss:$12 sps:$4 sm:$0xff]   ;;  %v3332_v1 = vld [vmem:[#allocation4 + $0x98] ss:$12 sps:$4 sm:$0xff]   ;;  %v3337_v20 = vld [vmem:[#allocation4 + $0x60] ss:$12 sps:$4 sm:$0xff]  }
  0xd6   : > { %v369_v24 = vpop.xlane.xlu0 %368  ;;  %v373_v25 = vpop.xlane.xlu1 %372  ;;  %776 = vmatprep.subr.bf16.mxu0 %v3330_v0  ;;  %3203 = vmatprep.subr.bf16.mxu1 %v3332_v1 }
  0xd7   : > { %v400_v26 = vmul.f32 0.0078125, %v369_v24  ;;  %v431_v27 = vmul.f32 %v3734_v22, %v3734_v22  ;;  %v402_v28 = vmul.f32 0.0078125, %v373_v25  ;;  %v433_v29 = vmul.f32 %v3736_v23, %v3736_v23  ;;  %3204 = vmatpush3.bf16.msra.mxu1 %v3332_v1 }
  0xd8   : > { %3205 = vmatprep.subr.bf16.mxu1 %v3336_v18 }
  0xd9   : > { %447 = vadd.xlane.f32.xlu0 %v431_v27  ;;  %v3742_v30 = vsub.f32 %v349_v2, %v400_v26  ;;  %v3744_v31 = vsub.f32 %v351_v3, %v402_v28  ;;  %v3338_v28 = vld [vmem:[#allocation4 + $0x4c] ss:$12 sps:$4 sm:$0xff]  }
  0xda   : > { %v375_v32 = vpop.xlane.xlu0 %374  ;;  %v377_v33 = vpop.xlane.xlu1 %376 }
  0xdb   : > { %v403_v34 = vmul.f32 0.0078125, %v375_v32  ;;  %v432_v35 = vmul.f32 %v3742_v30, %v3742_v30  ;;  %v404_v36 = vmul.f32 0.0078125, %v377_v33  ;;  %v434_v37 = vmul.f32 %v3744_v31, %v3744_v31  ;;  %3206 = vmatpush3.bf16.msra.mxu1 %v3336_v18  ;;  %v3341_v33 = vld [vmem:[#allocation4 + $0x48] ss:$12 sps:$4 sm:$0xff]  }
  0xdd   : > { %451 = vadd.xlane.f32.xlu0 %v433_v29  ;;  %449 = vadd.xlane.f32.xlu1 %v432_v35  ;;  %v3750_v38 = vsub.f32 %v352_v4, %v403_v34  ;;  %v3752_v39 = vsub.f32 %v353_v5, %v404_v36  ;;  %v3333_v5 = vld [vmem:[#allocation4 + $0x78] ss:$12 sps:$4 sm:$0xff]   ;;  %v3340_v29 = vld [vmem:[#allocation4 + $0x68] ss:$12 sps:$4 sm:$0xff]   ;;  %v3344_v36 = vld [vmem:[#allocation4 + $0x50] ss:$12 sps:$4 sm:$0xff]  }
  0xde   : > { %v379_v40 = vpop.xlane.xlu0 %378  ;;  %v381_v41 = vpop.xlane.xlu1 %380  ;;  %777 = vmatpush1.bf16.msra.mxu0 %v3333_v5  ;;  %3207 = vmatprep.subr.bf16.mxu1 %v3340_v29  ;;  %v3342_v35 = vld [vmem:[#allocation4 + $0x34] ss:$12 sps:$4 sm:$0xff]  }
  0xdf   : > { %v405_v42 = vmul.f32 0.0078125, %v379_v40  ;;  %v435_v43 = vmul.f32 %v3750_v38, %v3750_v38  ;;  %v406_v44 = vmul.f32 0.0078125, %v381_v41  ;;  %v436_v45 = vmul.f32 %v3752_v39, %v3752_v39  ;;  %778 = vmatprep.subr.bf16.mxu0 %v3334_v17  ;;  %3208 = vmatpush3.bf16.msra.mxu1 %v3340_v29  ;;  %v3348_v40 = vld [vmem:[#allocation4 + $0x38] ss:$12 sps:$4 sm:$0xff]  }
  0xe0   : > { %3209 = vmatprep.subr.bf16.mxu1 %v3344_v36  ;;  %v3349_v41 = vld [vmem:[#allocation4 + $0x18] ss:$12 sps:$4 sm:$0xff]  }
  0xe1   : > { %453 = vadd.xlane.f32.xlu1 %v434_v37  ;;  %455 = vadd.xlane.f32.xlu0 %v435_v43  ;;  %v3758_v46 = vsub.f32 %v354_v6, %v405_v42  ;;  %v3760_v47 = vsub.f32 %v355_v7, %v406_v44  ;;  %v3350_v42 = vld [vmem:[#allocation4 + $0x4] ss:$12 sps:$4 sm:$0xff]   ;;  %v3352_v43 = vld [vmem:[#allocation4 + $0x20] ss:$12 sps:$4 sm:$0xff]  }
  0xe2   : > { %v383_v48 = vpop.xlane.xlu0 %382  ;;  %v385_v49 = vpop.xlane.xlu1 %384  ;;  %779 = vmatpush1.bf16.msra.mxu0 %v3337_v20  ;;  %v3353_v44 = vld [vmem:[#allocation4] ss:$12 sps:$4 sm:$0xff]  }
  0xe3   : > { %v407_v50 = vmul.f32 0.0078125, %v383_v48  ;;  %v437_v51 = vmul.f32 %v3758_v46, %v3758_v46  ;;  %v408_v52 = vmul.f32 0.0078125, %v385_v49  ;;  %v438_v56 = vmul.f32 %v3760_v47, %v3760_v47  ;;  %780 = vmatprep.subr.bf16.mxu0 %v3338_v28  ;;  %3210 = vmatpush3.bf16.msra.mxu1 %v3344_v36 }
  0xe4   : > { %3211 = vmatprep.subr.bf16.mxu1 %v3348_v40  ;;  %v3519_v48 = vmov 0  }
  0xe5   : > { %457 = vadd.xlane.f32.xlu1 %v436_v45  ;;  %459 = vadd.xlane.f32.xlu0 %v437_v51  ;;  %v3767_v57 = vsub.f32 %v3703_v8, %v407_v50  ;;  %v3770_v58 = vsub.f32 %v3706_v9, %v408_v52  ;;  %v3354_v45 = vld [vmem:[#allocation4 + $0x8] ss:$12 sps:$4 sm:$0xff]  }
  0xe6   : > { %v387_v59 = vpop.xlane.xlu0 %386  ;;  %v389_v60 = vpop.xlane.xlu1 %388  ;;  %781 = vmatpush1.bf16.msra.mxu0 %v3341_v33  ;;  %804 = vmatprep.mubr.bf16.mxu0 %v3519_v48 }
  0xe7   : > { %v409_v61 = vmul.f32 0.0078125, %v387_v59  ;;  %v439_v62 = vmul.f32 %v3767_v57, %v3767_v57  ;;  %v410_v63 = vmul.f32 0.0078125, %v389_v60  ;;  %v440_v2 = vmul.f32 %v3770_v58, %v3770_v58  ;;  %782 = vmatprep.subr.bf16.mxu0 %v3342_v35  ;;  %3212 = vmatpush3.bf16.msra.mxu1 %v3348_v40 }
  0xe8   : > { %3213 = vmatprep.subr.bf16.mxu1 %v3352_v43 }
  0xe9   : > { %461 = vadd.xlane.f32.xlu1 %v438_v56  ;;  %463 = vadd.xlane.f32.xlu0 %v439_v62  ;;  %v3777_v3 = vsub.f32 %v3711_v10, %v409_v61  ;;  %v3780_v4 = vsub.f32 %v3714_v11, %v410_v63 }
  0xea   : > { %v391_v6 = vpop.xlane.xlu0 %390  ;;  %v393_v7 = vpop.xlane.xlu1 %392 }
  0xeb   : > { %v411_v8 = vmul.f32 0.0078125, %v391_v6  ;;  %v441_v9 = vmul.f32 %v3777_v3, %v3777_v3  ;;  %v412_v16 = vmul.f32 0.0078125, %v393_v7  ;;  %v442_v10 = vmul.f32 %v3780_v4, %v3780_v4  ;;  %3214 = vmatpush3.bf16.msra.mxu1 %v3352_v43 }
  0xec   : > { %3215 = vmatprep.subr.bf16.mxu1 %v3354_v45 }
  0xed   : > { %465 = vadd.xlane.f32.xlu1 %v440_v2  ;;  %467 = vadd.xlane.f32.xlu0 %v441_v9  ;;  %v3787_v11 = vsub.f32 %v3719_v12, %v411_v8  ;;  %v3790_v19 = vsub.f32 %v3722_v13, %v412_v16 }
  0xee   : > { %v395_v21 = vpop.xlane.xlu0 %394  ;;  %v397_v24 = vpop.xlane.xlu1 %396 }
  0xef   : > { %v413_v25 = vmul.f32 0.0078125, %v395_v21  ;;  %v443_v26 = vmul.f32 %v3787_v11, %v3787_v11  ;;  %v414_v27 = vmul.f32 0.0078125, %v397_v24  ;;  %v444_v12 = vmul.f32 %v3790_v19, %v3790_v19  ;;  %3216 = vmatpush3.bf16.msra.mxu1 %v3354_v45 }
  0xf1   : > { %469 = vadd.xlane.f32.xlu1 %v442_v10  ;;  %471 = vadd.xlane.f32.xlu0 %v443_v26  ;;  %v3797_v13 = vsub.f32 %v3727_v14, %v413_v25  ;;  %v3800_v32 = vsub.f32 %v3730_v15, %v414_v27  ;;  %v3345_v14 = vld [vmem:[#allocation4 + $0x30] ss:$12 sps:$4 sm:$0xff]   ;;  %v3810_v25 = vld [vmem:[%s4984_s1] ss:$0 sm:$0xff] }
  0xf2   : > { %783 = vmatpush1.bf16.msra.mxu0 %v3345_v14  ;;  %v3346_v15 = vld [vmem:[#allocation4 + $0x1c] ss:$12 sps:$4 sm:$0xff]   ;;  %v3817_v14 = vld [vmem:[%s4985_s2] ss:$0 sm:$0xff] }
  0xf3   : > { %v445_v34 = vmul.f32 %v3797_v13, %v3797_v13  ;;  %v446_v37 = vmul.f32 %v3800_v32, %v3800_v32  ;;  %784 = vmatprep.subr.bf16.mxu0 %v3346_v15 }
  0xf5   : > { %473 = vadd.xlane.f32.xlu1 %v444_v12  ;;  %475 = vadd.xlane.f32.xlu0 %v445_v34 }
  0xf6   : > { %785 = vmatpush1.bf16.msra.mxu0 %v3349_v41 }
  0xf7   : > { %786 = vmatprep.subr.bf16.mxu0 %v3350_v42 }
  0xf9   : > { %477 = vadd.xlane.f32.xlu1 %v446_v37 }
  0xfa   : > { %787 = vmatpush1.bf16.msra.mxu0 %v3353_v44 }
 0x162   : > { %v448_v49 = vpop.xlane.xlu0 %447 }
 0x163   : > { %v479_v50 = vmul.f32 0.0078125, %v448_v49 }
 0x165   : > { %v495_v51 = vadd.f32 1e-05, %v479_v50 }
 0x166   : > { %v450_v52 = vpop.xlane.xlu1 %449  ;;  %v452_v53 = vpop.xlane.xlu0 %451 }
 0x167   : > { %3355 = vrsqrt.f32 %v495_v51  ;;  %v480_v54 = vmul.f32 0.0078125, %v450_v52  ;;  %v481_v55 = vmul.f32 0.0078125, %v452_v53 }
 0x169   : > { %v496_v56 = vadd.f32 1e-05, %v480_v54  ;;  %v497_v59 = vadd.f32 1e-05, %v481_v55 }
 0x16a   : > { %v454_v60 = vpop.xlane.xlu1 %453  ;;  %v456_v61 = vpop.xlane.xlu0 %455 }
 0x16b   : > { %3357 = vrsqrt.f32 %v496_v56  ;;  %v482_v62 = vmul.f32 0.0078125, %v454_v60  ;;  %v483_v63 = vmul.f32 0.0078125, %v456_v61 }
 0x16c   : > { %3359 = vrsqrt.f32 %v497_v59 }
 0x16d   : > { %v498_v0 = vadd.f32 1e-05, %v482_v62  ;;  %v499_v1 = vadd.f32 1e-05, %v483_v63 }
 0x16e   : > { %v458_v2 = vpop.xlane.xlu1 %457  ;;  %v460_v5 = vpop.xlane.xlu0 %459 }
 0x16f   : > { %3361 = vrsqrt.f32 %v498_v0  ;;  %v484_v6 = vmul.f32 0.0078125, %v458_v2  ;;  %v485_v7 = vmul.f32 0.0078125, %v460_v5 }
 0x170   : > { %3363 = vrsqrt.f32 %v499_v1 }
 0x171   : > { %v500_v8 = vadd.f32 1e-05, %v484_v6  ;;  %v501_v9 = vadd.f32 1e-05, %v485_v7 }
 0x172   : > { %v462_v16 = vpop.xlane.xlu1 %461  ;;  %v464_v17 = vpop.xlane.xlu0 %463 }
 0x173   : > { %3365 = vrsqrt.f32 %v500_v8  ;;  %v486_v18 = vmul.f32 0.0078125, %v462_v16  ;;  %v487_v10 = vmul.f32 0.0078125, %v464_v17 }
 0x174   : > { %v3356_v20 = vpop.eup %3355  ;;  %3367 = vrsqrt.f32 %v501_v9 }
 0x175   : > { %v502_v21 = vadd.f32 1e-05, %v486_v18  ;;  %v503_v24 = vadd.f32 1e-05, %v487_v10  ;;  %v527_v26 = vmul.f32 %v3356_v20, %v3734_v22 }
 0x176   : > { %v466_v27 = vpop.xlane.xlu1 %465  ;;  %v468_v28 = vpop.xlane.xlu0 %467 }
 0x177   : > { %3369 = vrsqrt.f32 %v502_v21  ;;  %v488_v29 = vmul.f32 0.0078125, %v466_v27  ;;  %v489_v12 = vmul.f32 0.0078125, %v468_v28  ;;  %v549_v34 = vmul.f32 %v3810_v25, %v527_v26 }
 0x178   : > { %v3358_v33 = vpop.eup %3357  ;;  %3371 = vrsqrt.f32 %v503_v24 }
 0x179   : > { %v3360_v35 = vpop.eup %3359  ;;  %v504_v36 = vadd.f32 1e-05, %v488_v29  ;;  %v505_v37 = vadd.f32 1e-05, %v489_v12  ;;  %v528_v15 = vmul.f32 %v3358_v33, %v3742_v30  ;;  %v571_v49 = vadd.f32 %v3817_v14, %v549_v34 }
 0x17a   : > { %v470_v22 = vpop.xlane.xlu1 %469  ;;  %v472_v40 = vpop.xlane.xlu0 %471  ;;  %v529_v41 = vmul.f32 %v3360_v35, %v3736_v23 }
 0x17b   : > { %3373 = vrsqrt.f32 %v504_v36  ;;  %v490_v42 = vmul.f32 0.0078125, %v470_v22  ;;  %v491_v43 = vmul.f32 0.0078125, %v472_v40  ;;  %v550_v44 = vmul.f32 %v3810_v25, %v528_v15 }
 0x17c   : > { %v3362_v45 = vpop.eup %3361  ;;  %3375 = vrsqrt.f32 %v505_v37  ;;  %v551_v23 = vmul.f32 %v3810_v25, %v529_v41 }
 0x17d   : > { %v3364_v50 = vpop.eup %3363  ;;  %v506_v51 = vadd.f32 1e-05, %v490_v42  ;;  %v507_v52 = vadd.f32 1e-05, %v491_v43  ;;  %v572_v53 = vadd.f32 %v3817_v14, %v550_v44  ;;  %v530_v30 = vmul.f32 %v3362_v45, %v3744_v31 }
 0x17e   : > { %v474_v54 = vpop.xlane.xlu1 %473  ;;  %v476_v55 = vpop.xlane.xlu0 %475  ;;  %v531_v56 = vmul.f32 %v3364_v50, %v3750_v38  ;;  %v573_v38 = vadd.f32 %v3817_v14, %v551_v23 }
 0x17f   : > { %3377 = vrsqrt.f32 %v506_v51  ;;  %v492_v59 = vmul.f32 0.0078125, %v474_v54  ;;  %v493_v60 = vmul.f32 0.0078125, %v476_v55  ;;  %v587_v61 = vpack.c.bf16 %v572_v53, %v571_v49 }
 0x180   : > { %v3366_v62 = vpop.eup %3365  ;;  %3379 = vrsqrt.f32 %v507_v52  ;;  %v552_v63 = vmul.f32 %v3810_v25, %v530_v30  ;;  %v553_v5 = vmul.f32 %v3810_v25, %v531_v56 }
 0x181   : > { %v3368_v0 = vpop.eup %3367  ;;  %v508_v1 = vadd.f32 1e-05, %v492_v59  ;;  %v509_v2 = vadd.f32 1e-05, %v493_v60  ;;  %805 = vmatmul.mubr.bf16.vlgmr.msra.gmra.mxu0 %v587_v61  ;;  %3217 = vmatprep.mubr.bf16.mxu1 %v587_v61  ;;  %v532_v31 = vmul.f32 %v3366_v62, %v3752_v39 }
 0x182   : > { %v478_v6 = vpop.xlane.xlu1 %477  ;;  %v574_v7 = vadd.f32 %v3817_v14, %v552_v63  ;;  %814 = vmatprep.mubr.bf16.mxu0 %v3519_v48  ;;  %v533_v8 = vmul.f32 %v3368_v0, %v3758_v46  ;;  %v575_v21 = vadd.f32 %v3817_v14, %v553_v5 }
 0x183   : > { %3381 = vrsqrt.f32 %v508_v1  ;;  %v494_v9 = vmul.f32 0.0078125, %v478_v6  ;;  %v554_v16 = vmul.f32 %v3810_v25, %v532_v31 }
 0x184   : > { %v3370_v17 = vpop.eup %3369  ;;  %3383 = vrsqrt.f32 %v509_v2  ;;  %v588_v18 = vpack.c.bf16 %v574_v7, %v573_v38  ;;  %v555_v39 = vmul.f32 %v3810_v25, %v533_v8 }
 0x185   : > { %v3372_v10 = vpop.eup %3371  ;;  %v510_v20 = vadd.f32 1e-05, %v494_v9  ;;  %v576_v24 = vadd.f32 %v3817_v14, %v554_v16  ;;  %v534_v26 = vmul.f32 %v3370_v17, %v3760_v47 }
 0x186   : > { %3218 = vmatmul.mubr.bf16.vlgmr.msra.gmra.mxu1 %v588_v18  ;;  %v535_v46 = vmul.f32 %v3372_v10, %v3767_v57  ;;  %v577_v12 = vadd.f32 %v3817_v14, %v555_v39 }
 0x187   : > { %3385 = vrsqrt.f32 %v510_v20  ;;  %v589_v27 = vpack.c.bf16 %v576_v24, %v575_v21  ;;  %v556_v28 = vmul.f32 %v3810_v25, %v534_v26 }
 0x188   : > { %v3374_v29 = vpop.eup %3373  ;;  %v557_v36 = vmul.f32 %v3810_v25, %v535_v46 }
 0x189   : > { %v3376_v33 = vpop.eup %3375  ;;  %815 = vmatmul.mubr.bf16.gmra.mxu0 %v588_v18  ;;  %3221 = vmatprep.mubr.bf16.mxu1 %v589_v27  ;;  %v578_v34 = vadd.f32 %v3817_v14, %v556_v28  ;;  %v536_v35 = vmul.f32 %v3374_v29, %v3770_v58 }
 0x18a   : > { %824 = vmatprep.mubr.bf16.mxu0 %v3519_v48  ;;  %v537_v47 = vmul.f32 %v3376_v33, %v3777_v3  ;;  %v579_v41 = vadd.f32 %v3817_v14, %v557_v36 }
 0x18b   : > { %v590_v57 = vpack.c.bf16 %v578_v34, %v577_v12  ;;  %v558_v37 = vmul.f32 %v3810_v25, %v536_v35 }
 0x18c   : > { %v3378_v15 = vpop.eup %3377  ;;  %v559_v22 = vmul.f32 %v3810_v25, %v537_v47 }
 0x18d   : > { %v3380_v40 = vpop.eup %3379  ;;  %v580_v42 = vadd.f32 %v3817_v14, %v558_v37  ;;  %v538_v43 = vmul.f32 %v3378_v15, %v3780_v4 }
 0x18e   : > { %3222 = vmatmul.mubr.bf16.gmra.mxu1 %v590_v57  ;;  %v539_v58 = vmul.f32 %v3380_v40, %v3787_v11  ;;  %v581_v49 = vadd.f32 %v3817_v14, %v559_v22 }
 0x18f   : > { %v591_v44 = vpack.c.bf16 %v580_v42, %v579_v41  ;;  %v560_v45 = vmul.f32 %v3810_v25, %v538_v43 }
 0x190   : > { %v3382_v3 = vpop.eup %3381  ;;  %v561_v53 = vmul.f32 %v3810_v25, %v539_v58 }
 0x191   : > { %v3384_v50 = vpop.eup %3383  ;;  %825 = vmatmul.mubr.bf16.gmra.mxu0 %v589_v27  ;;  %3225 = vmatprep.mubr.bf16.mxu1 %v591_v44  ;;  %v582_v51 = vadd.f32 %v3817_v14, %v560_v45  ;;  %v540_v52 = vmul.f32 %v3382_v3, %v3790_v19 }
 0x192   : > { %834 = vmatprep.mubr.bf16.mxu0 %v3519_v48  ;;  %v541_v4 = vmul.f32 %v3384_v50, %v3797_v13  ;;  %v583_v55 = vadd.f32 %v3817_v14, %v561_v53 }
 0x193   : > { %v592_v11 = vpack.c.bf16 %v582_v51, %v581_v49  ;;  %v562_v30 = vmul.f32 %v3810_v25, %v540_v52 }
 0x194   : > { %v3386_v54 = vpop.eup %3385  ;;  %v563_v59 = vmul.f32 %v3810_v25, %v541_v4 }
 0x195   : > { %v584_v23 = vadd.f32 %v3817_v14, %v562_v30  ;;  %v542_v56 = vmul.f32 %v3386_v54, %v3800_v32  ;;  %v629_v32 = vlaneseq }
 0x196   : > { %3226 = vmatmul.mubr.bf16.gmra.mxu1 %v592_v11  ;;  %v585_v13 = vadd.f32 %v3817_v14, %v563_v59 }
 0x197   : > { %v593_v19 = vpack.c.bf16 %v584_v23, %v583_v55  ;;  %v564_v60 = vmul.f32 %v3810_v25, %v542_v56  ;;  %v630_v25 = vshrl.u32 %v629_v32, 7 }
 0x199   : > { %835 = vmatmul.mubr.bf16.gmra.mxu0 %v590_v57  ;;  %3229 = vmatprep.mubr.bf16.mxu1 %v593_v19  ;;  %v586_v61 = vadd.f32 %v3817_v14, %v564_v60  ;;  %v631_v63 = vsub.s32 0, %v630_v25  ;;  %v627_v14 = vld [vmem:[%s4987_s4] sm:$0x7]  ;;  %v635_v0 = vsub.s32 1, %v630_v25  ;;  %v639_v2 = vsub.s32 2, %v630_v25 }
 0x19a   : > { %844 = vmatprep.mubr.bf16.mxu0 %v3519_v48 }
 0x19b   : > { %v594_v62 = vpack.c.bf16 %v586_v61, %v585_v13  ;;  %v3875_v1 = vrot.slane %v627_v14, %v631_v63  ;;  %v3877_v31 = vrot.slane %v627_v14, %v635_v0 }
 0x19e   : > { %3230 = vmatmul.mubr.bf16.gmra.mxu1 %v594_v62 }
 0x1a1   : > { %845 = vmatmul.mubr.bf16.gmra.mxu0 %v591_v44 }
 0x1a2   : > { %854 = vmatprep.mubr.bf16.mxu0 %v3519_v48 }
 0x1a9   : > { %855 = vmatmul.mubr.bf16.gmra.mxu0 %v592_v11 }
 0x1aa   : > { %864 = vmatprep.mubr.bf16.mxu0 %v3519_v48 }
 0x1b1   : > { %865 = vmatmul.mubr.bf16.gmra.mxu0 %v593_v19 }
 0x1b2   : > { %874 = vmatprep.mubr.bf16.mxu0 %v3519_v48  ;;  %v3881_v48 = vrot.slane %v627_v14, %v639_v2 }
 0x1b9   : > { %875 = vmatmul.mubr.bf16.gmra.mxu0 %v594_v62 }
 0x241   : > { %v806_v5 = vpop.f32.mrf.mxu0 }
 0x242   : > { %v807_v6 = vadd.f32 %v806_v5, %v3875_v1 }
 0x243   : > { %v808_v38 = vpop.f32.mrf.mxu0 }
 0x244   : > { %v982_v7 = vmul.f32 0.17677669, %v807_v6  ;;  %v809_v8 = vadd.f32 %v808_v38, %v3877_v31 }
 0x245   : > { %v810_v9 = vpop.f32.mrf.mxu0 }
 0x246   : > { %v3884_v16 = vpack.c.bf16 %v982_v7, %v982_v7  ;;  %v3886_v17 = vpack.c.bf16 %v809_v8, %v809_v8  ;;  %v811_v18 = vadd.f32 %v810_v9, %v3875_v1  ;;  %v3219_v39 = vpop.f32.mrf.mxu1 }
 0x247   : > { %v928_v10 = vadd.f32 %v3219_v39, %v3881_v48  ;;  %v812_v20 = vpop.f32.mrf.mxu0 }
 0x248   : > { %1063 = vst.msk [vmem:[%s3890_s20] sm:$0xf] %vm1062_vm0, %v3884_v16  ;;  %1143 = vst.msk [vmem:[%s3895_s11] sm:$0xf] %vm1062_vm0, %v3886_v17  ;;  %v983_v21 = vmul.f32 0.17677669, %v811_v18  ;;  %v813_v24 = vadd.f32 %v812_v20, %v3877_v31  ;;  %v919_v26 = vpop.f32.mrf.mxu1 }
 0x249   : > { %v3171_v46 = vpack.c.bf16 %v928_v10, %v928_v10  ;;  %v920_v27 = vadd.f32 %v919_v26, %v3881_v48  ;;  %v816_v28 = vpop.f32.mrf.mxu0 }
 0x24a   : > { %v3902_v29 = vpack.c.bf16 %v983_v21, %v983_v21  ;;  %v3904_v12 = vpack.c.bf16 %v813_v24, %v813_v24  ;;  %v817_v33 = vadd.f32 %v816_v28, %v3875_v1  ;;  %v3220_v34 = vpop.f32.mrf.mxu1 }
 0x24b   : > { %1225 = vst.msk [vmem:[%s3907_s24 + $0x8] sm:$0xf] %vm1062_vm0, %v3171_v46  ;;  %v3911_v35 = vpack.c.bf16 %v920_v27, %v920_v27  ;;  %v931_v36 = vadd.f32 %v3220_v34, %v3881_v48  ;;  %1373 = vrot.lane.b32.xlu0 %v3171_v46, %s3520_s16  ;;  %v818_v47 = vpop.f32.mrf.mxu0 }
 0x24c   : > { %1064 = vst.msk [vmem:[%s3890_s20 + $0x4] sm:$0xf] %vm1062_vm0, %v3902_v29  ;;  %1144 = vst.msk [vmem:[%s3895_s11 + $0x4] sm:$0xf] %vm1062_vm0, %v3904_v12  ;;  %v984_v57 = vmul.f32 0.17677669, %v817_v33  ;;  %v819_v37 = vadd.f32 %v818_v47, %v3877_v31  ;;  %v922_v15 = vpop.f32.mrf.mxu1 }
 0x24d   : > { %1223 = vst.msk [vmem:[%s3907_s24] sm:$0xf] %vm1062_vm0, %v3911_v35  ;;  %v3172_v22 = vpack.c.bf16 %v931_v36, %v931_v36  ;;  %v923_v40 = vadd.f32 %v922_v15, %v3881_v48  ;;  %v820_v41 = vpop.f32.mrf.mxu0 }
 0x24e   : > { %v3926_v42 = vpack.c.bf16 %v984_v57, %v984_v57  ;;  %v3928_v43 = vpack.c.bf16 %v819_v37, %v819_v37  ;;  %v821_v58 = vadd.f32 %v820_v41, %v3875_v1  ;;  %v3223_v44 = vpop.f32.mrf.mxu1 }
 0x24f   : > { %1226 = vst.msk [vmem:[%s3907_s24 + $0xc] sm:$0xf] %vm1062_vm0, %v3172_v22  ;;  %v3933_v45 = vpack.c.bf16 %v923_v40, %v923_v40  ;;  %v944_v3 = vadd.f32 %v3223_v44, %v3881_v48  ;;  %1568 = vrot.lane.b32.xlu0 %v3171_v46, %s3521_s3  ;;  %1375 = vrot.lane.b32.xlu1 %v3172_v22, %s3520_s16  ;;  %v822_v49 = vpop.f32.mrf.mxu0 }
 0x250   : > { %1065 = vst.msk [vmem:[%s3890_s20 + $0x8] sm:$0xf] %vm1062_vm0, %v3926_v42  ;;  %1145 = vst.msk [vmem:[%s3895_s11 + $0x8] sm:$0xf] %vm1062_vm0, %v3928_v43  ;;  %v985_v50 = vmul.f32 0.17677669, %v821_v58  ;;  %v823_v51 = vadd.f32 %v822_v49, %v3877_v31  ;;  %v935_v52 = vpop.f32.mrf.mxu1 }
 0x251   : > { %1224 = vst.msk [vmem:[%s3907_s24 + $0x4] sm:$0xf] %vm1062_vm0, %v3933_v45  ;;  %v3948_v53 = vpack.c.bf16 %v944_v3, %v944_v3  ;;  %v936_v4 = vadd.f32 %v935_v52, %v3881_v48  ;;  %v826_v11 = vpop.f32.mrf.mxu0 }
 0x252   : > { %v3951_v30 = vpack.c.bf16 %v985_v50, %v985_v50  ;;  %v3953_v54 = vpack.c.bf16 %v823_v51, %v823_v51  ;;  %v827_v55 = vadd.f32 %v826_v11, %v3875_v1  ;;  %v3224_v23 = vpop.f32.mrf.mxu1 }
 0x253   : > { %1229 = vst.msk [vmem:[%s3907_s24 + $0x18] sm:$0xf] %vm1062_vm0, %v3948_v53  ;;  %v3959_v56 = vpack.c.bf16 %v936_v4, %v936_v4  ;;  %v947_v59 = vadd.f32 %v3224_v23, %v3881_v48  ;;  %1763 = vrot.lane.b32.xlu0 %v3171_v46, %s3522_s21  ;;  %1570 = vrot.lane.b32.xlu1 %v3172_v22, %s3521_s3  ;;  %v828_v19 = vpop.f32.mrf.mxu0 }
 0x254   : > { %1066 = vst.msk [vmem:[%s3890_s20 + $0xc] sm:$0xf] %vm1062_vm0, %v3951_v30  ;;  %1146 = vst.msk [vmem:[%s3895_s11 + $0xc] sm:$0xf] %vm1062_vm0, %v3953_v54  ;;  %v986_v60 = vmul.f32 0.17677669, %v827_v55  ;;  %v829_v13 = vadd.f32 %v828_v19, %v3877_v31  ;;  %v938_v61 = vpop.f32.mrf.mxu1 }
 0x255   : > { %1227 = vst.msk [vmem:[%s3907_s24 + $0x10] sm:$0xf] %vm1062_vm0, %v3959_v56  ;;  %v3974_v62 = vpack.c.bf16 %v947_v59, %v947_v59  ;;  %v939_v32 = vadd.f32 %v938_v61, %v3881_v48  ;;  %v830_v25 = vpop.f32.mrf.mxu0 }
 0x256   : > { %v3977_v63 = vpack.c.bf16 %v986_v60, %v986_v60  ;;  %v3979_v14 = vpack.c.bf16 %v829_v13, %v829_v13  ;;  %v831_v0 = vadd.f32 %v830_v25, %v3875_v1  ;;  %v3227_v2 = vpop.f32.mrf.mxu1 }
 0x257   : > { %1230 = vst.msk [vmem:[%s3907_s24 + $0x1c] sm:$0xf] %vm1062_vm0, %v3974_v62  ;;  %v3985_v5 = vpack.c.bf16 %v939_v32, %v939_v32  ;;  %v960_v6 = vadd.f32 %v3227_v2, %v3881_v48  ;;  %1239 = vrot.lane.b32.xlu0 %v3884_v16, %s3520_s16  ;;  %1765 = vrot.lane.b32.xlu1 %v3172_v22, %s3522_s21  ;;  %v832_v38 = vpop.f32.mrf.mxu0 }
 0x258   : > { %1067 = vst.msk [vmem:[%s3890_s20 + $0x10] sm:$0xf] %vm1062_vm0, %v3977_v63  ;;  %1147 = vst.msk [vmem:[%s3895_s11 + $0x10] sm:$0xf] %vm1062_vm0, %v3979_v14  ;;  %v987_v7 = vmul.f32 0.17677669, %v831_v0  ;;  %v833_v8 = vadd.f32 %v832_v38, %v3877_v31  ;;  %v951_v9 = vpop.f32.mrf.mxu1 }
 0x259   : > { %1228 = vst.msk [vmem:[%s3907_s24 + $0x14] sm:$0xf] %vm1062_vm0, %v3985_v5  ;;  %v4001_v18 = vpack.c.bf16 %v960_v6, %v960_v6  ;;  %v952_v39 = vadd.f32 %v951_v9, %v3881_v48  ;;  %v836_v10 = vpop.f32.mrf.mxu0 }
 0x25a   : > { %v4004_v20 = vpack.c.bf16 %v987_v7, %v987_v7  ;;  %v4006_v21 = vpack.c.bf16 %v833_v8, %v833_v8  ;;  %v837_v24 = vadd.f32 %v836_v10, %v3875_v1  ;;  %v3228_v26 = vpop.f32.mrf.mxu1 }
 0x25b   : > { %1233 = vst.msk [vmem:[%s3907_s24 + $0x28] sm:$0xf] %vm1062_vm0, %v4001_v18  ;;  %v4012_v46 = vpack.c.bf16 %v952_v39, %v952_v39  ;;  %v963_v27 = vadd.f32 %v3228_v26, %v3881_v48  ;;  %1304 = vrot.lane.b32.xlu0 %v3886_v17, %s3520_s16  ;;  %1241 = vrot.lane.b32.xlu1 %v3902_v29, %s3520_s16  ;;  %v838_v28 = vpop.f32.mrf.mxu0 }
 0x25c   : > { %1068 = vst.msk [vmem:[%s3890_s20 + $0x14] sm:$0xf] %vm1062_vm0, %v4004_v20  ;;  %1148 = vst.msk [vmem:[%s3895_s11 + $0x14] sm:$0xf] %vm1062_vm0, %v4006_v21  ;;  %v988_v33 = vmul.f32 0.17677669, %v837_v24  ;;  %v839_v34 = vadd.f32 %v838_v28, %v3877_v31  ;;  %v954_v36 = vpop.f32.mrf.mxu1 }
 0x25d   : > { %1231 = vst.msk [vmem:[%s3907_s24 + $0x20] sm:$0xf] %vm1062_vm0, %v4012_v46  ;;  %v4029_v47 = vpack.c.bf16 %v963_v27, %v963_v27  ;;  %v955_v57 = vadd.f32 %v954_v36, %v3881_v48  ;;  %v840_v37 = vpop.f32.mrf.mxu0 }
 0x25e   : > { %v4032_v15 = vpack.c.bf16 %v988_v33, %v988_v33  ;;  %v4034_v22 = vpack.c.bf16 %v839_v34, %v839_v34  ;;  %v841_v40 = vadd.f32 %v840_v37, %v3875_v1  ;;  %v3231_v41 = vpop.f32.mrf.mxu1 }
 0x25f   : > { %1234 = vst.msk [vmem:[%s3907_s24 + $0x2c] sm:$0xf] %vm1062_vm0, %v4029_v47  ;;  %v4040_v58 = vpack.c.bf16 %v955_v57, %v955_v57  ;;  %v976_v44 = vadd.f32 %v3231_v41, %v3881_v48  ;;  %1434 = vrot.lane.b32.xlu0 %v3884_v16, %s3521_s3  ;;  %1306 = vrot.lane.b32.xlu1 %v3904_v12, %s3520_s16  ;;  %v842_v3 = vpop.f32.mrf.mxu0 }
 0x260   : > { %1069 = vst.msk [vmem:[%s3890_s20 + $0x18] sm:$0xf] %vm1062_vm0, %v4032_v15  ;;  %1149 = vst.msk [vmem:[%s3895_s11 + $0x18] sm:$0xf] %vm1062_vm0, %v4034_v22  ;;  %v989_v49 = vmul.f32 0.17677669, %v841_v40  ;;  %v843_v50 = vadd.f32 %v842_v3, %v3877_v31  ;;  %v967_v51 = vpop.f32.mrf.mxu1 }
 0x261   : > { %1232 = vst.msk [vmem:[%s3907_s24 + $0x24] sm:$0xf] %vm1062_vm0, %v4040_v58  ;;  %v4057_v52 = vpack.c.bf16 %v976_v44, %v976_v44  ;;  %v968_v4 = vadd.f32 %v967_v51, %v3881_v48  ;;  %v846_v11 = vpop.f32.mrf.mxu0 }
 0x262   : > { %v4060_v55 = vpack.c.bf16 %v989_v49, %v989_v49  ;;  %v4062_v23 = vpack.c.bf16 %v843_v50, %v843_v50  ;;  %v847_v59 = vadd.f32 %v846_v11, %v3875_v1  ;;  %v3232_v19 = vpop.f32.mrf.mxu1 }
 0x263   : > { %1237 = vst.msk [vmem:[%s3907_s24 + $0x38] sm:$0xf] %vm1062_vm0, %v4057_v52  ;;  %v4068_v60 = vpack.c.bf16 %v968_v4, %v968_v4  ;;  %v979_v13 = vadd.f32 %v3232_v19, %v3881_v48  ;;  %1499 = vrot.lane.b32.xlu0 %v3886_v17, %s3521_s3  ;;  %1436 = vrot.lane.b32.xlu1 %v3902_v29, %s3521_s3  ;;  %v848_v61 = vpop.f32.mrf.mxu0 }
 0x264   : > { %1070 = vst.msk [vmem:[%s3890_s20 + $0x1c] sm:$0xf] %vm1062_vm0, %v4060_v55  ;;  %1150 = vst.msk [vmem:[%s3895_s11 + $0x1c] sm:$0xf] %vm1062_vm0, %v4062_v23  ;;  %v990_v32 = vmul.f32 0.17677669, %v847_v59  ;;  %v849_v25 = vadd.f32 %v848_v61, %v3877_v31  ;;  %v970_v0 = vpop.f32.mrf.mxu1 }
 0x265   : > { %1235 = vst.msk [vmem:[%s3907_s24 + $0x30] sm:$0xf] %vm1062_vm0, %v4068_v60  ;;  %v4085_v2 = vpack.c.bf16 %v979_v13, %v979_v13  ;;  %v971_v6 = vadd.f32 %v970_v0, %v3881_v48  ;;  %v850_v38 = vpop.f32.mrf.mxu0 }
 0x266   : > { %v4088_v7 = vpack.c.bf16 %v990_v32, %v990_v32  ;;  %v4090_v8 = vpack.c.bf16 %v849_v25, %v849_v25  ;;  %v851_v9 = vadd.f32 %v850_v38, %v3875_v1 }
 0x267   : > { %1238 = vst.msk [vmem:[%s3907_s24 + $0x3c] sm:$0xf] %vm1062_vm0, %v4085_v2  ;;  %v4096_v39 = vpack.c.bf16 %v971_v6, %v971_v6  ;;  %1629 = vrot.lane.b32.xlu0 %v3884_v16, %s3522_s21  ;;  %1501 = vrot.lane.b32.xlu1 %v3904_v12, %s3521_s3  ;;  %v852_v48 = vpop.f32.mrf.mxu0 }
 0x268   : > { %1071 = vst.msk [vmem:[%s3890_s20 + $0x20] sm:$0xf] %vm1062_vm0, %v4088_v7  ;;  %1151 = vst.msk [vmem:[%s3895_s11 + $0x20] sm:$0xf] %vm1062_vm0, %v4090_v8  ;;  %v991_v10 = vmul.f32 0.17677669, %v851_v9  ;;  %v853_v24 = vadd.f32 %v852_v48, %v3877_v31 }
 0x269   : > { %1236 = vst.msk [vmem:[%s3907_s24 + $0x34] sm:$0xf] %vm1062_vm0, %v4096_v39  ;;  %v856_v26 = vpop.f32.mrf.mxu0 }
 0x26a   : > { %v4112_v27 = vpack.c.bf16 %v991_v10, %v991_v10  ;;  %v4114_v16 = vpack.c.bf16 %v853_v24, %v853_v24  ;;  %v857_v28 = vadd.f32 %v856_v26, %v3875_v1 }
 0x26b   : > { %1694 = vrot.lane.b32.xlu0 %v3886_v17, %s3522_s21  ;;  %1631 = vrot.lane.b32.xlu1 %v3902_v29, %s3522_s21  ;;  %v858_v33 = vpop.f32.mrf.mxu0 }
 0x26c   : > { %1072 = vst.msk [vmem:[%s3890_s20 + $0x24] sm:$0xf] %vm1062_vm0, %v4112_v27  ;;  %1152 = vst.msk [vmem:[%s3895_s11 + $0x24] sm:$0xf] %vm1062_vm0, %v4114_v16  ;;  %v992_v34 = vmul.f32 0.17677669, %v857_v28  ;;  %v859_v36 = vadd.f32 %v858_v33, %v3877_v31 }
 0x26d   : > { %v860_v57 = vpop.f32.mrf.mxu0 }
 0x26e   : > { %v4128_v37 = vpack.c.bf16 %v992_v34, %v992_v34  ;;  %v4130_v40 = vpack.c.bf16 %v859_v36, %v859_v36  ;;  %v861_v17 = vadd.f32 %v860_v57, %v3875_v1 }
 0x26f   : > { %1696 = vrot.lane.b32.xlu1 %v3904_v12, %s3522_s21  ;;  %1369 = vrot.lane.b32.xlu0 %v3911_v35, %s3520_s16  ;;  %v862_v29 = vpop.f32.mrf.mxu0 }
 0x270   : > { %1073 = vst.msk [vmem:[%s3890_s20 + $0x28] sm:$0xf] %vm1062_vm0, %v4128_v37  ;;  %1153 = vst.msk [vmem:[%s3895_s11 + $0x28] sm:$0xf] %vm1062_vm0, %v4130_v40  ;;  %v993_v41 = vmul.f32 0.17677669, %v861_v17  ;;  %v863_v44 = vadd.f32 %v862_v29, %v3877_v31 }
 0x271   : > { %v866_v3 = vpop.f32.mrf.mxu0 }
 0x272   : > { %v4144_v49 = vpack.c.bf16 %v993_v41, %v993_v41  ;;  %v4146_v50 = vpack.c.bf16 %v863_v44, %v863_v44  ;;  %v867_v12 = vadd.f32 %v866_v3, %v3875_v1 }
 0x273   : > { %1371 = vrot.lane.b32.xlu1 %v3933_v45, %s3520_s16  ;;  %1564 = vrot.lane.b32.xlu0 %v3911_v35, %s3521_s3  ;;  %v868_v51 = vpop.f32.mrf.mxu0 }
 0x274   : > { %1074 = vst.msk [vmem:[%s3890_s20 + $0x2c] sm:$0xf] %vm1062_vm0, %v4144_v49  ;;  %1154 = vst.msk [vmem:[%s3895_s11 + $0x2c] sm:$0xf] %vm1062_vm0, %v4146_v50  ;;  %v994_v4 = vmul.f32 0.17677669, %v867_v12  ;;  %v869_v11 = vadd.f32 %v868_v51, %v3877_v31 }
 0x275   : > { %v870_v59 = vpop.f32.mrf.mxu0 }
 0x276   : > { %v4160_v19 = vpack.c.bf16 %v994_v4, %v994_v4  ;;  %v4162_v13 = vpack.c.bf16 %v869_v11, %v869_v11  ;;  %v871_v61 = vadd.f32 %v870_v59, %v3875_v1 }
 0x277   : > { %1566 = vrot.lane.b32.xlu1 %v3933_v45, %s3521_s3  ;;  %1759 = vrot.lane.b32.xlu0 %v3911_v35, %s3522_s21  ;;  %v872_v32 = vpop.f32.mrf.mxu0 }
 0x278   : > { %1075 = vst.msk [vmem:[%s3890_s20 + $0x30] sm:$0xf] %vm1062_vm0, %v4160_v19  ;;  %1155 = vst.msk [vmem:[%s3895_s11 + $0x30] sm:$0xf] %vm1062_vm0, %v4162_v13  ;;  %v995_v25 = vmul.f32 0.17677669, %v871_v61  ;;  %v873_v0 = vadd.f32 %v872_v32, %v3877_v31 }
 0x279   : > { %v876_v6 = vpop.f32.mrf.mxu0 }
 0x27a   : > { %v4176_v38 = vpack.c.bf16 %v995_v25, %v995_v25  ;;  %v4178_v9 = vpack.c.bf16 %v873_v0, %v873_v0  ;;  %v877_v48 = vadd.f32 %v876_v6, %v3875_v1 }
 0x27b   : > { %1761 = vrot.lane.b32.xlu1 %v3933_v45, %s3522_s21  ;;  %1381 = vrot.lane.b32.xlu0 %v3948_v53, %s3520_s16  ;;  %v878_v35 = vpop.f32.mrf.mxu0 }
 0x27c   : > { %1076 = vst.msk [vmem:[%s3890_s20 + $0x34] sm:$0xf] %vm1062_vm0, %v4176_v38  ;;  %1156 = vst.msk [vmem:[%s3895_s11 + $0x34] sm:$0xf] %vm1062_vm0, %v4178_v9  ;;  %v996_v10 = vmul.f32 0.17677669, %v877_v48  ;;  %v879_v24 = vadd.f32 %v878_v35, %v3877_v31 }
 0x27d   : > { %v880_v26 = vpop.f32.mrf.mxu0 }
 0x27e   : > { %v4192_v28 = vpack.c.bf16 %v996_v10, %v996_v10  ;;  %v4194_v33 = vpack.c.bf16 %v879_v24, %v879_v24  ;;  %v881_v45 = vadd.f32 %v880_v26, %v3875_v1 }
 0x27f   : > { %1243 = vrot.lane.b32.xlu1 %v3926_v42, %s3520_s16  ;;  %1576 = vrot.lane.b32.xlu0 %v3948_v53, %s3521_s3  ;;  %v882_v34 = vpop.f32.mrf.mxu0 }
 0x280   : > { %1077 = vst.msk [vmem:[%s3890_s20 + $0x38] sm:$0xf] %vm1062_vm0, %v4192_v28  ;;  %1157 = vst.msk [vmem:[%s3895_s11 + $0x38] sm:$0xf] %vm1062_vm0, %v4194_v33  ;;  %v997_v36 = vmul.f32 0.17677669, %v881_v45  ;;  %v883_v57 = vadd.f32 %v882_v34, %v3877_v31 }
 0x282   : > { %v4208_v17 = vpack.c.bf16 %v997_v36, %v997_v36  ;;  %v4210_v29 = vpack.c.bf16 %v883_v57, %v883_v57 }
 0x283   : > { %1771 = vrot.lane.b32.xlu0 %v3948_v53, %s3522_s21  ;;  %1383 = vrot.lane.b32.xlu1 %v3974_v62, %s3520_s16 }
 0x284   : > { %1078 = vst.msk [vmem:[%s3890_s20 + $0x3c] sm:$0xf] %vm1062_vm0, %v4208_v17  ;;  %1158 = vst.msk [vmem:[%s3895_s11 + $0x3c] sm:$0xf] %vm1062_vm0, %v4210_v29 }
 0x287   : > { %1308 = vrot.lane.b32.xlu0 %v3928_v43, %s3520_s16  ;;  %1578 = vrot.lane.b32.xlu1 %v3974_v62, %s3521_s3 }
 0x28b   : > { %1438 = vrot.lane.b32.xlu0 %v3926_v42, %s3521_s3  ;;  %1773 = vrot.lane.b32.xlu1 %v3974_v62, %s3522_s21 }
 0x28f   : > { %1503 = vrot.lane.b32.xlu0 %v3928_v43, %s3521_s3  ;;  %1245 = vrot.lane.b32.xlu1 %v3951_v30, %s3520_s16 }
 0x293   : > { %1633 = vrot.lane.b32.xlu0 %v3926_v42, %s3522_s21  ;;  %1310 = vrot.lane.b32.xlu1 %v3953_v54, %s3520_s16 }
 0x297   : > { %1698 = vrot.lane.b32.xlu0 %v3928_v43, %s3522_s21  ;;  %1440 = vrot.lane.b32.xlu1 %v3951_v30, %s3521_s3 }
 0x29b   : > { %1505 = vrot.lane.b32.xlu1 %v3953_v54, %s3521_s3  ;;  %1377 = vrot.lane.b32.xlu0 %v3959_v56, %s3520_s16 }
 0x29f   : > { %1635 = vrot.lane.b32.xlu1 %v3951_v30, %s3522_s21  ;;  %1572 = vrot.lane.b32.xlu0 %v3959_v56, %s3521_s3 }
 0x2a3   : > { %1700 = vrot.lane.b32.xlu1 %v3953_v54, %s3522_s21  ;;  %1767 = vrot.lane.b32.xlu0 %v3959_v56, %s3522_s21 }
 0x2a7   : > { %1379 = vrot.lane.b32.xlu1 %v3985_v5, %s3520_s16  ;;  %1389 = vrot.lane.b32.xlu0 %v4001_v18, %s3520_s16 }
 0x2ab   : > { %1574 = vrot.lane.b32.xlu1 %v3985_v5, %s3521_s3  ;;  %1584 = vrot.lane.b32.xlu0 %v4001_v18, %s3521_s3 }
 0x2af   : > { %1769 = vrot.lane.b32.xlu1 %v3985_v5, %s3522_s21  ;;  %1779 = vrot.lane.b32.xlu0 %v4001_v18, %s3522_s21 }
 0x2b3   : > { %1247 = vrot.lane.b32.xlu0 %v3977_v63, %s3520_s16  ;;  %1391 = vrot.lane.b32.xlu1 %v4029_v47, %s3520_s16 }
 0x2b7   : > { %1312 = vrot.lane.b32.xlu0 %v3979_v14, %s3520_s16  ;;  %1586 = vrot.lane.b32.xlu1 %v4029_v47, %s3521_s3 }
 0x2bb   : > { %1442 = vrot.lane.b32.xlu0 %v3977_v63, %s3521_s3  ;;  %1781 = vrot.lane.b32.xlu1 %v4029_v47, %s3522_s21 }
 0x2bd   : > { %v1374_v1 = vpop.permute.xlu0 %1373 }
 0x2be   : > { %3013 = vst.msk [vmem:[%s3907_s24 + $0x48] sm:$0xf] %vm1062_vm0, %v1374_v1 }
 0x2bf   : > { %1507 = vrot.lane.b32.xlu0 %v3979_v14, %s3521_s3  ;;  %1249 = vrot.lane.b32.xlu1 %v4004_v20, %s3520_s16 }
 0x2c1   : > { %v1376_v31 = vpop.permute.xlu1 %1375  ;;  %v1569_v42 = vpop.permute.xlu0 %1568 }
 0x2c2   : > { %3014 = vst.msk [vmem:[%s3907_s24 + $0x4c] sm:$0xf] %vm1062_vm0, %v1376_v31  ;;  %3061 = vst.msk [vmem:[%s3907_s24 + $0x88] sm:$0xf] %vm1062_vm0, %v1569_v42 }
 0x2c3   : > { %1637 = vrot.lane.b32.xlu0 %v3977_v63, %s3522_s21  ;;  %1314 = vrot.lane.b32.xlu1 %v4006_v21, %s3520_s16 }
 0x2c5   : > { %v1571_v43 = vpop.permute.xlu1 %1570  ;;  %v1764_v53 = vpop.permute.xlu0 %1763 }
 0x2c6   : > { %3062 = vst.msk [vmem:[%s3907_s24 + $0x8c] sm:$0xf] %vm1062_vm0, %v1571_v43  ;;  %3109 = vst.msk [vmem:[%s3907_s24 + $0xc8] sm:$0xf] %vm1062_vm0, %v1764_v53 }
 0x2c7   : > { %1702 = vrot.lane.b32.xlu0 %v3979_v14, %s3522_s21  ;;  %1444 = vrot.lane.b32.xlu1 %v4004_v20, %s3521_s3 }
 0x2c9   : > { %v1766_v30 = vpop.permute.xlu1 %1765  ;;  %v1240_v54 = vpop.permute.xlu0 %1239 }
 0x2ca   : > { %3110 = vst.msk [vmem:[%s3907_s24 + $0xcc] sm:$0xf] %vm1062_vm0, %v1766_v30  ;;  %2979 = vst.msk [vmem:[%s3890_s20 + $0x40] sm:$0xf] %vm1062_vm0, %v1240_v54 }
 0x2cb   : > { %1509 = vrot.lane.b32.xlu1 %v4006_v21, %s3521_s3  ;;  %1385 = vrot.lane.b32.xlu0 %v4012_v46, %s3520_s16 }
 0x2cd   : > { %v1242_v56 = vpop.permute.xlu1 %1241  ;;  %v1305_v62 = vpop.permute.xlu0 %1304 }
 0x2ce   : > { %2980 = vst.msk [vmem:[%s3890_s20 + $0x44] sm:$0xf] %vm1062_vm0, %v1242_v56  ;;  %2995 = vst.msk [vmem:[%s3895_s11 + $0x40] sm:$0xf] %vm1062_vm0, %v1305_v62 }
 0x2cf   : > { %1639 = vrot.lane.b32.xlu1 %v4004_v20, %s3522_s21  ;;  %1580 = vrot.lane.b32.xlu0 %v4012_v46, %s3521_s3 }
 0x2d1   : > { %v1307_v63 = vpop.permute.xlu1 %1306  ;;  %v1435_v14 = vpop.permute.xlu0 %1434 }
 0x2d2   : > { %2996 = vst.msk [vmem:[%s3895_s11 + $0x44] sm:$0xf] %vm1062_vm0, %v1307_v63  ;;  %3027 = vst.msk [vmem:[%s3890_s20 + $0x80] sm:$0xf] %vm1062_vm0, %v1435_v14 }
 0x2d3   : > { %1704 = vrot.lane.b32.xlu1 %v4006_v21, %s3522_s21  ;;  %1775 = vrot.lane.b32.xlu0 %v4012_v46, %s3522_s21 }
 0x2d5   : > { %v1437_v5 = vpop.permute.xlu1 %1436  ;;  %v1500_v18 = vpop.permute.xlu0 %1499 }
 0x2d6   : > { %3028 = vst.msk [vmem:[%s3890_s20 + $0x84] sm:$0xf] %vm1062_vm0, %v1437_v5  ;;  %3043 = vst.msk [vmem:[%s3895_s11 + $0x80] sm:$0xf] %vm1062_vm0, %v1500_v18 }
 0x2d7   : > { %1387 = vrot.lane.b32.xlu1 %v4040_v58, %s3520_s16  ;;  %1397 = vrot.lane.b32.xlu0 %v4057_v52, %s3520_s16 }
 0x2d9   : > { %v1502_v20 = vpop.permute.xlu1 %1501  ;;  %v1630_v21 = vpop.permute.xlu0 %1629 }
 0x2da   : > { %3044 = vst.msk [vmem:[%s3895_s11 + $0x84] sm:$0xf] %vm1062_vm0, %v1502_v20  ;;  %3075 = vst.msk [vmem:[%s3890_s20 + $0xc0] sm:$0xf] %vm1062_vm0, %v1630_v21 }
 0x2db   : > { %1582 = vrot.lane.b32.xlu1 %v4040_v58, %s3521_s3  ;;  %1592 = vrot.lane.b32.xlu0 %v4057_v52, %s3521_s3 }
 0x2dd   : > { %v1632_v46 = vpop.permute.xlu1 %1631  ;;  %v1695_v47 = vpop.permute.xlu0 %1694 }
 0x2de   : > { %3076 = vst.msk [vmem:[%s3890_s20 + $0xc4] sm:$0xf] %vm1062_vm0, %v1632_v46  ;;  %3091 = vst.msk [vmem:[%s3895_s11 + $0xc0] sm:$0xf] %vm1062_vm0, %v1695_v47 }
 0x2df   : > { %1777 = vrot.lane.b32.xlu1 %v4040_v58, %s3522_s21  ;;  %1251 = vrot.lane.b32.xlu0 %v4032_v15, %s3520_s16 }
 0x2e1   : > { %v1697_v41 = vpop.permute.xlu1 %1696  ;;  %v1370_v44 = vpop.permute.xlu0 %1369 }
 0x2e2   : > { %3092 = vst.msk [vmem:[%s3895_s11 + $0xc4] sm:$0xf] %vm1062_vm0, %v1697_v41  ;;  %3011 = vst.msk [vmem:[%s3907_s24 + $0x40] sm:$0xf] %vm1062_vm0, %v1370_v44 }
 0x2e3   : > { %1316 = vrot.lane.b32.xlu0 %v4034_v22, %s3520_s16  ;;  %1399 = vrot.lane.b32.xlu1 %v4085_v2, %s3520_s16 }
 0x2e5   : > { %v1372_v58 = vpop.permute.xlu1 %1371  ;;  %v1565_v3 = vpop.permute.xlu0 %1564 }
 0x2e6   : > { %3012 = vst.msk [vmem:[%s3907_s24 + $0x44] sm:$0xf] %vm1062_vm0, %v1372_v58  ;;  %3059 = vst.msk [vmem:[%s3907_s24 + $0x80] sm:$0xf] %vm1062_vm0, %v1565_v3 }
 0x2e7   : > { %1446 = vrot.lane.b32.xlu0 %v4032_v15, %s3521_s3  ;;  %1594 = vrot.lane.b32.xlu1 %v4085_v2, %s3521_s3 }
 0x2e9   : > { %v1567_v12 = vpop.permute.xlu1 %1566  ;;  %v1760_v51 = vpop.permute.xlu0 %1759 }
 0x2ea   : > { %3060 = vst.msk [vmem:[%s3907_s24 + $0x84] sm:$0xf] %vm1062_vm0, %v1567_v12  ;;  %3107 = vst.msk [vmem:[%s3907_s24 + $0xc0] sm:$0xf] %vm1062_vm0, %v1760_v51 }
 0x2eb   : > { %1511 = vrot.lane.b32.xlu0 %v4034_v22, %s3521_s3  ;;  %1253 = vrot.lane.b32.xlu1 %v4060_v55, %s3520_s16 }
 0x2ed   : > { %v1762_v4 = vpop.permute.xlu1 %1761  ;;  %v1382_v11 = vpop.permute.xlu0 %1381 }
 0x2ee   : > { %3108 = vst.msk [vmem:[%s3907_s24 + $0xc4] sm:$0xf] %vm1062_vm0, %v1762_v4  ;;  %3017 = vst.msk [vmem:[%s3907_s24 + $0x58] sm:$0xf] %vm1062_vm0, %v1382_v11 }
 0x2ef   : > { %1641 = vrot.lane.b32.xlu0 %v4032_v15, %s3522_s21  ;;  %1318 = vrot.lane.b32.xlu1 %v4062_v23, %s3520_s16 }
 0x2f1   : > { %v1244_v59 = vpop.permute.xlu1 %1243  ;;  %v1577_v61 = vpop.permute.xlu0 %1576 }
 0x2f2   : > { %2981 = vst.msk [vmem:[%s3890_s20 + $0x48] sm:$0xf] %vm1062_vm0, %v1244_v59  ;;  %3065 = vst.msk [vmem:[%s3907_s24 + $0x98] sm:$0xf] %vm1062_vm0, %v1577_v61 }
 0x2f3   : > { %1706 = vrot.lane.b32.xlu0 %v4034_v22, %s3522_s21  ;;  %1448 = vrot.lane.b32.xlu1 %v4060_v55, %s3521_s3 }
 0x2f5   : > { %v1384_v15 = vpop.permute.xlu1 %1383  ;;  %v1772_v32 = vpop.permute.xlu0 %1771 }
 0x2f6   : > { %3018 = vst.msk [vmem:[%s3907_s24 + $0x5c] sm:$0xf] %vm1062_vm0, %v1384_v15  ;;  %3113 = vst.msk [vmem:[%s3907_s24 + $0xd8] sm:$0xf] %vm1062_vm0, %v1772_v32 }
 0x2f7   : > { %1513 = vrot.lane.b32.xlu1 %v4062_v23, %s3521_s3  ;;  %1393 = vrot.lane.b32.xlu0 %v4068_v60, %s3520_s16 }
 0x2f9   : > { %v1579_v22 = vpop.permute.xlu1 %1578  ;;  %v1309_v25 = vpop.permute.xlu0 %1308 }
 0x2fa   : > { %3066 = vst.msk [vmem:[%s3907_s24 + $0x9c] sm:$0xf] %vm1062_vm0, %v1579_v22  ;;  %2997 = vst.msk [vmem:[%s3895_s11 + $0x48] sm:$0xf] %vm1062_vm0, %v1309_v25 }
 0x2fb   : > { %1643 = vrot.lane.b32.xlu1 %v4060_v55, %s3522_s21  ;;  %1588 = vrot.lane.b32.xlu0 %v4068_v60, %s3521_s3 }
 0x2fd   : > { %v1774_v0 = vpop.permute.xlu1 %1773  ;;  %v1439_v6 = vpop.permute.xlu0 %1438 }
 0x2fe   : > { %3114 = vst.msk [vmem:[%s3907_s24 + $0xdc] sm:$0xf] %vm1062_vm0, %v1774_v0  ;;  %3029 = vst.msk [vmem:[%s3890_s20 + $0x88] sm:$0xf] %vm1062_vm0, %v1439_v6 }
 0x2ff   : > { %1708 = vrot.lane.b32.xlu1 %v4062_v23, %s3522_s21  ;;  %1783 = vrot.lane.b32.xlu0 %v4068_v60, %s3522_s21 }
 0x301   : > { %v1246_v55 = vpop.permute.xlu1 %1245  ;;  %v1504_v48 = vpop.permute.xlu0 %1503 }
 0x302   : > { %2982 = vst.msk [vmem:[%s3890_s20 + $0x4c] sm:$0xf] %vm1062_vm0, %v1246_v55  ;;  %3045 = vst.msk [vmem:[%s3895_s11 + $0x88] sm:$0xf] %vm1062_vm0, %v1504_v48 }
 0x303   : > { %1395 = vrot.lane.b32.xlu1 %v4096_v39, %s3520_s16  ;;  %1255 = vrot.lane.b32.xlu0 %v4088_v7, %s3520_s16 }
 0x305   : > { %v1311_v23 = vpop.permute.xlu1 %1310  ;;  %v1634_v35 = vpop.permute.xlu0 %1633 }
 0x306   : > { %2998 = vst.msk [vmem:[%s3895_s11 + $0x4c] sm:$0xf] %vm1062_vm0, %v1311_v23  ;;  %3077 = vst.msk [vmem:[%s3890_s20 + $0xc8] sm:$0xf] %vm1062_vm0, %v1634_v35 }
 0x307   : > { %1590 = vrot.lane.b32.xlu1 %v4096_v39, %s3521_s3  ;;  %1320 = vrot.lane.b32.xlu0 %v4090_v8, %s3520_s16 }
 0x309   : > { %v1441_v60 = vpop.permute.xlu1 %1440  ;;  %v1699_v10 = vpop.permute.xlu0 %1698 }
 0x30a   : > { %3030 = vst.msk [vmem:[%s3890_s20 + $0x8c] sm:$0xf] %vm1062_vm0, %v1441_v60  ;;  %3093 = vst.msk [vmem:[%s3895_s11 + $0xc8] sm:$0xf] %vm1062_vm0, %v1699_v10 }
 0x30b   : > { %1785 = vrot.lane.b32.xlu1 %v4096_v39, %s3522_s21  ;;  %1450 = vrot.lane.b32.xlu0 %v4088_v7, %s3521_s3 }
 0x30d   : > { %v1506_v24 = vpop.permute.xlu1 %1505  ;;  %v1378_v26 = vpop.permute.xlu0 %1377 }
 0x30e   : > { %3046 = vst.msk [vmem:[%s3895_s11 + $0x8c] sm:$0xf] %vm1062_vm0, %v1506_v24  ;;  %3015 = vst.msk [vmem:[%s3907_s24 + $0x50] sm:$0xf] %vm1062_vm0, %v1378_v26 }
 0x30f   : > { %1257 = vrot.lane.b32.xlu1 %v4112_v27, %s3520_s16  ;;  %1515 = vrot.lane.b32.xlu0 %v4090_v8, %s3521_s3 }
 0x311   : > { %v1636_v39 = vpop.permute.xlu1 %1635  ;;  %v1573_v45 = vpop.permute.xlu0 %1572 }
 0x312   : > { %3078 = vst.msk [vmem:[%s3890_s20 + $0xcc] sm:$0xf] %vm1062_vm0, %v1636_v39  ;;  %3063 = vst.msk [vmem:[%s3907_s24 + $0x90] sm:$0xf] %vm1062_vm0, %v1573_v45 }
 0x313   : > { %1322 = vrot.lane.b32.xlu1 %v4114_v16, %s3520_s16  ;;  %1645 = vrot.lane.b32.xlu0 %v4088_v7, %s3522_s21 }
 0x315   : > { %v1701_v34 = vpop.permute.xlu1 %1700  ;;  %v1768_v36 = vpop.permute.xlu0 %1767 }
 0x316   : > { %3094 = vst.msk [vmem:[%s3895_s11 + $0xcc] sm:$0xf] %vm1062_vm0, %v1701_v34  ;;  %3111 = vst.msk [vmem:[%s3907_s24 + $0xd0] sm:$0xf] %vm1062_vm0, %v1768_v36 }
 0x317   : > { %1452 = vrot.lane.b32.xlu1 %v4112_v27, %s3521_s3  ;;  %1710 = vrot.lane.b32.xlu0 %v4090_v8, %s3522_s21 }
 0x319   : > { %v1380_v57 = vpop.permute.xlu1 %1379  ;;  %v1390_v1 = vpop.permute.xlu0 %1389 }
 0x31a   : > { %3016 = vst.msk [vmem:[%s3907_s24 + $0x54] sm:$0xf] %vm1062_vm0, %v1380_v57  ;;  %3021 = vst.msk [vmem:[%s3907_s24 + $0x68] sm:$0xf] %vm1062_vm0, %v1390_v1 }
 0x31b   : > { %1517 = vrot.lane.b32.xlu1 %v4114_v16, %s3521_s3  ;;  %1259 = vrot.lane.b32.xlu0 %v4128_v37, %s3520_s16 }
 0x31d   : > { %v1575_v7 = vpop.permute.xlu1 %1574  ;;  %v1585_v31 = vpop.permute.xlu0 %1584 }
 0x31e   : > { %3064 = vst.msk [vmem:[%s3907_s24 + $0x94] sm:$0xf] %vm1062_vm0, %v1575_v7  ;;  %3069 = vst.msk [vmem:[%s3907_s24 + $0xa8] sm:$0xf] %vm1062_vm0, %v1585_v31 }
 0x31f   : > { %1647 = vrot.lane.b32.xlu1 %v4112_v27, %s3522_s21  ;;  %1324 = vrot.lane.b32.xlu0 %v4130_v40, %s3520_s16 }
 0x321   : > { %v1770_v8 = vpop.permute.xlu1 %1769  ;;  %v1780_v42 = vpop.permute.xlu0 %1779 }
 0x322   : > { %3112 = vst.msk [vmem:[%s3907_s24 + $0xd4] sm:$0xf] %vm1062_vm0, %v1770_v8  ;;  %3117 = vst.msk [vmem:[%s3907_s24 + $0xe8] sm:$0xf] %vm1062_vm0, %v1780_v42 }
 0x323   : > { %1712 = vrot.lane.b32.xlu1 %v4114_v16, %s3522_s21  ;;  %1454 = vrot.lane.b32.xlu0 %v4128_v37, %s3521_s3 }
 0x325   : > { %v1392_v27 = vpop.permute.xlu1 %1391  ;;  %v1248_v43 = vpop.permute.xlu0 %1247 }
 0x326   : > { %3022 = vst.msk [vmem:[%s3907_s24 + $0x6c] sm:$0xf] %vm1062_vm0, %v1392_v27  ;;  %2983 = vst.msk [vmem:[%s3890_s20 + $0x50] sm:$0xf] %vm1062_vm0, %v1248_v43 }
 0x327   : > { %1261 = vrot.lane.b32.xlu1 %v4144_v49, %s3520_s16  ;;  %1519 = vrot.lane.b32.xlu0 %v4130_v40, %s3521_s3 }
 0x329   : > { %v1587_v16 = vpop.permute.xlu1 %1586  ;;  %v1313_v53 = vpop.permute.xlu0 %1312 }
 0x32a   : > { %3070 = vst.msk [vmem:[%s3907_s24 + $0xac] sm:$0xf] %vm1062_vm0, %v1587_v16  ;;  %2999 = vst.msk [vmem:[%s3895_s11 + $0x50] sm:$0xf] %vm1062_vm0, %v1313_v53 }
 0x32b   : > { %1326 = vrot.lane.b32.xlu1 %v4146_v50, %s3520_s16  ;;  %1649 = vrot.lane.b32.xlu0 %v4128_v37, %s3522_s21 }
 0x32d   : > { %v1782_v30 = vpop.permute.xlu1 %1781  ;;  %v1443_v54 = vpop.permute.xlu0 %1442 }
 0x32e   : > { %3118 = vst.msk [vmem:[%s3907_s24 + $0xec] sm:$0xf] %vm1062_vm0, %v1782_v30  ;;  %3031 = vst.msk [vmem:[%s3890_s20 + $0x90] sm:$0xf] %vm1062_vm0, %v1443_v54 }
 0x32f   : > { %1456 = vrot.lane.b32.xlu1 %v4144_v49, %s3521_s3  ;;  %1714 = vrot.lane.b32.xlu0 %v4130_v40, %s3522_s21 }
 0x331   : > { %v1250_v56 = vpop.permute.xlu1 %1249  ;;  %v1508_v62 = vpop.permute.xlu0 %1507 }
 0x332   : > { %2984 = vst.msk [vmem:[%s3890_s20 + $0x54] sm:$0xf] %vm1062_vm0, %v1250_v56  ;;  %3047 = vst.msk [vmem:[%s3895_s11 + $0x90] sm:$0xf] %vm1062_vm0, %v1508_v62 }
 0x333   : > { %1521 = vrot.lane.b32.xlu1 %v4146_v50, %s3521_s3  ;;  %1263 = vrot.lane.b32.xlu0 %v4160_v19, %s3520_s16 }
 0x335   : > { %v1315_v37 = vpop.permute.xlu1 %1314  ;;  %v1638_v63 = vpop.permute.xlu0 %1637 }
 0x336   : > { %3000 = vst.msk [vmem:[%s3895_s11 + $0x54] sm:$0xf] %vm1062_vm0, %v1315_v37  ;;  %3079 = vst.msk [vmem:[%s3890_s20 + $0xd0] sm:$0xf] %vm1062_vm0, %v1638_v63 }
 0x337   : > { %1651 = vrot.lane.b32.xlu1 %v4144_v49, %s3522_s21  ;;  %1328 = vrot.lane.b32.xlu0 %v4162_v13, %s3520_s16 }
 0x339   : > { %v1445_v40 = vpop.permute.xlu1 %1444  ;;  %v1703_v14 = vpop.permute.xlu0 %1702 }
 0x33a   : > { %3032 = vst.msk [vmem:[%s3890_s20 + $0x94] sm:$0xf] %vm1062_vm0, %v1445_v40  ;;  %3095 = vst.msk [vmem:[%s3895_s11 + $0xd0] sm:$0xf] %vm1062_vm0, %v1703_v14 }
 0x33b   : > { %1716 = vrot.lane.b32.xlu1 %v4146_v50, %s3522_s21  ;;  %1458 = vrot.lane.b32.xlu0 %v4160_v19, %s3521_s3 }
 0x33d   : > { %v1510_v49 = vpop.permute.xlu1 %1509  ;;  %v1386_v5 = vpop.permute.xlu0 %1385 }
 0x33e   : > { %3048 = vst.msk [vmem:[%s3895_s11 + $0x94] sm:$0xf] %vm1062_vm0, %v1510_v49  ;;  %3019 = vst.msk [vmem:[%s3907_s24 + $0x60] sm:$0xf] %vm1062_vm0, %v1386_v5 }
 0x33f   : > { %1265 = vrot.lane.b32.xlu1 %v4176_v38, %s3520_s16  ;;  %1523 = vrot.lane.b32.xlu0 %v4162_v13, %s3521_s3 }
 0x341   : > { %v1640_v50 = vpop.permute.xlu1 %1639  ;;  %v1581_v18 = vpop.permute.xlu0 %1580 }
 0x342   : > { %3080 = vst.msk [vmem:[%s3890_s20 + $0xd4] sm:$0xf] %vm1062_vm0, %v1640_v50  ;;  %3067 = vst.msk [vmem:[%s3907_s24 + $0xa0] sm:$0xf] %vm1062_vm0, %v1581_v18 }
 0x343   : > { %1330 = vrot.lane.b32.xlu1 %v4178_v9, %s3520_s16  ;;  %1653 = vrot.lane.b32.xlu0 %v4160_v19, %s3522_s21 }
 0x345   : > { %v1705_v20 = vpop.permute.xlu1 %1704  ;;  %v1776_v21 = vpop.permute.xlu0 %1775 }
 0x346   : > { %3096 = vst.msk [vmem:[%s3895_s11 + $0xd4] sm:$0xf] %vm1062_vm0, %v1705_v20  ;;  %3115 = vst.msk [vmem:[%s3907_s24 + $0xe0] sm:$0xf] %vm1062_vm0, %v1776_v21 }
 0x347   : > { %1460 = vrot.lane.b32.xlu1 %v4176_v38, %s3521_s3  ;;  %1718 = vrot.lane.b32.xlu0 %v4162_v13, %s3522_s21 }
 0x349   : > { %v1388_v46 = vpop.permute.xlu1 %1387  ;;  %v1398_v47 = vpop.permute.xlu0 %1397 }
 0x34a   : > { %3020 = vst.msk [vmem:[%s3907_s24 + $0x64] sm:$0xf] %vm1062_vm0, %v1388_v46  ;;  %3025 = vst.msk [vmem:[%s3907_s24 + $0x78] sm:$0xf] %vm1062_vm0, %v1398_v47 }
 0x34b   : > { %1525 = vrot.lane.b32.xlu1 %v4178_v9, %s3521_s3  ;;  %1267 = vrot.lane.b32.xlu0 %v4192_v28, %s3520_s16 }
 0x34d   : > { %v1583_v19 = vpop.permute.xlu1 %1582  ;;  %v1593_v41 = vpop.permute.xlu0 %1592 }
 0x34e   : > { %3068 = vst.msk [vmem:[%s3907_s24 + $0xa4] sm:$0xf] %vm1062_vm0, %v1583_v19  ;;  %3073 = vst.msk [vmem:[%s3907_s24 + $0xb8] sm:$0xf] %vm1062_vm0, %v1593_v41 }
 0x34f   : > { %1655 = vrot.lane.b32.xlu1 %v4176_v38, %s3522_s21  ;;  %1332 = vrot.lane.b32.xlu0 %v4194_v33, %s3520_s16 }
 0x351   : > { %v1778_v13 = vpop.permute.xlu1 %1777  ;;  %v1252_v44 = vpop.permute.xlu0 %1251 }
 0x352   : > { %3116 = vst.msk [vmem:[%s3907_s24 + $0xe4] sm:$0xf] %vm1062_vm0, %v1778_v13  ;;  %2985 = vst.msk [vmem:[%s3890_s20 + $0x58] sm:$0xf] %vm1062_vm0, %v1252_v44 }
 0x353   : > { %1720 = vrot.lane.b32.xlu1 %v4178_v9, %s3522_s21  ;;  %1462 = vrot.lane.b32.xlu0 %v4192_v28, %s3521_s3 }
 0x355   : > { %v1400_v38 = vpop.permute.xlu1 %1399  ;;  %v1317_v58 = vpop.permute.xlu0 %1316 }
 0x356   : > { %3026 = vst.msk [vmem:[%s3907_s24 + $0x7c] sm:$0xf] %vm1062_vm0, %v1400_v38  ;;  %3001 = vst.msk [vmem:[%s3895_s11 + $0x58] sm:$0xf] %vm1062_vm0, %v1317_v58 }
 0x357   : > { %1269 = vrot.lane.b32.xlu1 %v4208_v17, %s3520_s16  ;;  %1527 = vrot.lane.b32.xlu0 %v4194_v33, %s3521_s3 }
 0x359   : > { %v1595_v9 = vpop.permute.xlu1 %1594  ;;  %v1447_v3 = vpop.permute.xlu0 %1446 }
 0x35a   : > { %3074 = vst.msk [vmem:[%s3907_s24 + $0xbc] sm:$0xf] %vm1062_vm0, %v1595_v9  ;;  %3033 = vst.msk [vmem:[%s3890_s20 + $0x98] sm:$0xf] %vm1062_vm0, %v1447_v3 }
 0x35b   : > { %1334 = vrot.lane.b32.xlu1 %v4210_v29, %s3520_s16  ;;  %1657 = vrot.lane.b32.xlu0 %v4192_v28, %s3522_s21 }
 0x35d   : > { %v1254_v12 = vpop.permute.xlu1 %1253  ;;  %v1512_v51 = vpop.permute.xlu0 %1511 }
 0x35e   : > { %2986 = vst.msk [vmem:[%s3890_s20 + $0x5c] sm:$0xf] %vm1062_vm0, %v1254_v12  ;;  %3049 = vst.msk [vmem:[%s3895_s11 + $0x98] sm:$0xf] %vm1062_vm0, %v1512_v51  ;;  %v1860_v51 = vld [vmem:[%s3890_s20] sm:$0xff] (%p3647_p10)  }
 0x35f   : > { %1464 = vrot.lane.b32.xlu1 %v4208_v17, %s3521_s3  ;;  %1722 = vrot.lane.b32.xlu0 %v4194_v33, %s3522_s21  ;;  %1861 = vst [vmem:[%s4756_s13] sm:$0xff] (%p3647_p10), %v1860_v51  }
 0x361   : > { %v1319_v4 = vpop.permute.xlu1 %1318  ;;  %v1642_v11 = vpop.permute.xlu0 %1641 }
 0x362   : > { %3002 = vst.msk [vmem:[%s3895_s11 + $0x5c] sm:$0xf] %vm1062_vm0, %v1319_v4  ;;  %3081 = vst.msk [vmem:[%s3890_s20 + $0xd8] sm:$0xf] %vm1062_vm0, %v1642_v11  ;;  %v1864_v4 = vld [vmem:[%s3890_s20 + $0x8] sm:$0xff] (%p3647_p10)   ;;  %v1868_v11 = vld [vmem:[%s3890_s20 + $0x10] sm:$0xff] (%p3647_p10)  }
 0x363   : > { %1529 = vrot.lane.b32.xlu1 %v4210_v29, %s3521_s3  ;;  %1787 = vrot.lane.b32.xlu0 %v4057_v52, %s3522_s21  ;;  %1865 = vst [vmem:[%s4756_s13 + $0x8] sm:$0xff] (%p3647_p10), %v1864_v4   ;;  %1869 = vst [vmem:[%s4756_s13 + $0x10] sm:$0xff] (%p3647_p10), %v1868_v11  }
 0x365   : > { %v1449_v28 = vpop.permute.xlu1 %1448  ;;  %v1707_v59 = vpop.permute.xlu0 %1706 }
 0x366   : > { %3034 = vst.msk [vmem:[%s3890_s20 + $0x9c] sm:$0xf] %vm1062_vm0, %v1449_v28  ;;  %3097 = vst.msk [vmem:[%s3895_s11 + $0xd8] sm:$0xf] %vm1062_vm0, %v1707_v59  ;;  %v1872_v28 = vld [vmem:[%s3890_s20 + $0x18] sm:$0xff] (%p3647_p10)   ;;  %v1876_v59 = vld [vmem:[%s3890_s20 + $0x20] sm:$0xff] (%p3647_p10)  }
 0x367   : > { %1659 = vrot.lane.b32.xlu1 %v4208_v17, %s3522_s21  ;;  %1873 = vst [vmem:[%s4756_s13 + $0x18] sm:$0xff] (%p3647_p10), %v1872_v28   ;;  %1877 = vst [vmem:[%s4756_s13 + $0x20] sm:$0xff] (%p3647_p10), %v1876_v59  }
 0x369   : > { %v1514_v33 = vpop.permute.xlu1 %1513  ;;  %v1394_v61 = vpop.permute.xlu0 %1393 }
 0x36a   : > { %3050 = vst.msk [vmem:[%s3895_s11 + $0x9c] sm:$0xf] %vm1062_vm0, %v1514_v33  ;;  %3023 = vst.msk [vmem:[%s3907_s24 + $0x70] sm:$0xf] %vm1062_vm0, %v1394_v61  ;;  %v1880_v33 = vld [vmem:[%s3890_s20 + $0x28] sm:$0xff] (%p3647_p10)   ;;  %v1884_v61 = vld [vmem:[%s3890_s20 + $0x30] sm:$0xff] (%p3647_p10)  }
 0x36b   : > { %1724 = vrot.lane.b32.xlu1 %v4210_v29, %s3522_s21  ;;  %1881 = vst [vmem:[%s4756_s13 + $0x28] sm:$0xff] (%p3647_p10), %v1880_v33   ;;  %1885 = vst [vmem:[%s4756_s13 + $0x30] sm:$0xff] (%p3647_p10), %v1884_v61  }
 0x36d   : > { %v1644_v52 = vpop.permute.xlu1 %1643  ;;  %v1589_v15 = vpop.permute.xlu0 %1588 }
 0x36e   : > { %3082 = vst.msk [vmem:[%s3890_s20 + $0xdc] sm:$0xf] %vm1062_vm0, %v1644_v52  ;;  %3071 = vst.msk [vmem:[%s3907_s24 + $0xb0] sm:$0xf] %vm1062_vm0, %v1589_v15  ;;  %v1888_v52 = vld [vmem:[%s3890_s20 + $0x38] sm:$0xff] (%p3647_p10)   ;;  %v1892_v15 = vld [vmem:[%s3890_s20 + $0x40] sm:$0xff] (%p3647_p10)  }
 0x36f   : > { %1789 = vrot.lane.b32.xlu1 %v4085_v2, %s3522_s21  ;;  %1889 = vst [vmem:[%s4756_s13 + $0x38] sm:$0xff] (%p3647_p10), %v1888_v52   ;;  %1893 = vst [vmem:[%s4756_s13 + $0x80] sm:$0xff] (%p3647_p10), %v1892_v15  }
 0x371   : > { %v1709_v17 = vpop.permute.xlu1 %1708  ;;  %v1784_v32 = vpop.permute.xlu0 %1783 }
 0x372   : > { %3098 = vst.msk [vmem:[%s3895_s11 + $0xdc] sm:$0xf] %vm1062_vm0, %v1709_v17  ;;  %3119 = vst.msk [vmem:[%s3907_s24 + $0xf0] sm:$0xf] %vm1062_vm0, %v1784_v32  ;;  %v1896_v17 = vld [vmem:[%s3890_s20 + $0x48] sm:$0xff] (%p3647_p10)   ;;  %v1900_v32 = vld [vmem:[%s3890_s20 + $0x50] sm:$0xff] (%p3647_p10)  }
 0x373   : > { %1897 = vst [vmem:[%s4756_s13 + $0x88] sm:$0xff] (%p3647_p10), %v1896_v17   ;;  %1901 = vst [vmem:[%s4756_s13 + $0x90] sm:$0xff] (%p3647_p10), %v1900_v32  }
 0x375   : > { %v1396_v29 = vpop.permute.xlu1 %1395  ;;  %v1256_v22 = vpop.permute.xlu0 %1255 }
 0x376   : > { %3024 = vst.msk [vmem:[%s3907_s24 + $0x74] sm:$0xf] %vm1062_vm0, %v1396_v29  ;;  %2987 = vst.msk [vmem:[%s3890_s20 + $0x60] sm:$0xf] %vm1062_vm0, %v1256_v22  ;;  %v1904_v29 = vld [vmem:[%s3890_s20 + $0x58] sm:$0xff] (%p3647_p10)  }
 0x377   : > { %1905 = vst [vmem:[%s4756_s13 + $0x98] sm:$0xff] (%p3647_p10), %v1904_v29  }
 0x379   : > { %v1591_v25 = vpop.permute.xlu1 %1590  ;;  %v1321_v0 = vpop.permute.xlu0 %1320 }
 0x37a   : > { %3072 = vst.msk [vmem:[%s3907_s24 + $0xb4] sm:$0xf] %vm1062_vm0, %v1591_v25  ;;  %3003 = vst.msk [vmem:[%s3895_s11 + $0x60] sm:$0xf] %vm1062_vm0, %v1321_v0 }
 0x37d   : > { %v1786_v2 = vpop.permute.xlu1 %1785  ;;  %v1451_v6 = vpop.permute.xlu0 %1450 }
 0x37e   : > { %3120 = vst.msk [vmem:[%s3907_s24 + $0xf4] sm:$0xf] %vm1062_vm0, %v1786_v2  ;;  %3035 = vst.msk [vmem:[%s3890_s20 + $0xa0] sm:$0xf] %vm1062_vm0, %v1451_v6  ;;  %v1924_v6 = vld [vmem:[%s3890_s20 + $0x80] sm:$0xff] (%p3647_p10)  }
 0x37f   : > { %1925 = vst [vmem:[%s4756_s13 + $0x100] sm:$0xff] (%p3647_p10), %v1924_v6  }
 0x381   : > { %v1258_v55 = vpop.permute.xlu1 %1257  ;;  %v1516_v48 = vpop.permute.xlu0 %1515 }
 0x382   : > { %2988 = vst.msk [vmem:[%s3890_s20 + $0x64] sm:$0xf] %vm1062_vm0, %v1258_v55  ;;  %3051 = vst.msk [vmem:[%s3895_s11 + $0xa0] sm:$0xf] %vm1062_vm0, %v1516_v48  ;;  %v1928_v55 = vld [vmem:[%s3890_s20 + $0x88] sm:$0xff] (%p3647_p10)   ;;  %v1932_v48 = vld [vmem:[%s3890_s20 + $0x90] sm:$0xff] (%p3647_p10)  }
 0x383   : > { %1929 = vst [vmem:[%s4756_s13 + $0x108] sm:$0xff] (%p3647_p10), %v1928_v55   ;;  %1933 = vst [vmem:[%s4756_s13 + $0x110] sm:$0xff] (%p3647_p10), %v1932_v48  }
 0x385   : > { %v1323_v23 = vpop.permute.xlu1 %1322  ;;  %v1646_v35 = vpop.permute.xlu0 %1645 }
 0x386   : > { %3004 = vst.msk [vmem:[%s3895_s11 + $0x64] sm:$0xf] %vm1062_vm0, %v1323_v23  ;;  %3083 = vst.msk [vmem:[%s3890_s20 + $0xe0] sm:$0xf] %vm1062_vm0, %v1646_v35  ;;  %v1936_v23 = vld [vmem:[%s3890_s20 + $0x98] sm:$0xff] (%p3647_p10)  }
 0x387   : > { %1937 = vst [vmem:[%s4756_s13 + $0x118] sm:$0xff] (%p3647_p10), %v1936_v23  }
 0x389   : > { %v1453_v60 = vpop.permute.xlu1 %1452  ;;  %v1711_v10 = vpop.permute.xlu0 %1710  ;;  %v1908_v22 = vld [vmem:[%s3890_s20 + $0x60] sm:$0xff] (%p3647_p10)  }
 0x38a   : > { %3036 = vst.msk [vmem:[%s3890_s20 + $0xa4] sm:$0xf] %vm1062_vm0, %v1453_v60  ;;  %3099 = vst.msk [vmem:[%s3895_s11 + $0xe0] sm:$0xf] %vm1062_vm0, %v1711_v10 }
 0x38b   : > { %1909 = vst [vmem:[%s4756_s13 + $0xa0] sm:$0xff] (%p3647_p10), %v1908_v22  }
 0x38d   : > { %v1518_v24 = vpop.permute.xlu1 %1517  ;;  %v1260_v26 = vpop.permute.xlu0 %1259 }
 0x38e   : > { %3052 = vst.msk [vmem:[%s3895_s11 + $0xa4] sm:$0xf] %vm1062_vm0, %v1518_v24  ;;  %2989 = vst.msk [vmem:[%s3890_s20 + $0x68] sm:$0xf] %vm1062_vm0, %v1260_v26  ;;  %v1956_v26 = vld [vmem:[%s3890_s20 + $0xc0] sm:$0xff] (%p3647_p10)  }
 0x38f   : > { %1957 = vst [vmem:[%s4756_s13 + $0x180] sm:$0xff] (%p3647_p10), %v1956_v26  }
 0x391   : > { %v1648_v39 = vpop.permute.xlu1 %1647  ;;  %v1325_v45 = vpop.permute.xlu0 %1324  ;;  %v1940_v35 = vld [vmem:[%s3890_s20 + $0xa0] sm:$0xff] (%p3647_p10)  }
 0x392   : > { %3084 = vst.msk [vmem:[%s3890_s20 + $0xe4] sm:$0xf] %vm1062_vm0, %v1648_v39  ;;  %3005 = vst.msk [vmem:[%s3895_s11 + $0x68] sm:$0xf] %vm1062_vm0, %v1325_v45  ;;  %v1960_v39 = vld [vmem:[%s3890_s20 + $0xc8] sm:$0xff] (%p3647_p10)   ;;  %v1964_v45 = vld [vmem:[%s3890_s20 + $0xd0] sm:$0xff] (%p3647_p10)  }
 0x393   : > { %1941 = vst [vmem:[%s4756_s13 + $0x120] sm:$0xff] (%p3647_p10), %v1940_v35   ;;  %1961 = vst [vmem:[%s4756_s13 + $0x188] sm:$0xff] (%p3647_p10), %v1960_v39  }
 0x394   : > { %1965 = vst [vmem:[%s4756_s13 + $0x190] sm:$0xff] (%p3647_p10), %v1964_v45  }
 0x395   : > { %v1713_v34 = vpop.permute.xlu1 %1712  ;;  %v1455_v36 = vpop.permute.xlu0 %1454 }
 0x396   : > { %3100 = vst.msk [vmem:[%s3895_s11 + $0xe4] sm:$0xf] %vm1062_vm0, %v1713_v34  ;;  %3037 = vst.msk [vmem:[%s3890_s20 + $0xa8] sm:$0xf] %vm1062_vm0, %v1455_v36  ;;  %v1968_v34 = vld [vmem:[%s3890_s20 + $0xd8] sm:$0xff] (%p3647_p10)  }
 0x397   : > { %1969 = vst [vmem:[%s4756_s13 + $0x198] sm:$0xff] (%p3647_p10), %v1968_v34  }
 0x399   : > { %v1262_v57 = vpop.permute.xlu1 %1261  ;;  %v1520_v1 = vpop.permute.xlu0 %1519  ;;  %v1972_v36 = vld [vmem:[%s3890_s20 + $0xe0] sm:$0xff] (%p3647_p10)  }
 0x39a   : > { %2990 = vst.msk [vmem:[%s3890_s20 + $0x6c] sm:$0xf] %vm1062_vm0, %v1262_v57  ;;  %3053 = vst.msk [vmem:[%s3895_s11 + $0xa8] sm:$0xf] %vm1062_vm0, %v1520_v1 }
 0x39b   : > { %1973 = vst [vmem:[%s4756_s13 + $0x1a0] sm:$0xff] (%p3647_p10), %v1972_v36  }
 0x39d   : > { %v1327_v7 = vpop.permute.xlu1 %1326  ;;  %v1650_v31 = vpop.permute.xlu0 %1649 }
 0x39e   : > { %3006 = vst.msk [vmem:[%s3895_s11 + $0x6c] sm:$0xf] %vm1062_vm0, %v1327_v7  ;;  %3085 = vst.msk [vmem:[%s3890_s20 + $0xe8] sm:$0xf] %vm1062_vm0, %v1650_v31 }
 0x3a1   : > { %v1457_v8 = vpop.permute.xlu1 %1456  ;;  %v1715_v42 = vpop.permute.xlu0 %1714  ;;  %v1912_v25 = vld [vmem:[%s3890_s20 + $0x68] sm:$0xff] (%p3647_p10)  }
 0x3a2   : > { %3038 = vst.msk [vmem:[%s3890_s20 + $0xac] sm:$0xf] %vm1062_vm0, %v1457_v8  ;;  %3101 = vst.msk [vmem:[%s3895_s11 + $0xe8] sm:$0xf] %vm1062_vm0, %v1715_v42 }
 0x3a3   : > { %1913 = vst [vmem:[%s4756_s13 + $0xa8] sm:$0xff] (%p3647_p10), %v1912_v25  }
 0x3a5   : > { %v1522_v27 = vpop.permute.xlu1 %1521  ;;  %v1264_v43 = vpop.permute.xlu0 %1263 }
 0x3a6   : > { %3054 = vst.msk [vmem:[%s3895_s11 + $0xac] sm:$0xf] %vm1062_vm0, %v1522_v27  ;;  %2991 = vst.msk [vmem:[%s3890_s20 + $0x70] sm:$0xf] %vm1062_vm0, %v1264_v43 }
 0x3a9   : > { %v1652_v16 = vpop.permute.xlu1 %1651  ;;  %v1329_v53 = vpop.permute.xlu0 %1328  ;;  %v1944_v60 = vld [vmem:[%s3890_s20 + $0xa8] sm:$0xff] (%p3647_p10)  }
 0x3aa   : > { %3086 = vst.msk [vmem:[%s3890_s20 + $0xec] sm:$0xf] %vm1062_vm0, %v1652_v16  ;;  %3007 = vst.msk [vmem:[%s3895_s11 + $0x70] sm:$0xf] %vm1062_vm0, %v1329_v53 }
 0x3ab   : > { %1945 = vst [vmem:[%s4756_s13 + $0x128] sm:$0xff] (%p3647_p10), %v1944_v60  }
 0x3ad   : > { %v1717_v30 = vpop.permute.xlu1 %1716  ;;  %v1459_v54 = vpop.permute.xlu0 %1458 }
 0x3ae   : > { %3102 = vst.msk [vmem:[%s3895_s11 + $0xec] sm:$0xf] %vm1062_vm0, %v1717_v30  ;;  %3039 = vst.msk [vmem:[%s3890_s20 + $0xb0] sm:$0xf] %vm1062_vm0, %v1459_v54 }
 0x3b1   : > { %v1266_v56 = vpop.permute.xlu1 %1265  ;;  %v1524_v62 = vpop.permute.xlu0 %1523  ;;  %v1976_v57 = vld [vmem:[%s3890_s20 + $0xe8] sm:$0xff] (%p3647_p10)  }
 0x3b2   : > { %2992 = vst.msk [vmem:[%s3890_s20 + $0x74] sm:$0xf] %vm1062_vm0, %v1266_v56  ;;  %3055 = vst.msk [vmem:[%s3895_s11 + $0xb0] sm:$0xf] %vm1062_vm0, %v1524_v62 }
 0x3b3   : > { %1977 = vst [vmem:[%s4756_s13 + $0x1a8] sm:$0xff] (%p3647_p10), %v1976_v57  }
 0x3b5   : > { %v1331_v37 = vpop.permute.xlu1 %1330  ;;  %v1654_v63 = vpop.permute.xlu0 %1653 }
 0x3b6   : > { %3008 = vst.msk [vmem:[%s3895_s11 + $0x74] sm:$0xf] %vm1062_vm0, %v1331_v37  ;;  %3087 = vst.msk [vmem:[%s3890_s20 + $0xf0] sm:$0xf] %vm1062_vm0, %v1654_v63 }
 0x3b9   : > { %v1461_v40 = vpop.permute.xlu1 %1460  ;;  %v1719_v14 = vpop.permute.xlu0 %1718  ;;  %v1916_v0 = vld [vmem:[%s3890_s20 + $0x70] sm:$0xff] (%p3647_p10)  }
 0x3ba   : > { %3040 = vst.msk [vmem:[%s3890_s20 + $0xb4] sm:$0xf] %vm1062_vm0, %v1461_v40  ;;  %3103 = vst.msk [vmem:[%s3895_s11 + $0xf0] sm:$0xf] %vm1062_vm0, %v1719_v14 }
 0x3bb   : > { %1917 = vst [vmem:[%s4756_s13 + $0xb0] sm:$0xff] (%p3647_p10), %v1916_v0  }
 0x3bd   : > { %v1526_v49 = vpop.permute.xlu1 %1525  ;;  %v1268_v5 = vpop.permute.xlu0 %1267 }
 0x3be   : > { %3056 = vst.msk [vmem:[%s3895_s11 + $0xb4] sm:$0xf] %vm1062_vm0, %v1526_v49  ;;  %2993 = vst.msk [vmem:[%s3890_s20 + $0x78] sm:$0xf] %vm1062_vm0, %v1268_v5 }
 0x3c1   : > { %v1656_v50 = vpop.permute.xlu1 %1655  ;;  %v1333_v18 = vpop.permute.xlu0 %1332  ;;  %v1948_v10 = vld [vmem:[%s3890_s20 + $0xb0] sm:$0xff] (%p3647_p10)  }
 0x3c2   : > { %3088 = vst.msk [vmem:[%s3890_s20 + $0xf4] sm:$0xf] %vm1062_vm0, %v1656_v50  ;;  %3009 = vst.msk [vmem:[%s3895_s11 + $0x78] sm:$0xf] %vm1062_vm0, %v1333_v18 }
 0x3c3   : > { %1949 = vst [vmem:[%s4756_s13 + $0x130] sm:$0xff] (%p3647_p10), %v1948_v10  }
 0x3c5   : > { %v1721_v20 = vpop.permute.xlu1 %1720  ;;  %v1463_v21 = vpop.permute.xlu0 %1462 }
 0x3c6   : > { %3104 = vst.msk [vmem:[%s3895_s11 + $0xf4] sm:$0xf] %vm1062_vm0, %v1721_v20  ;;  %3041 = vst.msk [vmem:[%s3890_s20 + $0xb8] sm:$0xf] %vm1062_vm0, %v1463_v21 }
 0x3c9   : > { %v1270_v46 = vpop.permute.xlu1 %1269  ;;  %v1528_v47 = vpop.permute.xlu0 %1527  ;;  %v1980_v1 = vld [vmem:[%s3890_s20 + $0xf0] sm:$0xff] (%p3647_p10)  }
 0x3ca   : > { %2994 = vst.msk [vmem:[%s3890_s20 + $0x7c] sm:$0xf] %vm1062_vm0, %v1270_v46  ;;  %3057 = vst.msk [vmem:[%s3895_s11 + $0xb8] sm:$0xf] %vm1062_vm0, %v1528_v47 }
 0x3cb   : > { %1981 = vst [vmem:[%s4756_s13 + $0x1b0] sm:$0xff] (%p3647_p10), %v1980_v1  }
 0x3cd   : > { %v1335_v19 = vpop.permute.xlu1 %1334  ;;  %v1658_v41 = vpop.permute.xlu0 %1657 }
 0x3ce   : > { %3010 = vst.msk [vmem:[%s3895_s11 + $0x7c] sm:$0xf] %vm1062_vm0, %v1335_v19  ;;  %3089 = vst.msk [vmem:[%s3890_s20 + $0xf8] sm:$0xf] %vm1062_vm0, %v1658_v41 }
 0x3d1   : > { %v1465_v13 = vpop.permute.xlu1 %1464  ;;  %v1723_v44 = vpop.permute.xlu0 %1722  ;;  %v1920_v2 = vld [vmem:[%s3890_s20 + $0x78] sm:$0xff] (%p3647_p10)  }
 0x3d2   : > { %3042 = vst.msk [vmem:[%s3890_s20 + $0xbc] sm:$0xf] %vm1062_vm0, %v1465_v13  ;;  %3105 = vst.msk [vmem:[%s3895_s11 + $0xf8] sm:$0xf] %vm1062_vm0, %v1723_v44 }
 0x3d3   : > { %1921 = vst [vmem:[%s4756_s13 + $0xb8] sm:$0xff] (%p3647_p10), %v1920_v2  }
 0x3d5   : > { %v1530_v38 = vpop.permute.xlu1 %1529  ;;  %v1788_v58 = vpop.permute.xlu0 %1787 }
 0x3d6   : > { %3058 = vst.msk [vmem:[%s3895_s11 + $0xbc] sm:$0xf] %vm1062_vm0, %v1530_v38  ;;  %3121 = vst.msk [vmem:[%s3907_s24 + $0xf8] sm:$0xf] %vm1062_vm0, %v1788_v58 }
 0x3d9   : > { %v1660_v9 = vpop.permute.xlu1 %1659  ;;  %v1952_v24 = vld [vmem:[%s3890_s20 + $0xb8] sm:$0xff] (%p3647_p10)  }
 0x3da   : > { %3090 = vst.msk [vmem:[%s3890_s20 + $0xfc] sm:$0xf] %vm1062_vm0, %v1660_v9  ;;  %1953 = vst [vmem:[%s4756_s13 + $0x138] sm:$0xff] (%p3647_p10), %v1952_v24  }
 0x3dd   : > { %v1725_v3 = vpop.permute.xlu1 %1724 }
 0x3de   : > { %3106 = vst.msk [vmem:[%s3895_s11 + $0xfc] sm:$0xf] %vm1062_vm0, %v1725_v3  ;;  %1838 = sbr.rel (!%p3647_p10) target bundleno = 995 (0x3e3), region = 52 }
 0x3e1   : > { %v1790_v12 = vpop.permute.xlu1 %1789  ;;  %v1984_v7 = vld [vmem:[%s3890_s20 + $0xf8] sm:$0xff] (%p3647_p10)  }
 0x3e2   : > { %3122 = vst.msk [vmem:[%s3907_s24 + $0xfc] sm:$0xf] %vm1062_vm0, %v1790_v12  ;;  %1985 = vst [vmem:[%s4756_s13 + $0x1b8] sm:$0xff] (%p3647_p10), %v1984_v7  }
 0x3e3 PF: > { %2139 = sbr.rel (!%p3647_p10) target bundleno = 1022 (0x3fe), region = 93  ;;  %s5016_s18 = sld [smem:[#allocation11_spill]] (%p3647_p10)  ;;  %v2161_v31 = vld [vmem:[%s3895_s11] sm:$0xff] (%p3647_p10)   ;;  %v2165_v8 = vld [vmem:[%s3895_s11 + $0x8] sm:$0xff] (%p3647_p10)   ;;  %v2169_v42 = vld [vmem:[%s3895_s11 + $0x10] sm:$0xff] (%p3647_p10)  }
 0x3e4   : > { %s5017_s19 = sld [smem:[#allocation12_spill]] (%p3647_p10)  ;;  %v2173_v27 = vld [vmem:[%s3895_s11 + $0x18] sm:$0xff] (%p3647_p10)   ;;  %v2177_v43 = vld [vmem:[%s3895_s11 + $0x20] sm:$0xff] (%p3647_p10)   ;;  %v2181_v16 = vld [vmem:[%s3895_s11 + $0x28] sm:$0xff] (%p3647_p10)  }
 0x3e5   : > { %v2185_v53 = vld [vmem:[%s3895_s11 + $0x30] sm:$0xff] (%p3647_p10)   ;;  %v2189_v30 = vld [vmem:[%s3895_s11 + $0x38] sm:$0xff] (%p3647_p10)   ;;  %v2193_v54 = vld [vmem:[%s3895_s11 + $0x40] sm:$0xff] (%p3647_p10)   ;;  %s5018_s6 = sld [smem:[#allocation17_spill]] (%p3647_p10) }
 0x3e6   : > { %v2197_v56 = vld [vmem:[%s3895_s11 + $0x48] sm:$0xff] (%p3647_p10)   ;;  %v2201_v62 = vld [vmem:[%s3895_s11 + $0x50] sm:$0xff] (%p3647_p10)   ;;  %v2205_v37 = vld [vmem:[%s3895_s11 + $0x58] sm:$0xff] (%p3647_p10)  }
 0x3e7   : > { %v2209_v63 = vld [vmem:[%s3895_s11 + $0x60] sm:$0xff] (%p3647_p10)   ;;  %v2213_v40 = vld [vmem:[%s3895_s11 + $0x68] sm:$0xff] (%p3647_p10)   ;;  %v2217_v14 = vld [vmem:[%s3895_s11 + $0x70] sm:$0xff] (%p3647_p10)  }
 0x3e8   : > { %v2221_v49 = vld [vmem:[%s3895_s11 + $0x78] sm:$0xff]   ;;  %v2225_v5 = vld [vmem:[%s3895_s11 + $0x80] sm:$0xff]   ;;  %v2229_v50 = vld [vmem:[%s3895_s11 + $0x88] sm:$0xff]  }
 0x3e9   : > { %s3129_s20 = sshll.u32 %s5016_s18, 4  ;;  %v2233_v18 = vld [vmem:[%s3895_s11 + $0x90] sm:$0xff]   ;;  %v2237_v20 = vld [vmem:[%s3895_s11 + $0x98] sm:$0xff]   ;;  %v2241_v21 = vld [vmem:[%s3895_s11 + $0xa0] sm:$0xff]  }
 0x3ea   : > { %s3130_s16 = sshll.u32 %s5017_s19, 7  ;;  %v2245_v46 = vld [vmem:[%s3895_s11 + $0xa8] sm:$0xff]   ;;  %v2249_v47 = vld [vmem:[%s3895_s11 + $0xb0] sm:$0xff]   ;;  %v2253_v19 = vld [vmem:[%s3895_s11 + $0xb8] sm:$0xff]  }
 0x3eb   : > { %s2142_s3 = sadd.s32 %s3130_s16, %s3129_s20  ;;  %v2257_v41 = vld [vmem:[%s3895_s11 + $0xc0] sm:$0xff]   ;;  %v2261_v13 = vld [vmem:[%s3895_s11 + $0xc8] sm:$0xff]   ;;  %v2265_v44 = vld [vmem:[%s3895_s11 + $0xd0] sm:$0xff]  }
 0x3ec   : > { %s3131_s21 = sshll.u32 %s2142_s3, 2  ;;  %v2269_v38 = vld [vmem:[%s3895_s11 + $0xd8] sm:$0xff]   ;;  %v2273_v58 = vld [vmem:[%s3895_s11 + $0xe0] sm:$0xff]   ;;  %v2277_v9 = vld [vmem:[%s3895_s11 + $0xe8] sm:$0xff]  }
 0x3ed   : > { %s4829_s28 = scalar_lea.vmem %s5018_s6, %s3131_s21  ;;  %v2281_v3 = vld [vmem:[%s3895_s11 + $0xf0] sm:$0xff]   ;;  %v2285_v12 = vld [vmem:[%s3895_s11 + $0xf8] sm:$0xff]  }
 0x3ee   : > { %2162 = vst [vmem:[%s4829_s28] sm:$0xff] %v2161_v31   ;;  %2166 = vst [vmem:[%s4829_s28 + $0x8] sm:$0xff] %v2165_v8  }
 0x3ef   : > { %2170 = vst [vmem:[%s4829_s28 + $0x10] sm:$0xff] %v2169_v42   ;;  %2174 = vst [vmem:[%s4829_s28 + $0x18] sm:$0xff] %v2173_v27  }
 0x3f0   : > { %2178 = vst [vmem:[%s4829_s28 + $0x20] sm:$0xff] %v2177_v43   ;;  %2182 = vst [vmem:[%s4829_s28 + $0x28] sm:$0xff] %v2181_v16  }
 0x3f1   : > { %2186 = vst [vmem:[%s4829_s28 + $0x30] sm:$0xff] %v2185_v53   ;;  %2190 = vst [vmem:[%s4829_s28 + $0x38] sm:$0xff] %v2189_v30  }
 0x3f2   : > { %2194 = vst [vmem:[%s4829_s28 + $0x80] sm:$0xff] %v2193_v54   ;;  %2198 = vst [vmem:[%s4829_s28 + $0x88] sm:$0xff] %v2197_v56  }
 0x3f3   : > { %2202 = vst [vmem:[%s4829_s28 + $0x90] sm:$0xff] %v2201_v62   ;;  %2206 = vst [vmem:[%s4829_s28 + $0x98] sm:$0xff] %v2205_v37  }
 0x3f4   : > { %2210 = vst [vmem:[%s4829_s28 + $0xa0] sm:$0xff] %v2209_v63   ;;  %2214 = vst [vmem:[%s4829_s28 + $0xa8] sm:$0xff] %v2213_v40  }
 0x3f5   : > { %2218 = vst [vmem:[%s4829_s28 + $0xb0] sm:$0xff] %v2217_v14   ;;  %2222 = vst [vmem:[%s4829_s28 + $0xb8] sm:$0xff] %v2221_v49  }
 0x3f6   : > { %2226 = vst [vmem:[%s4829_s28 + $0x100] sm:$0xff] %v2225_v5   ;;  %2230 = vst [vmem:[%s4829_s28 + $0x108] sm:$0xff] %v2229_v50  }
 0x3f7   : > { %2234 = vst [vmem:[%s4829_s28 + $0x110] sm:$0xff] %v2233_v18   ;;  %2238 = vst [vmem:[%s4829_s28 + $0x118] sm:$0xff] %v2237_v20  }
 0x3f8   : > { %2242 = vst [vmem:[%s4829_s28 + $0x120] sm:$0xff] %v2241_v21   ;;  %2246 = vst [vmem:[%s4829_s28 + $0x128] sm:$0xff] %v2245_v46  }
 0x3f9   : > { %2250 = vst [vmem:[%s4829_s28 + $0x130] sm:$0xff] %v2249_v47   ;;  %2254 = vst [vmem:[%s4829_s28 + $0x138] sm:$0xff] %v2253_v19  }
 0x3fa   : > { %2258 = vst [vmem:[%s4829_s28 + $0x180] sm:$0xff] %v2257_v41   ;;  %2262 = vst [vmem:[%s4829_s28 + $0x188] sm:$0xff] %v2261_v13  }
 0x3fb   : > { %2266 = vst [vmem:[%s4829_s28 + $0x190] sm:$0xff] %v2265_v44   ;;  %2270 = vst [vmem:[%s4829_s28 + $0x198] sm:$0xff] %v2269_v38  }
 0x3fc   : > { %2274 = vst [vmem:[%s4829_s28 + $0x1a0] sm:$0xff] %v2273_v58   ;;  %2278 = vst [vmem:[%s4829_s28 + $0x1a8] sm:$0xff] %v2277_v9  }
 0x3fd   : > { %2282 = vst [vmem:[%s4829_s28 + $0x1b0] sm:$0xff] %v2281_v3   ;;  %2286 = vst [vmem:[%s4829_s28 + $0x1b8] sm:$0xff] %v2285_v12  }
 0x3fe PF: > { %2440 = sbr.rel (!%p3647_p10) target bundleno = 1049 (0x419), region = 134  ;;  %s5020_s15 = sld [smem:[#allocation11_spill]] (%p3647_p10)  ;;  %v2462_v51 = vld [vmem:[%s3907_s24] sm:$0xff] (%p3647_p10)   ;;  %v2466_v4 = vld [vmem:[%s3907_s24 + $0x8] sm:$0xff] (%p3647_p10)   ;;  %v2470_v11 = vld [vmem:[%s3907_s24 + $0x10] sm:$0xff] (%p3647_p10)  }
 0x3ff   : > { %s5021_s17 = sld [smem:[#allocation12_spill]] (%p3647_p10)  ;;  %v2474_v28 = vld [vmem:[%s3907_s24 + $0x18] sm:$0xff] (%p3647_p10)   ;;  %v2478_v59 = vld [vmem:[%s3907_s24 + $0x20] sm:$0xff] (%p3647_p10)   ;;  %v2482_v33 = vld [vmem:[%s3907_s24 + $0x28] sm:$0xff] (%p3647_p10)  }
 0x400   : > { %v2486_v61 = vld [vmem:[%s3907_s24 + $0x30] sm:$0xff] (%p3647_p10)   ;;  %v2490_v52 = vld [vmem:[%s3907_s24 + $0x38] sm:$0xff] (%p3647_p10)   ;;  %v2494_v15 = vld [vmem:[%s3907_s24 + $0x40] sm:$0xff] (%p3647_p10)   ;;  %s5022_s18 = sld [smem:[#allocation18_spill]] (%p3647_p10) }
 0x401   : > { %v2498_v17 = vld [vmem:[%s3907_s24 + $0x48] sm:$0xff] (%p3647_p10)   ;;  %v2502_v32 = vld [vmem:[%s3907_s24 + $0x50] sm:$0xff] (%p3647_p10)   ;;  %v2506_v29 = vld [vmem:[%s3907_s24 + $0x58] sm:$0xff] (%p3647_p10)  }
 0x402   : > { %v2510_v22 = vld [vmem:[%s3907_s24 + $0x60] sm:$0xff] (%p3647_p10)   ;;  %v2514_v25 = vld [vmem:[%s3907_s24 + $0x68] sm:$0xff] (%p3647_p10)   ;;  %v2518_v0 = vld [vmem:[%s3907_s24 + $0x70] sm:$0xff] (%p3647_p10)  }
 0x403   : > { %v2522_v2 = vld [vmem:[%s3907_s24 + $0x78] sm:$0xff]   ;;  %v2526_v6 = vld [vmem:[%s3907_s24 + $0x80] sm:$0xff]   ;;  %v2530_v55 = vld [vmem:[%s3907_s24 + $0x88] sm:$0xff]  }
 0x404   : > { %s3132_s11 = sshll.u32 %s5020_s15, 4  ;;  %v2534_v48 = vld [vmem:[%s3907_s24 + $0x90] sm:$0xff]   ;;  %v2538_v23 = vld [vmem:[%s3907_s24 + $0x98] sm:$0xff]   ;;  %v2542_v35 = vld [vmem:[%s3907_s24 + $0xa0] sm:$0xff]  }
 0x405   : > { %s3133_s27 = sshll.u32 %s5021_s17, 7  ;;  %v2546_v60 = vld [vmem:[%s3907_s24 + $0xa8] sm:$0xff]   ;;  %v2550_v10 = vld [vmem:[%s3907_s24 + $0xb0] sm:$0xff]   ;;  %v2554_v24 = vld [vmem:[%s3907_s24 + $0xb8] sm:$0xff]  }
 0x406   : > { %s2443_s10 = sadd.s32 %s3133_s27, %s3132_s11  ;;  %v2558_v26 = vld [vmem:[%s3907_s24 + $0xc0] sm:$0xff]   ;;  %v2562_v39 = vld [vmem:[%s3907_s24 + $0xc8] sm:$0xff]   ;;  %v2566_v45 = vld [vmem:[%s3907_s24 + $0xd0] sm:$0xff]  }
 0x407   : > { %s3134_s12 = sshll.u32 %s2443_s10, 2  ;;  %v2570_v34 = vld [vmem:[%s3907_s24 + $0xd8] sm:$0xff]   ;;  %v2574_v36 = vld [vmem:[%s3907_s24 + $0xe0] sm:$0xff]   ;;  %v2578_v57 = vld [vmem:[%s3907_s24 + $0xe8] sm:$0xff]  }
 0x408   : > { %s4902_s19 = scalar_lea.vmem %s5022_s18, %s3134_s12  ;;  %v2582_v1 = vld [vmem:[%s3907_s24 + $0xf0] sm:$0xff]   ;;  %v2586_v7 = vld [vmem:[%s3907_s24 + $0xf8] sm:$0xff]  }
 0x409   : > { %2463 = vst [vmem:[%s4902_s19] sm:$0xff] %v2462_v51   ;;  %2467 = vst [vmem:[%s4902_s19 + $0x8] sm:$0xff] %v2466_v4  }
 0x40a   : > { %2471 = vst [vmem:[%s4902_s19 + $0x10] sm:$0xff] %v2470_v11   ;;  %2475 = vst [vmem:[%s4902_s19 + $0x18] sm:$0xff] %v2474_v28  }
 0x40b   : > { %2479 = vst [vmem:[%s4902_s19 + $0x20] sm:$0xff] %v2478_v59   ;;  %2483 = vst [vmem:[%s4902_s19 + $0x28] sm:$0xff] %v2482_v33  }
 0x40c   : > { %2487 = vst [vmem:[%s4902_s19 + $0x30] sm:$0xff] %v2486_v61   ;;  %2491 = vst [vmem:[%s4902_s19 + $0x38] sm:$0xff] %v2490_v52  }
 0x40d   : > { %2495 = vst [vmem:[%s4902_s19 + $0x80] sm:$0xff] %v2494_v15   ;;  %2499 = vst [vmem:[%s4902_s19 + $0x88] sm:$0xff] %v2498_v17  }
 0x40e   : > { %2503 = vst [vmem:[%s4902_s19 + $0x90] sm:$0xff] %v2502_v32   ;;  %2507 = vst [vmem:[%s4902_s19 + $0x98] sm:$0xff] %v2506_v29  }
 0x40f   : > { %2511 = vst [vmem:[%s4902_s19 + $0xa0] sm:$0xff] %v2510_v22   ;;  %2515 = vst [vmem:[%s4902_s19 + $0xa8] sm:$0xff] %v2514_v25  }
 0x410   : > { %2519 = vst [vmem:[%s4902_s19 + $0xb0] sm:$0xff] %v2518_v0   ;;  %2523 = vst [vmem:[%s4902_s19 + $0xb8] sm:$0xff] %v2522_v2  }
 0x411   : > { %2527 = vst [vmem:[%s4902_s19 + $0x100] sm:$0xff] %v2526_v6   ;;  %2531 = vst [vmem:[%s4902_s19 + $0x108] sm:$0xff] %v2530_v55  }
 0x412   : > { %2535 = vst [vmem:[%s4902_s19 + $0x110] sm:$0xff] %v2534_v48   ;;  %2539 = vst [vmem:[%s4902_s19 + $0x118] sm:$0xff] %v2538_v23  }
 0x413   : > { %2543 = vst [vmem:[%s4902_s19 + $0x120] sm:$0xff] %v2542_v35   ;;  %2547 = vst [vmem:[%s4902_s19 + $0x128] sm:$0xff] %v2546_v60  }
 0x414   : > { %2551 = vst [vmem:[%s4902_s19 + $0x130] sm:$0xff] %v2550_v10   ;;  %2555 = vst [vmem:[%s4902_s19 + $0x138] sm:$0xff] %v2554_v24  }
 0x415   : > { %2559 = vst [vmem:[%s4902_s19 + $0x180] sm:$0xff] %v2558_v26   ;;  %2563 = vst [vmem:[%s4902_s19 + $0x188] sm:$0xff] %v2562_v39  }
 0x416   : > { %2567 = vst [vmem:[%s4902_s19 + $0x190] sm:$0xff] %v2566_v45   ;;  %2571 = vst [vmem:[%s4902_s19 + $0x198] sm:$0xff] %v2570_v34  }
 0x417   : > { %2575 = vst [vmem:[%s4902_s19 + $0x1a0] sm:$0xff] %v2574_v36   ;;  %2579 = vst [vmem:[%s4902_s19 + $0x1a8] sm:$0xff] %v2578_v57  }
 0x418   : > { %2583 = vst [vmem:[%s4902_s19 + $0x1b0] sm:$0xff] %v2582_v1   ;;  %2587 = vst [vmem:[%s4902_s19 + $0x1b8] sm:$0xff] %v2586_v7  }
 0x419 PF: > { %s22_s8 = sadd.s32 1, %s3511_s8   ;;  %s5023_s20 = sld [smem:[#allocation13_spill]] }
 0x41a   : > { %p19_p1 = scmp.ge.s32.totalorder %s22_s8, 6   ;;  %s5024_s24 = smov %s3487_s25 }
 0x41b   : > { %s5025_s25 = smov %s3491_s26  ;;  %s5026_s26 = smov %s3660_s7 }
 0x41c   : > { %s5027_s27 = smov %s3503_s29  ;;  %s5028_s28 = smov %s3507_s30 }
 0x41d   : > { %s5030_s30 = smov %s5036_s22  ;;  %21 = sbr.rel (!%p19_p1) target bundleno = 11 (0xb), region = 240 }
 0x41f   : > { %s5029_s29 = smov %s5023_s20 }
 0x422   :  { %2765 = vsyncpa [#allocation3], 1 }
 0x423   :  { %2767 = vsyncpa [#allocation3 + $0x1], 1 }
 0x424   :  { %2768 = vsyncpa [#allocation5], 1 }

</bundles_post_ra>
